<compile_context>
chip_gen: v7x
topology: tpu7x:2x2x1
jax: 0.10.0
libtpu: 0.0.40
codegen_flags: <defaults>
</compile_context>

<pallas_src>
import functools

import jax
import jax.numpy as jnp
from jax import lax
from jax.experimental import pallas as pl
from jax.experimental.pallas import tpu as pltpu


def _convt_tanh_kernel(x_ref, w_ref, b_ref, o_ref, *, k, dil, cin, cout, Ho, Wo, nb):
    # x_ref: (nb, Cin, Hp, Wp)   VMEM  zero-dilated (+edge-adjusted) input slab
    # w_ref: (Cin*Cout*k*k,)     SMEM  raw PyTorch weight, flattened (Cin, Cout, kH, kW)
    # b_ref: (Cout,)             SMEM
    # o_ref: (nb, Cout, Ho, Wo)  VMEM
    for n in range(nb):
        # Hoist the k*k*Cin shifted patches (independent of the output channel).
        patches = []
        for ci in range(cin):
            for kh in range(k):
                for kw in range(k):
                    patches.append(
                        x_ref[n, ci, pl.ds(kh * dil, Ho), pl.ds(kw * dil, Wo)]
                        .astype(jnp.float32))

        for co in range(cout):
            acc = jnp.full((Ho, Wo), b_ref[co], jnp.float32)
            t = 0
            for ci in range(cin):
                for kh in range(k):
                    for kw in range(k):
                        # spatially flipped weight, read as one SMEM scalar (static index)
                        widx = ((ci * cout + co) * k + (k - 1 - kh)) * k + (k - 1 - kw)
                        acc = acc + patches[t] * w_ref[widx]
                        t += 1
            o_ref[n, co, :, :] = jnp.tanh(acc).astype(o_ref.dtype)


@functools.partial(
    jax.jit, static_argnames=("stride", "padding", "dilation", "batches_per_step"))
def _convt_tanh(x_nchw, weight, bias, *, stride, padding, dilation, batches_per_step):
    """weight layout matches PyTorch ConvTranspose2d: (Cin, Cout, kH, kW)."""
    N, Cin, H, W = x_nchw.shape
    Cin_w, Cout, kH, kW = weight.shape
    assert Cin == Cin_w and kH == kW
    k, s, p, d = kH, stride, padding, dilation

    Ho = (H - 1) * s - 2 * p + d * (k - 1) + 1
    Wo = (W - 1) * s - 2 * p + d * (k - 1) + 1
    pe = d * (k - 1) - p      # edge padding of the stride-1 equivalent conv (0 here)

    # (s-1) interior zeros + edge pad/crop in ONE pad op, staying NCHW.  With
    # allow_input_fusion below, XLA may fold this directly into the pallas
    # input fetch (no standalone dispatch / HBM round-trip).
    xp = lax.pad(x_nchw, jnp.zeros((), x_nchw.dtype),
                 ((0, 0, 0), (0, 0, 0), (pe, pe, s - 1), (pe, pe, s - 1)))
    Hp, Wp = xp.shape[2], xp.shape[3]
    assert Hp == (k - 1) * d + Ho and Wp == (k - 1) * d + Wo

    nb = batches_per_step
    assert N % nb == 0
    nsteps = N // nb

    w_flat = weight.reshape(-1)              # contiguous -> free reshape
    kern = functools.partial(_convt_tanh_kernel, k=k, dil=d, cin=Cin, cout=Cout,
                             Ho=Ho, Wo=Wo, nb=nb)

    return pl.pallas_call(
        kern,
        out_shape=jax.ShapeDtypeStruct((N, Cout, Ho, Wo), x_nchw.dtype),
        grid=(nsteps,),
        in_specs=[
            pl.BlockSpec((nb, Cin, Hp, Wp), lambda g: (g, 0, 0, 0)),
            pl.BlockSpec(memory_space=pltpu.MemorySpace.SMEM),   # weights (scalars)
            pl.BlockSpec(memory_space=pltpu.MemorySpace.SMEM),   # bias (scalars)
        ],
        out_specs=pl.BlockSpec((nb, Cout, Ho, Wo), lambda g: (g, 0, 0, 0)),
        compiler_params=pltpu.CompilerParams(
            dimension_semantics=("parallel",),
            allow_input_fusion=[True, False, False]),
    )(xp, w_flat, bias)


def _pick_batches_per_step(n):
    """Whole batch in one grid step on single-TC chips; split across 2 TCs otherwise."""
    try:
        kind = jax.devices()[0].device_kind.lower()
    except Exception:
        kind = ""
    two_tc = ("v7" in kind) or ("7x" in kind) or ("v4" in kind) or ("v5p" in kind)
    if two_tc and n >= 2 and n % 2 == 0:
        return n // 2          # two grid steps -> one per TensorCore
    return n                   # v5e / v6e: one big step, minimal fixed overhead


def conv_transpose2d_tanh(x_nchw, weight, bias, *, stride, padding, dilation):
    return _convt_tanh(
        x_nchw, weight, bias, stride=stride, padding=padding, dilation=dilation,
        batches_per_step=_pick_batches_per_step(x_nchw.shape[0]))


def _reference(x_nchw, weight, bias, *, stride, padding, dilation):
    """Pure-JAX reference for ConvTranspose2d + tanh (sanity check)."""
    Cin, Cout, k, _ = weight.shape
    w_oihw = jnp.transpose(weight[:, :, ::-1, ::-1], (1, 0, 2, 3))
    pe = dilation * (k - 1) - padding
    y = lax.conv_general_dilated(
        x_nchw, w_oihw,
        window_strides=(1, 1),
        padding=[(pe, pe), (pe, pe)],
        lhs_dilation=(stride, stride),
        rhs_dilation=(dilation, dilation),
        dimension_numbers=("NCHW", "OIHW", "NCHW"))
    y = y + bias[None, :, None, None]
    return jnp.tanh(y)


if __name__ == "__main__":
    key = jax.random.PRNGKey(0)
    k_x, k_w, k_b = jax.random.split(key, 3)

    # Small input consistent with the module: (N, Cin=3, H, W)
    x = jax.random.normal(k_x, (2, 3, 11, 15), dtype=jnp.float32)
    # ConvTranspose2d(3, 8, 2) parameters: weight (3, 8, 2, 2), bias (8,)
    weight = 0.2 * jax.random.normal(k_w, (3, 8, 2, 2), dtype=jnp.float32)
    bias = 0.1 * jax.random.normal(k_b, (8,), dtype=jnp.float32)

    out = conv_transpose2d_tanh(x, weight, bias, stride=2, padding=2, dilation=2)
    out = jax.block_until_ready(out)

    ref = _reference(x, weight, bias, stride=2, padding=2, dilation=2)
    assert out.shape == ref.shape, (out.shape, ref.shape)
    assert jnp.allclose(out, ref, atol=2e-5, rtol=2e-5), float(jnp.abs(out - ref).max())

    print("KERNEL_OK")
</pallas_src>

<mosaic_0001>
module attributes {stable_mosaic.version = 11 : i64} {
  func.func @_convt_tanh_kernel(%arg0: i32, %arg1: memref<2x3x21x29xf32, #tpu.memory_space<vmem>>, %arg2: memref<96xf32, #tpu.memory_space<smem>>, %arg3: memref<8xf32, #tpu.memory_space<smem>>, %arg4: memref<2x8x19x27xf32, #tpu.memory_space<vmem>>) attributes {dimension_semantics = [#tpu.dimension_semantics<parallel>], iteration_bounds = array<i64: 1>, scalar_prefetch = 0 : i64, scratch_operands = 0 : i64, tpu.core_type = #tpu.core_type<tc>, window_params = [{transform_indices = @transform_0, window_bounds = array<i64: 2, 3, 21, 29>}, {transform_indices = @transform_1, window_bounds = array<i64: 96>}, {transform_indices = @transform_2, window_bounds = array<i64: 8>}, {transform_indices = @transform_3, window_bounds = array<i64: 2, 8, 19, 27>}]} {
    %c0 = arith.constant 0 : index
    %c0_0 = arith.constant 0 : index
    %c0_1 = arith.constant 0 : index
    %c0_2 = arith.constant 0 : index
    %0 = vector.load %arg1[%c0, %c0_0, %c0_1, %c0_2] : memref<2x3x21x29xf32, #tpu.memory_space<vmem>>, vector<1x1x19x27xf32>
    %1 = vector.shape_cast %0 : vector<1x1x19x27xf32> to vector<19x27xf32>
    %c0_3 = arith.constant 0 : index
    %c0_4 = arith.constant 0 : index
    %c0_5 = arith.constant 0 : index
    %c2 = arith.constant 2 : index
    %2 = vector.load %arg1[%c0_3, %c0_4, %c0_5, %c2] : memref<2x3x21x29xf32, #tpu.memory_space<vmem>>, vector<1x1x19x27xf32>
    %3 = vector.shape_cast %2 : vector<1x1x19x27xf32> to vector<19x27xf32>
    %c0_6 = arith.constant 0 : index
    %c0_7 = arith.constant 0 : index
    %c2_8 = arith.constant 2 : index
    %c0_9 = arith.constant 0 : index
    %4 = vector.load %arg1[%c0_6, %c0_7, %c2_8, %c0_9] : memref<2x3x21x29xf32, #tpu.memory_space<vmem>>, vector<1x1x19x27xf32>
    %5 = vector.shape_cast %4 : vector<1x1x19x27xf32> to vector<19x27xf32>
    %c0_10 = arith.constant 0 : index
    %c0_11 = arith.constant 0 : index
    %c2_12 = arith.constant 2 : index
    %c2_13 = arith.constant 2 : index
    %6 = vector.load %arg1[%c0_10, %c0_11, %c2_12, %c2_13] : memref<2x3x21x29xf32, #tpu.memory_space<vmem>>, vector<1x1x19x27xf32>
    %7 = vector.shape_cast %6 : vector<1x1x19x27xf32> to vector<19x27xf32>
    %c0_14 = arith.constant 0 : index
    %c1 = arith.constant 1 : index
    %c0_15 = arith.constant 0 : index
    %c0_16 = arith.constant 0 : index
    %8 = vector.load %arg1[%c0_14, %c1, %c0_15, %c0_16] : memref<2x3x21x29xf32, #tpu.memory_space<vmem>>, vector<1x1x19x27xf32>
    %9 = vector.shape_cast %8 : vector<1x1x19x27xf32> to vector<19x27xf32>
    %c0_17 = arith.constant 0 : index
    %c1_18 = arith.constant 1 : index
    %c0_19 = arith.constant 0 : index
    %c2_20 = arith.constant 2 : index
    %10 = vector.load %arg1[%c0_17, %c1_18, %c0_19, %c2_20] : memref<2x3x21x29xf32, #tpu.memory_space<vmem>>, vector<1x1x19x27xf32>
    %11 = vector.shape_cast %10 : vector<1x1x19x27xf32> to vector<19x27xf32>
    %c0_21 = arith.constant 0 : index
    %c1_22 = arith.constant 1 : index
    %c2_23 = arith.constant 2 : index
    %c0_24 = arith.constant 0 : index
    %12 = vector.load %arg1[%c0_21, %c1_22, %c2_23, %c0_24] : memref<2x3x21x29xf32, #tpu.memory_space<vmem>>, vector<1x1x19x27xf32>
    %13 = vector.shape_cast %12 : vector<1x1x19x27xf32> to vector<19x27xf32>
    %c0_25 = arith.constant 0 : index
    %c1_26 = arith.constant 1 : index
    %c2_27 = arith.constant 2 : index
    %c2_28 = arith.constant 2 : index
    %14 = vector.load %arg1[%c0_25, %c1_26, %c2_27, %c2_28] : memref<2x3x21x29xf32, #tpu.memory_space<vmem>>, vector<1x1x19x27xf32>
    %15 = vector.shape_cast %14 : vector<1x1x19x27xf32> to vector<19x27xf32>
    %c0_29 = arith.constant 0 : index
    %c2_30 = arith.constant 2 : index
    %c0_31 = arith.constant 0 : index
    %c0_32 = arith.constant 0 : index
    %16 = vector.load %arg1[%c0_29, %c2_30, %c0_31, %c0_32] : memref<2x3x21x29xf32, #tpu.memory_space<vmem>>, vector<1x1x19x27xf32>
    %17 = vector.shape_cast %16 : vector<1x1x19x27xf32> to vector<19x27xf32>
    %c0_33 = arith.constant 0 : index
    %c2_34 = arith.constant 2 : index
    %c0_35 = arith.constant 0 : index
    %c2_36 = arith.constant 2 : index
    %18 = vector.load %arg1[%c0_33, %c2_34, %c0_35, %c2_36] : memref<2x3x21x29xf32, #tpu.memory_space<vmem>>, vector<1x1x19x27xf32>
    %19 = vector.shape_cast %18 : vector<1x1x19x27xf32> to vector<19x27xf32>
    %c0_37 = arith.constant 0 : index
    %c2_38 = arith.constant 2 : index
    %c2_39 = arith.constant 2 : index
    %c0_40 = arith.constant 0 : index
    %20 = vector.load %arg1[%c0_37, %c2_38, %c2_39, %c0_40] : memref<2x3x21x29xf32, #tpu.memory_space<vmem>>, vector<1x1x19x27xf32>
    %21 = vector.shape_cast %20 : vector<1x1x19x27xf32> to vector<19x27xf32>
    %c0_41 = arith.constant 0 : index
    %c2_42 = arith.constant 2 : index
    %c2_43 = arith.constant 2 : index
    %c2_44 = arith.constant 2 : index
    %22 = vector.load %arg1[%c0_41, %c2_42, %c2_43, %c2_44] : memref<2x3x21x29xf32, #tpu.memory_space<vmem>>, vector<1x1x19x27xf32>
    %23 = vector.shape_cast %22 : vector<1x1x19x27xf32> to vector<19x27xf32>
    %c0_45 = arith.constant 0 : index
    %24 = memref.load %arg3[%c0_45] : memref<8xf32, #tpu.memory_space<smem>>
    %25 = vector.broadcast %24 : f32 to vector<19x27xf32>
    %c3 = arith.constant 3 : index
    %26 = memref.load %arg2[%c3] : memref<96xf32, #tpu.memory_space<smem>>
    %27 = vector.broadcast %26 : f32 to vector<19x27xf32>
    %28 = arith.mulf %1, %27 : vector<19x27xf32>
    %29 = arith.addf %25, %28 : vector<19x27xf32>
    %c2_46 = arith.constant 2 : index
    %30 = memref.load %arg2[%c2_46] : memref<96xf32, #tpu.memory_space<smem>>
    %31 = vector.broadcast %30 : f32 to vector<19x27xf32>
    %32 = arith.mulf %3, %31 : vector<19x27xf32>
    %33 = arith.addf %29, %32 : vector<19x27xf32>
    %c1_47 = arith.constant 1 : index
    %34 = memref.load %arg2[%c1_47] : memref<96xf32, #tpu.memory_space<smem>>
    %35 = vector.broadcast %34 : f32 to vector<19x27xf32>
    %36 = arith.mulf %5, %35 : vector<19x27xf32>
    %37 = arith.addf %33, %36 : vector<19x27xf32>
    %c0_48 = arith.constant 0 : index
    %38 = memref.load %arg2[%c0_48] : memref<96xf32, #tpu.memory_space<smem>>
    %39 = vector.broadcast %38 : f32 to vector<19x27xf32>
    %40 = arith.mulf %7, %39 : vector<19x27xf32>
    %41 = arith.addf %37, %40 : vector<19x27xf32>
    %c35 = arith.constant 35 : index
    %42 = memref.load %arg2[%c35] : memref<96xf32, #tpu.memory_space<smem>>
    %43 = vector.broadcast %42 : f32 to vector<19x27xf32>
    %44 = arith.mulf %9, %43 : vector<19x27xf32>
    %45 = arith.addf %41, %44 : vector<19x27xf32>
    %c34 = arith.constant 34 : index
    %46 = memref.load %arg2[%c34] : memref<96xf32, #tpu.memory_space<smem>>
    %47 = vector.broadcast %46 : f32 to vector<19x27xf32>
    %48 = arith.mulf %11, %47 : vector<19x27xf32>
    %49 = arith.addf %45, %48 : vector<19x27xf32>
    %c33 = arith.constant 33 : index
    %50 = memref.load %arg2[%c33] : memref<96xf32, #tpu.memory_space<smem>>
    %51 = vector.broadcast %50 : f32 to vector<19x27xf32>
    %52 = arith.mulf %13, %51 : vector<19x27xf32>
    %53 = arith.addf %49, %52 : vector<19x27xf32>
    %c32 = arith.constant 32 : index
    %54 = memref.load %arg2[%c32] : memref<96xf32, #tpu.memory_space<smem>>
    %55 = vector.broadcast %54 : f32 to vector<19x27xf32>
    %56 = arith.mulf %15, %55 : vector<19x27xf32>
    %57 = arith.addf %53, %56 : vector<19x27xf32>
    %c67 = arith.constant 67 : index
    %58 = memref.load %arg2[%c67] : memref<96xf32, #tpu.memory_space<smem>>
    %59 = vector.broadcast %58 : f32 to vector<19x27xf32>
    %60 = arith.mulf %17, %59 : vector<19x27xf32>
    %61 = arith.addf %57, %60 : vector<19x27xf32>
    %c66 = arith.constant 66 : index
    %62 = memref.load %arg2[%c66] : memref<96xf32, #tpu.memory_space<smem>>
    %63 = vector.broadcast %62 : f32 to vector<19x27xf32>
    %64 = arith.mulf %19, %63 : vector<19x27xf32>
    %65 = arith.addf %61, %64 : vector<19x27xf32>
    %c65 = arith.constant 65 : index
    %66 = memref.load %arg2[%c65] : memref<96xf32, #tpu.memory_space<smem>>
    %67 = vector.broadcast %66 : f32 to vector<19x27xf32>
    %68 = arith.mulf %21, %67 : vector<19x27xf32>
    %69 = arith.addf %65, %68 : vector<19x27xf32>
    %c64 = arith.constant 64 : index
    %70 = memref.load %arg2[%c64] : memref<96xf32, #tpu.memory_space<smem>>
    %71 = vector.broadcast %70 : f32 to vector<19x27xf32>
    %72 = arith.mulf %23, %71 : vector<19x27xf32>
    %73 = arith.addf %69, %72 : vector<19x27xf32>
    %74 = math.tanh %73 : vector<19x27xf32>
    %c0_49 = arith.constant 0 : index
    %c0_50 = arith.constant 0 : index
    %c0_51 = arith.constant 0 : index
    %c0_52 = arith.constant 0 : index
    %75 = vector.load %arg4[%c0_49, %c0_50, %c0_51, %c0_52] : memref<2x8x19x27xf32, #tpu.memory_space<vmem>>, vector<1x1x19x27xf32>
    %76 = vector.shape_cast %75 : vector<1x1x19x27xf32> to vector<19x27xf32>
    %77 = vector.shape_cast %74 : vector<19x27xf32> to vector<1x1x19x27xf32>
    tpu.vector_store %arg4[%c0_49, %c0_50, %c0_51, %c0_52], %77 {strides = array<i32>} : memref<2x8x19x27xf32, #tpu.memory_space<vmem>>, vector<1x1x19x27xf32>,
    %c1_53 = arith.constant 1 : index
    %78 = memref.load %arg3[%c1_53] : memref<8xf32, #tpu.memory_space<smem>>
    %79 = vector.broadcast %78 : f32 to vector<19x27xf32>
    %c7 = arith.constant 7 : index
    %80 = memref.load %arg2[%c7] : memref<96xf32, #tpu.memory_space<smem>>
    %81 = vector.broadcast %80 : f32 to vector<19x27xf32>
    %82 = arith.mulf %1, %81 : vector<19x27xf32>
    %83 = arith.addf %79, %82 : vector<19x27xf32>
    %c6 = arith.constant 6 : index
    %84 = memref.load %arg2[%c6] : memref<96xf32, #tpu.memory_space<smem>>
    %85 = vector.broadcast %84 : f32 to vector<19x27xf32>
    %86 = arith.mulf %3, %85 : vector<19x27xf32>
    %87 = arith.addf %83, %86 : vector<19x27xf32>
    %c5 = arith.constant 5 : index
    %88 = memref.load %arg2[%c5] : memref<96xf32, #tpu.memory_space<smem>>
    %89 = vector.broadcast %88 : f32 to vector<19x27xf32>
    %90 = arith.mulf %5, %89 : vector<19x27xf32>
    %91 = arith.addf %87, %90 : vector<19x27xf32>
    %c4 = arith.constant 4 : index
    %92 = memref.load %arg2[%c4] : memref<96xf32, #tpu.memory_space<smem>>
    %93 = vector.broadcast %92 : f32 to vector<19x27xf32>
    %94 = arith.mulf %7, %93 : vector<19x27xf32>
    %95 = arith.addf %91, %94 : vector<19x27xf32>
    %c39 = arith.constant 39 : index
    %96 = memref.load %arg2[%c39] : memref<96xf32, #tpu.memory_space<smem>>
    %97 = vector.broadcast %96 : f32 to vector<19x27xf32>
    %98 = arith.mulf %9, %97 : vector<19x27xf32>
    %99 = arith.addf %95, %98 : vector<19x27xf32>
    %c38 = arith.constant 38 : index
    %100 = memref.load %arg2[%c38] : memref<96xf32, #tpu.memory_space<smem>>
    %101 = vector.broadcast %100 : f32 to vector<19x27xf32>
    %102 = arith.mulf %11, %101 : vector<19x27xf32>
    %103 = arith.addf %99, %102 : vector<19x27xf32>
    %c37 = arith.constant 37 : index
    %104 = memref.load %arg2[%c37] : memref<96xf32, #tpu.memory_space<smem>>
    %105 = vector.broadcast %104 : f32 to vector<19x27xf32>
    %106 = arith.mulf %13, %105 : vector<19x27xf32>
    %107 = arith.addf %103, %106 : vector<19x27xf32>
    %c36 = arith.constant 36 : index
    %108 = memref.load %arg2[%c36] : memref<96xf32, #tpu.memory_space<smem>>
    %109 = vector.broadcast %108 : f32 to vector<19x27xf32>
    %110 = arith.mulf %15, %109 : vector<19x27xf32>
    %111 = arith.addf %107, %110 : vector<19x27xf32>
    %c71 = arith.constant 71 : index
    %112 = memref.load %arg2[%c71] : memref<96xf32, #tpu.memory_space<smem>>
    %113 = vector.broadcast %112 : f32 to vector<19x27xf32>
    %114 = arith.mulf %17, %113 : vector<19x27xf32>
    %115 = arith.addf %111, %114 : vector<19x27xf32>
    %c70 = arith.constant 70 : index
    %116 = memref.load %arg2[%c70] : memref<96xf32, #tpu.memory_space<smem>>
    %117 = vector.broadcast %116 : f32 to vector<19x27xf32>
    %118 = arith.mulf %19, %117 : vector<19x27xf32>
    %119 = arith.addf %115, %118 : vector<19x27xf32>
    %c69 = arith.constant 69 : index
    %120 = memref.load %arg2[%c69] : memref<96xf32, #tpu.memory_space<smem>>
    %121 = vector.broadcast %120 : f32 to vector<19x27xf32>
    %122 = arith.mulf %21, %121 : vector<19x27xf32>
    %123 = arith.addf %119, %122 : vector<19x27xf32>
    %c68 = arith.constant 68 : index
    %124 = memref.load %arg2[%c68] : memref<96xf32, #tpu.memory_space<smem>>
    %125 = vector.broadcast %124 : f32 to vector<19x27xf32>
    %126 = arith.mulf %23, %125 : vector<19x27xf32>
    %127 = arith.addf %123, %126 : vector<19x27xf32>
    %128 = math.tanh %127 : vector<19x27xf32>
    %c0_54 = arith.constant 0 : index
    %c1_55 = arith.constant 1 : index
    %c0_56 = arith.constant 0 : index
    %c0_57 = arith.constant 0 : index
    %129 = vector.load %arg4[%c0_54, %c1_55, %c0_56, %c0_57] : memref<2x8x19x27xf32, #tpu.memory_space<vmem>>, vector<1x1x19x27xf32>
    %130 = vector.shape_cast %129 : vector<1x1x19x27xf32> to vector<19x27xf32>
    %131 = vector.shape_cast %128 : vector<19x27xf32> to vector<1x1x19x27xf32>
    tpu.vector_store %arg4[%c0_54, %c1_55, %c0_56, %c0_57], %131 {strides = array<i32>} : memref<2x8x19x27xf32, #tpu.memory_space<vmem>>, vector<1x1x19x27xf32>,
    %c2_58 = arith.constant 2 : index
    %132 = memref.load %arg3[%c2_58] : memref<8xf32, #tpu.memory_space<smem>>
    %133 = vector.broadcast %132 : f32 to vector<19x27xf32>
    %c11 = arith.constant 11 : index
    %134 = memref.load %arg2[%c11] : memref<96xf32, #tpu.memory_space<smem>>
    %135 = vector.broadcast %134 : f32 to vector<19x27xf32>
    %136 = arith.mulf %1, %135 : vector<19x27xf32>
    %137 = arith.addf %133, %136 : vector<19x27xf32>
    %c10 = arith.constant 10 : index
    %138 = memref.load %arg2[%c10] : memref<96xf32, #tpu.memory_space<smem>>
    %139 = vector.broadcast %138 : f32 to vector<19x27xf32>
    %140 = arith.mulf %3, %139 : vector<19x27xf32>
    %141 = arith.addf %137, %140 : vector<19x27xf32>
    %c9 = arith.constant 9 : index
    %142 = memref.load %arg2[%c9] : memref<96xf32, #tpu.memory_space<smem>>
    %143 = vector.broadcast %142 : f32 to vector<19x27xf32>
    %144 = arith.mulf %5, %143 : vector<19x27xf32>
    %145 = arith.addf %141, %144 : vector<19x27xf32>
    %c8 = arith.constant 8 : index
    %146 = memref.load %arg2[%c8] : memref<96xf32, #tpu.memory_space<smem>>
    %147 = vector.broadcast %146 : f32 to vector<19x27xf32>
    %148 = arith.mulf %7, %147 : vector<19x27xf32>
    %149 = arith.addf %145, %148 : vector<19x27xf32>
    %c43 = arith.constant 43 : index
    %150 = memref.load %arg2[%c43] : memref<96xf32, #tpu.memory_space<smem>>
    %151 = vector.broadcast %150 : f32 to vector<19x27xf32>
    %152 = arith.mulf %9, %151 : vector<19x27xf32>
    %153 = arith.addf %149, %152 : vector<19x27xf32>
    %c42 = arith.constant 42 : index
    %154 = memref.load %arg2[%c42] : memref<96xf32, #tpu.memory_space<smem>>
    %155 = vector.broadcast %154 : f32 to vector<19x27xf32>
    %156 = arith.mulf %11, %155 : vector<19x27xf32>
    %157 = arith.addf %153, %156 : vector<19x27xf32>
    %c41 = arith.constant 41 : index
    %158 = memref.load %arg2[%c41] : memref<96xf32, #tpu.memory_space<smem>>
    %159 = vector.broadcast %158 : f32 to vector<19x27xf32>
    %160 = arith.mulf %13, %159 : vector<19x27xf32>
    %161 = arith.addf %157, %160 : vector<19x27xf32>
    %c40 = arith.constant 40 : index
    %162 = memref.load %arg2[%c40] : memref<96xf32, #tpu.memory_space<smem>>
    %163 = vector.broadcast %162 : f32 to vector<19x27xf32>
    %164 = arith.mulf %15, %163 : vector<19x27xf32>
    %165 = arith.addf %161, %164 : vector<19x27xf32>
    %c75 = arith.constant 75 : index
    %166 = memref.load %arg2[%c75] : memref<96xf32, #tpu.memory_space<smem>>
    %167 = vector.broadcast %166 : f32 to vector<19x27xf32>
    %168 = arith.mulf %17, %167 : vector<19x27xf32>
    %169 = arith.addf %165, %168 : vector<19x27xf32>
    %c74 = arith.constant 74 : index
    %170 = memref.load %arg2[%c74] : memref<96xf32, #tpu.memory_space<smem>>
    %171 = vector.broadcast %170 : f32 to vector<19x27xf32>
    %172 = arith.mulf %19, %171 : vector<19x27xf32>
    %173 = arith.addf %169, %172 : vector<19x27xf32>
    %c73 = arith.constant 73 : index
    %174 = memref.load %arg2[%c73] : memref<96xf32, #tpu.memory_space<smem>>
    %175 = vector.broadcast %174 : f32 to vector<19x27xf32>
    %176 = arith.mulf %21, %175 : vector<19x27xf32>
    %177 = arith.addf %173, %176 : vector<19x27xf32>
    %c72 = arith.constant 72 : index
    %178 = memref.load %arg2[%c72] : memref<96xf32, #tpu.memory_space<smem>>
    %179 = vector.broadcast %178 : f32 to vector<19x27xf32>
    %180 = arith.mulf %23, %179 : vector<19x27xf32>
    %181 = arith.addf %177, %180 : vector<19x27xf32>
    %182 = math.tanh %181 : vector<19x27xf32>
    %c0_59 = arith.constant 0 : index
    %c2_60 = arith.constant 2 : index
    %c0_61 = arith.constant 0 : index
    %c0_62 = arith.constant 0 : index
    %183 = vector.load %arg4[%c0_59, %c2_60, %c0_61, %c0_62] : memref<2x8x19x27xf32, #tpu.memory_space<vmem>>, vector<1x1x19x27xf32>
    %184 = vector.shape_cast %183 : vector<1x1x19x27xf32> to vector<19x27xf32>
    %185 = vector.shape_cast %182 : vector<19x27xf32> to vector<1x1x19x27xf32>
    tpu.vector_store %arg4[%c0_59, %c2_60, %c0_61, %c0_62], %185 {strides = array<i32>} : memref<2x8x19x27xf32, #tpu.memory_space<vmem>>, vector<1x1x19x27xf32>,
    %c3_63 = arith.constant 3 : index
    %186 = memref.load %arg3[%c3_63] : memref<8xf32, #tpu.memory_space<smem>>
    %187 = vector.broadcast %186 : f32 to vector<19x27xf32>
    %c15 = arith.constant 15 : index
    %188 = memref.load %arg2[%c15] : memref<96xf32, #tpu.memory_space<smem>>
    %189 = vector.broadcast %188 : f32 to vector<19x27xf32>
    %190 = arith.mulf %1, %189 : vector<19x27xf32>
    %191 = arith.addf %187, %190 : vector<19x27xf32>
    %c14 = arith.constant 14 : index
    %192 = memref.load %arg2[%c14] : memref<96xf32, #tpu.memory_space<smem>>
    %193 = vector.broadcast %192 : f32 to vector<19x27xf32>
    %194 = arith.mulf %3, %193 : vector<19x27xf32>
    %195 = arith.addf %191, %194 : vector<19x27xf32>
    %c13 = arith.constant 13 : index
    %196 = memref.load %arg2[%c13] : memref<96xf32, #tpu.memory_space<smem>>
    %197 = vector.broadcast %196 : f32 to vector<19x27xf32>
    %198 = arith.mulf %5, %197 : vector<19x27xf32>
    %199 = arith.addf %195, %198 : vector<19x27xf32>
    %c12 = arith.constant 12 : index
    %200 = memref.load %arg2[%c12] : memref<96xf32, #tpu.memory_space<smem>>
    %201 = vector.broadcast %200 : f32 to vector<19x27xf32>
    %202 = arith.mulf %7, %201 : vector<19x27xf32>
    %203 = arith.addf %199, %202 : vector<19x27xf32>
    %c47 = arith.constant 47 : index
    %204 = memref.load %arg2[%c47] : memref<96xf32, #tpu.memory_space<smem>>
    %205 = vector.broadcast %204 : f32 to vector<19x27xf32>
    %206 = arith.mulf %9, %205 : vector<19x27xf32>
    %207 = arith.addf %203, %206 : vector<19x27xf32>
    %c46 = arith.constant 46 : index
    %208 = memref.load %arg2[%c46] : memref<96xf32, #tpu.memory_space<smem>>
    %209 = vector.broadcast %208 : f32 to vector<19x27xf32>
    %210 = arith.mulf %11, %209 : vector<19x27xf32>
    %211 = arith.addf %207, %210 : vector<19x27xf32>
    %c45 = arith.constant 45 : index
    %212 = memref.load %arg2[%c45] : memref<96xf32, #tpu.memory_space<smem>>
    %213 = vector.broadcast %212 : f32 to vector<19x27xf32>
    %214 = arith.mulf %13, %213 : vector<19x27xf32>
    %215 = arith.addf %211, %214 : vector<19x27xf32>
    %c44 = arith.constant 44 : index
    %216 = memref.load %arg2[%c44] : memref<96xf32, #tpu.memory_space<smem>>
    %217 = vector.broadcast %216 : f32 to vector<19x27xf32>
    %218 = arith.mulf %15, %217 : vector<19x27xf32>
    %219 = arith.addf %215, %218 : vector<19x27xf32>
    %c79 = arith.constant 79 : index
    %220 = memref.load %arg2[%c79] : memref<96xf32, #tpu.memory_space<smem>>
    %221 = vector.broadcast %220 : f32 to vector<19x27xf32>
    %222 = arith.mulf %17, %221 : vector<19x27xf32>
    %223 = arith.addf %219, %222 : vector<19x27xf32>
    %c78 = arith.constant 78 : index
    %224 = memref.load %arg2[%c78] : memref<96xf32, #tpu.memory_space<smem>>
    %225 = vector.broadcast %224 : f32 to vector<19x27xf32>
    %226 = arith.mulf %19, %225 : vector<19x27xf32>
    %227 = arith.addf %223, %226 : vector<19x27xf32>
    %c77 = arith.constant 77 : index
    %228 = memref.load %arg2[%c77] : memref<96xf32, #tpu.memory_space<smem>>
    %229 = vector.broadcast %228 : f32 to vector<19x27xf32>
    %230 = arith.mulf %21, %229 : vector<19x27xf32>
    %231 = arith.addf %227, %230 : vector<19x27xf32>
    %c76 = arith.constant 76 : index
    %232 = memref.load %arg2[%c76] : memref<96xf32, #tpu.memory_space<smem>>
    %233 = vector.broadcast %232 : f32 to vector<19x27xf32>
    %234 = arith.mulf %23, %233 : vector<19x27xf32>
    %235 = arith.addf %231, %234 : vector<19x27xf32>
    %236 = math.tanh %235 : vector<19x27xf32>
    %c0_64 = arith.constant 0 : index
    %c3_65 = arith.constant 3 : index
    %c0_66 = arith.constant 0 : index
    %c0_67 = arith.constant 0 : index
    %237 = vector.load %arg4[%c0_64, %c3_65, %c0_66, %c0_67] : memref<2x8x19x27xf32, #tpu.memory_space<vmem>>, vector<1x1x19x27xf32>
    %238 = vector.shape_cast %237 : vector<1x1x19x27xf32> to vector<19x27xf32>
    %239 = vector.shape_cast %236 : vector<19x27xf32> to vector<1x1x19x27xf32>
    tpu.vector_store %arg4[%c0_64, %c3_65, %c0_66, %c0_67], %239 {strides = array<i32>} : memref<2x8x19x27xf32, #tpu.memory_space<vmem>>, vector<1x1x19x27xf32>,
    %c4_68 = arith.constant 4 : index
    %240 = memref.load %arg3[%c4_68] : memref<8xf32, #tpu.memory_space<smem>>
    %241 = vector.broadcast %240 : f32 to vector<19x27xf32>
    %c19 = arith.constant 19 : index
    %242 = memref.load %arg2[%c19] : memref<96xf32, #tpu.memory_space<smem>>
    %243 = vector.broadcast %242 : f32 to vector<19x27xf32>
    %244 = arith.mulf %1, %243 : vector<19x27xf32>
    %245 = arith.addf %241, %244 : vector<19x27xf32>
    %c18 = arith.constant 18 : index
    %246 = memref.load %arg2[%c18] : memref<96xf32, #tpu.memory_space<smem>>
    %247 = vector.broadcast %246 : f32 to vector<19x27xf32>
    %248 = arith.mulf %3, %247 : vector<19x27xf32>
    %249 = arith.addf %245, %248 : vector<19x27xf32>
    %c17 = arith.constant 17 : index
    %250 = memref.load %arg2[%c17] : memref<96xf32, #tpu.memory_space<smem>>
    %251 = vector.broadcast %250 : f32 to vector<19x27xf32>
    %252 = arith.mulf %5, %251 : vector<19x27xf32>
    %253 = arith.addf %249, %252 : vector<19x27xf32>
    %c16 = arith.constant 16 : index
    %254 = memref.load %arg2[%c16] : memref<96xf32, #tpu.memory_space<smem>>
    %255 = vector.broadcast %254 : f32 to vector<19x27xf32>
    %256 = arith.mulf %7, %255 : vector<19x27xf32>
    %257 = arith.addf %253, %256 : vector<19x27xf32>
    %c51 = arith.constant 51 : index
    %258 = memref.load %arg2[%c51] : memref<96xf32, #tpu.memory_space<smem>>
    %259 = vector.broadcast %258 : f32 to vector<19x27xf32>
    %260 = arith.mulf %9, %259 : vector<19x27xf32>
    %261 = arith.addf %257, %260 : vector<19x27xf32>
    %c50 = arith.constant 50 : index
    %262 = memref.load %arg2[%c50] : memref<96xf32, #tpu.memory_space<smem>>
    %263 = vector.broadcast %262 : f32 to vector<19x27xf32>
    %264 = arith.mulf %11, %263 : vector<19x27xf32>
    %265 = arith.addf %261, %264 : vector<19x27xf32>
    %c49 = arith.constant 49 : index
    %266 = memref.load %arg2[%c49] : memref<96xf32, #tpu.memory_space<smem>>
    %267 = vector.broadcast %266 : f32 to vector<19x27xf32>
    %268 = arith.mulf %13, %267 : vector<19x27xf32>
    %269 = arith.addf %265, %268 : vector<19x27xf32>
    %c48 = arith.constant 48 : index
    %270 = memref.load %arg2[%c48] : memref<96xf32, #tpu.memory_space<smem>>
    %271 = vector.broadcast %270 : f32 to vector<19x27xf32>
    %272 = arith.mulf %15, %271 : vector<19x27xf32>
    %273 = arith.addf %269, %272 : vector<19x27xf32>
    %c83 = arith.constant 83 : index
    %274 = memref.load %arg2[%c83] : memref<96xf32, #tpu.memory_space<smem>>
    %275 = vector.broadcast %274 : f32 to vector<19x27xf32>
    %276 = arith.mulf %17, %275 : vector<19x27xf32>
    %277 = arith.addf %273, %276 : vector<19x27xf32>
    %c82 = arith.constant 82 : index
    %278 = memref.load %arg2[%c82] : memref<96xf32, #tpu.memory_space<smem>>
    %279 = vector.broadcast %278 : f32 to vector<19x27xf32>
    %280 = arith.mulf %19, %279 : vector<19x27xf32>
    %281 = arith.addf %277, %280 : vector<19x27xf32>
    %c81 = arith.constant 81 : index
    %282 = memref.load %arg2[%c81] : memref<96xf32, #tpu.memory_space<smem>>
    %283 = vector.broadcast %282 : f32 to vector<19x27xf32>
    %284 = arith.mulf %21, %283 : vector<19x27xf32>
    %285 = arith.addf %281, %284 : vector<19x27xf32>
    %c80 = arith.constant 80 : index
    %286 = memref.load %arg2[%c80] : memref<96xf32, #tpu.memory_space<smem>>
    %287 = vector.broadcast %286 : f32 to vector<19x27xf32>
    %288 = arith.mulf %23, %287 : vector<19x27xf32>
    %289 = arith.addf %285, %288 : vector<19x27xf32>
    %290 = math.tanh %289 : vector<19x27xf32>
    %c0_69 = arith.constant 0 : index
    %c4_70 = arith.constant 4 : index
    %c0_71 = arith.constant 0 : index
    %c0_72 = arith.constant 0 : index
    %291 = vector.load %arg4[%c0_69, %c4_70, %c0_71, %c0_72] : memref<2x8x19x27xf32, #tpu.memory_space<vmem>>, vector<1x1x19x27xf32>
    %292 = vector.shape_cast %291 : vector<1x1x19x27xf32> to vector<19x27xf32>
    %293 = vector.shape_cast %290 : vector<19x27xf32> to vector<1x1x19x27xf32>
    tpu.vector_store %arg4[%c0_69, %c4_70, %c0_71, %c0_72], %293 {strides = array<i32>} : memref<2x8x19x27xf32, #tpu.memory_space<vmem>>, vector<1x1x19x27xf32>,
    %c5_73 = arith.constant 5 : index
    %294 = memref.load %arg3[%c5_73] : memref<8xf32, #tpu.memory_space<smem>>
    %295 = vector.broadcast %294 : f32 to vector<19x27xf32>
    %c23 = arith.constant 23 : index
    %296 = memref.load %arg2[%c23] : memref<96xf32, #tpu.memory_space<smem>>
    %297 = vector.broadcast %296 : f32 to vector<19x27xf32>
    %298 = arith.mulf %1, %297 : vector<19x27xf32>
    %299 = arith.addf %295, %298 : vector<19x27xf32>
    %c22 = arith.constant 22 : index
    %300 = memref.load %arg2[%c22] : memref<96xf32, #tpu.memory_space<smem>>
    %301 = vector.broadcast %300 : f32 to vector<19x27xf32>
    %302 = arith.mulf %3, %301 : vector<19x27xf32>
    %303 = arith.addf %299, %302 : vector<19x27xf32>
    %c21 = arith.constant 21 : index
    %304 = memref.load %arg2[%c21] : memref<96xf32, #tpu.memory_space<smem>>
    %305 = vector.broadcast %304 : f32 to vector<19x27xf32>
    %306 = arith.mulf %5, %305 : vector<19x27xf32>
    %307 = arith.addf %303, %306 : vector<19x27xf32>
    %c20 = arith.constant 20 : index
    %308 = memref.load %arg2[%c20] : memref<96xf32, #tpu.memory_space<smem>>
    %309 = vector.broadcast %308 : f32 to vector<19x27xf32>
    %310 = arith.mulf %7, %309 : vector<19x27xf32>
    %311 = arith.addf %307, %310 : vector<19x27xf32>
    %c55 = arith.constant 55 : index
    %312 = memref.load %arg2[%c55] : memref<96xf32, #tpu.memory_space<smem>>
    %313 = vector.broadcast %312 : f32 to vector<19x27xf32>
    %314 = arith.mulf %9, %313 : vector<19x27xf32>
    %315 = arith.addf %311, %314 : vector<19x27xf32>
    %c54 = arith.constant 54 : index
    %316 = memref.load %arg2[%c54] : memref<96xf32, #tpu.memory_space<smem>>
    %317 = vector.broadcast %316 : f32 to vector<19x27xf32>
    %318 = arith.mulf %11, %317 : vector<19x27xf32>
    %319 = arith.addf %315, %318 : vector<19x27xf32>
    %c53 = arith.constant 53 : index
    %320 = memref.load %arg2[%c53] : memref<96xf32, #tpu.memory_space<smem>>
    %321 = vector.broadcast %320 : f32 to vector<19x27xf32>
    %322 = arith.mulf %13, %321 : vector<19x27xf32>
    %323 = arith.addf %319, %322 : vector<19x27xf32>
    %c52 = arith.constant 52 : index
    %324 = memref.load %arg2[%c52] : memref<96xf32, #tpu.memory_space<smem>>
    %325 = vector.broadcast %324 : f32 to vector<19x27xf32>
    %326 = arith.mulf %15, %325 : vector<19x27xf32>
    %327 = arith.addf %323, %326 : vector<19x27xf32>
    %c87 = arith.constant 87 : index
    %328 = memref.load %arg2[%c87] : memref<96xf32, #tpu.memory_space<smem>>
    %329 = vector.broadcast %328 : f32 to vector<19x27xf32>
    %330 = arith.mulf %17, %329 : vector<19x27xf32>
    %331 = arith.addf %327, %330 : vector<19x27xf32>
    %c86 = arith.constant 86 : index
    %332 = memref.load %arg2[%c86] : memref<96xf32, #tpu.memory_space<smem>>
    %333 = vector.broadcast %332 : f32 to vector<19x27xf32>
    %334 = arith.mulf %19, %333 : vector<19x27xf32>
    %335 = arith.addf %331, %334 : vector<19x27xf32>
    %c85 = arith.constant 85 : index
    %336 = memref.load %arg2[%c85] : memref<96xf32, #tpu.memory_space<smem>>
    %337 = vector.broadcast %336 : f32 to vector<19x27xf32>
    %338 = arith.mulf %21, %337 : vector<19x27xf32>
    %339 = arith.addf %335, %338 : vector<19x27xf32>
    %c84 = arith.constant 84 : index
    %340 = memref.load %arg2[%c84] : memref<96xf32, #tpu.memory_space<smem>>
    %341 = vector.broadcast %340 : f32 to vector<19x27xf32>
    %342 = arith.mulf %23, %341 : vector<19x27xf32>
    %343 = arith.addf %339, %342 : vector<19x27xf32>
    %344 = math.tanh %343 : vector<19x27xf32>
    %c0_74 = arith.constant 0 : index
    %c5_75 = arith.constant 5 : index
    %c0_76 = arith.constant 0 : index
    %c0_77 = arith.constant 0 : index
    %345 = vector.load %arg4[%c0_74, %c5_75, %c0_76, %c0_77] : memref<2x8x19x27xf32, #tpu.memory_space<vmem>>, vector<1x1x19x27xf32>
    %346 = vector.shape_cast %345 : vector<1x1x19x27xf32> to vector<19x27xf32>
    %347 = vector.shape_cast %344 : vector<19x27xf32> to vector<1x1x19x27xf32>
    tpu.vector_store %arg4[%c0_74, %c5_75, %c0_76, %c0_77], %347 {strides = array<i32>} : memref<2x8x19x27xf32, #tpu.memory_space<vmem>>, vector<1x1x19x27xf32>,
    %c6_78 = arith.constant 6 : index
    %348 = memref.load %arg3[%c6_78] : memref<8xf32, #tpu.memory_space<smem>>
    %349 = vector.broadcast %348 : f32 to vector<19x27xf32>
    %c27 = arith.constant 27 : index
    %350 = memref.load %arg2[%c27] : memref<96xf32, #tpu.memory_space<smem>>
    %351 = vector.broadcast %350 : f32 to vector<19x27xf32>
    %352 = arith.mulf %1, %351 : vector<19x27xf32>
    %353 = arith.addf %349, %352 : vector<19x27xf32>
    %c26 = arith.constant 26 : index
    %354 = memref.load %arg2[%c26] : memref<96xf32, #tpu.memory_space<smem>>
    %355 = vector.broadcast %354 : f32 to vector<19x27xf32>
    %356 = arith.mulf %3, %355 : vector<19x27xf32>
    %357 = arith.addf %353, %356 : vector<19x27xf32>
    %c25 = arith.constant 25 : index
    %358 = memref.load %arg2[%c25] : memref<96xf32, #tpu.memory_space<smem>>
    %359 = vector.broadcast %358 : f32 to vector<19x27xf32>
    %360 = arith.mulf %5, %359 : vector<19x27xf32>
    %361 = arith.addf %357, %360 : vector<19x27xf32>
    %c24 = arith.constant 24 : index
    %362 = memref.load %arg2[%c24] : memref<96xf32, #tpu.memory_space<smem>>
    %363 = vector.broadcast %362 : f32 to vector<19x27xf32>
    %364 = arith.mulf %7, %363 : vector<19x27xf32>
    %365 = arith.addf %361, %364 : vector<19x27xf32>
    %c59 = arith.constant 59 : index
    %366 = memref.load %arg2[%c59] : memref<96xf32, #tpu.memory_space<smem>>
    %367 = vector.broadcast %366 : f32 to vector<19x27xf32>
    %368 = arith.mulf %9, %367 : vector<19x27xf32>
    %369 = arith.addf %365, %368 : vector<19x27xf32>
    %c58 = arith.constant 58 : index
    %370 = memref.load %arg2[%c58] : memref<96xf32, #tpu.memory_space<smem>>
    %371 = vector.broadcast %370 : f32 to vector<19x27xf32>
    %372 = arith.mulf %11, %371 : vector<19x27xf32>
    %373 = arith.addf %369, %372 : vector<19x27xf32>
    %c57 = arith.constant 57 : index
    %374 = memref.load %arg2[%c57] : memref<96xf32, #tpu.memory_space<smem>>
    %375 = vector.broadcast %374 : f32 to vector<19x27xf32>
    %376 = arith.mulf %13, %375 : vector<19x27xf32>
    %377 = arith.addf %373, %376 : vector<19x27xf32>
    %c56 = arith.constant 56 : index
    %378 = memref.load %arg2[%c56] : memref<96xf32, #tpu.memory_space<smem>>
    %379 = vector.broadcast %378 : f32 to vector<19x27xf32>
    %380 = arith.mulf %15, %379 : vector<19x27xf32>
    %381 = arith.addf %377, %380 : vector<19x27xf32>
    %c91 = arith.constant 91 : index
    %382 = memref.load %arg2[%c91] : memref<96xf32, #tpu.memory_space<smem>>
    %383 = vector.broadcast %382 : f32 to vector<19x27xf32>
    %384 = arith.mulf %17, %383 : vector<19x27xf32>
    %385 = arith.addf %381, %384 : vector<19x27xf32>
    %c90 = arith.constant 90 : index
    %386 = memref.load %arg2[%c90] : memref<96xf32, #tpu.memory_space<smem>>
    %387 = vector.broadcast %386 : f32 to vector<19x27xf32>
    %388 = arith.mulf %19, %387 : vector<19x27xf32>
    %389 = arith.addf %385, %388 : vector<19x27xf32>
    %c89 = arith.constant 89 : index
    %390 = memref.load %arg2[%c89] : memref<96xf32, #tpu.memory_space<smem>>
    %391 = vector.broadcast %390 : f32 to vector<19x27xf32>
    %392 = arith.mulf %21, %391 : vector<19x27xf32>
    %393 = arith.addf %389, %392 : vector<19x27xf32>
    %c88 = arith.constant 88 : index
    %394 = memref.load %arg2[%c88] : memref<96xf32, #tpu.memory_space<smem>>
    %395 = vector.broadcast %394 : f32 to vector<19x27xf32>
    %396 = arith.mulf %23, %395 : vector<19x27xf32>
    %397 = arith.addf %393, %396 : vector<19x27xf32>
    %398 = math.tanh %397 : vector<19x27xf32>
    %c0_79 = arith.constant 0 : index
    %c6_80 = arith.constant 6 : index
    %c0_81 = arith.constant 0 : index
    %c0_82 = arith.constant 0 : index
    %399 = vector.load %arg4[%c0_79, %c6_80, %c0_81, %c0_82] : memref<2x8x19x27xf32, #tpu.memory_space<vmem>>, vector<1x1x19x27xf32>
    %400 = vector.shape_cast %399 : vector<1x1x19x27xf32> to vector<19x27xf32>
    %401 = vector.shape_cast %398 : vector<19x27xf32> to vector<1x1x19x27xf32>
    tpu.vector_store %arg4[%c0_79, %c6_80, %c0_81, %c0_82], %401 {strides = array<i32>} : memref<2x8x19x27xf32, #tpu.memory_space<vmem>>, vector<1x1x19x27xf32>,
    %c7_83 = arith.constant 7 : index
    %402 = memref.load %arg3[%c7_83] : memref<8xf32, #tpu.memory_space<smem>>
    %403 = vector.broadcast %402 : f32 to vector<19x27xf32>
    %c31 = arith.constant 31 : index
    %404 = memref.load %arg2[%c31] : memref<96xf32, #tpu.memory_space<smem>>
    %405 = vector.broadcast %404 : f32 to vector<19x27xf32>
    %406 = arith.mulf %1, %405 : vector<19x27xf32>
    %407 = arith.addf %403, %406 : vector<19x27xf32>
    %c30 = arith.constant 30 : index
    %408 = memref.load %arg2[%c30] : memref<96xf32, #tpu.memory_space<smem>>
    %409 = vector.broadcast %408 : f32 to vector<19x27xf32>
    %410 = arith.mulf %3, %409 : vector<19x27xf32>
    %411 = arith.addf %407, %410 : vector<19x27xf32>
    %c29 = arith.constant 29 : index
    %412 = memref.load %arg2[%c29] : memref<96xf32, #tpu.memory_space<smem>>
    %413 = vector.broadcast %412 : f32 to vector<19x27xf32>
    %414 = arith.mulf %5, %413 : vector<19x27xf32>
    %415 = arith.addf %411, %414 : vector<19x27xf32>
    %c28 = arith.constant 28 : index
    %416 = memref.load %arg2[%c28] : memref<96xf32, #tpu.memory_space<smem>>
    %417 = vector.broadcast %416 : f32 to vector<19x27xf32>
    %418 = arith.mulf %7, %417 : vector<19x27xf32>
    %419 = arith.addf %415, %418 : vector<19x27xf32>
    %c63 = arith.constant 63 : index
    %420 = memref.load %arg2[%c63] : memref<96xf32, #tpu.memory_space<smem>>
    %421 = vector.broadcast %420 : f32 to vector<19x27xf32>
    %422 = arith.mulf %9, %421 : vector<19x27xf32>
    %423 = arith.addf %419, %422 : vector<19x27xf32>
    %c62 = arith.constant 62 : index
    %424 = memref.load %arg2[%c62] : memref<96xf32, #tpu.memory_space<smem>>
    %425 = vector.broadcast %424 : f32 to vector<19x27xf32>
    %426 = arith.mulf %11, %425 : vector<19x27xf32>
    %427 = arith.addf %423, %426 : vector<19x27xf32>
    %c61 = arith.constant 61 : index
    %428 = memref.load %arg2[%c61] : memref<96xf32, #tpu.memory_space<smem>>
    %429 = vector.broadcast %428 : f32 to vector<19x27xf32>
    %430 = arith.mulf %13, %429 : vector<19x27xf32>
    %431 = arith.addf %427, %430 : vector<19x27xf32>
    %c60 = arith.constant 60 : index
    %432 = memref.load %arg2[%c60] : memref<96xf32, #tpu.memory_space<smem>>
    %433 = vector.broadcast %432 : f32 to vector<19x27xf32>
    %434 = arith.mulf %15, %433 : vector<19x27xf32>
    %435 = arith.addf %431, %434 : vector<19x27xf32>
    %c95 = arith.constant 95 : index
    %436 = memref.load %arg2[%c95] : memref<96xf32, #tpu.memory_space<smem>>
    %437 = vector.broadcast %436 : f32 to vector<19x27xf32>
    %438 = arith.mulf %17, %437 : vector<19x27xf32>
    %439 = arith.addf %435, %438 : vector<19x27xf32>
    %c94 = arith.constant 94 : index
    %440 = memref.load %arg2[%c94] : memref<96xf32, #tpu.memory_space<smem>>
    %441 = vector.broadcast %440 : f32 to vector<19x27xf32>
    %442 = arith.mulf %19, %441 : vector<19x27xf32>
    %443 = arith.addf %439, %442 : vector<19x27xf32>
    %c93 = arith.constant 93 : index
    %444 = memref.load %arg2[%c93] : memref<96xf32, #tpu.memory_space<smem>>
    %445 = vector.broadcast %444 : f32 to vector<19x27xf32>
    %446 = arith.mulf %21, %445 : vector<19x27xf32>
    %447 = arith.addf %443, %446 : vector<19x27xf32>
    %c92 = arith.constant 92 : index
    %448 = memref.load %arg2[%c92] : memref<96xf32, #tpu.memory_space<smem>>
    %449 = vector.broadcast %448 : f32 to vector<19x27xf32>
    %450 = arith.mulf %23, %449 : vector<19x27xf32>
    %451 = arith.addf %447, %450 : vector<19x27xf32>
    %452 = math.tanh %451 : vector<19x27xf32>
    %c0_84 = arith.constant 0 : index
    %c7_85 = arith.constant 7 : index
    %c0_86 = arith.constant 0 : index
    %c0_87 = arith.constant 0 : index
    %453 = vector.load %arg4[%c0_84, %c7_85, %c0_86, %c0_87] : memref<2x8x19x27xf32, #tpu.memory_space<vmem>>, vector<1x1x19x27xf32>
    %454 = vector.shape_cast %453 : vector<1x1x19x27xf32> to vector<19x27xf32>
    %455 = vector.shape_cast %452 : vector<19x27xf32> to vector<1x1x19x27xf32>
    tpu.vector_store %arg4[%c0_84, %c7_85, %c0_86, %c0_87], %455 {strides = array<i32>} : memref<2x8x19x27xf32, #tpu.memory_space<vmem>>, vector<1x1x19x27xf32>,
    %c1_88 = arith.constant 1 : index
    %c0_89 = arith.constant 0 : index
    %c0_90 = arith.constant 0 : index
    %c0_91 = arith.constant 0 : index
    %456 = vector.load %arg1[%c1_88, %c0_89, %c0_90, %c0_91] : memref<2x3x21x29xf32, #tpu.memory_space<vmem>>, vector<1x1x19x27xf32>
    %457 = vector.shape_cast %456 : vector<1x1x19x27xf32> to vector<19x27xf32>
    %c1_92 = arith.constant 1 : index
    %c0_93 = arith.constant 0 : index
    %c0_94 = arith.constant 0 : index
    %c2_95 = arith.constant 2 : index
    %458 = vector.load %arg1[%c1_92, %c0_93, %c0_94, %c2_95] : memref<2x3x21x29xf32, #tpu.memory_space<vmem>>, vector<1x1x19x27xf32>
    %459 = vector.shape_cast %458 : vector<1x1x19x27xf32> to vector<19x27xf32>
    %c1_96 = arith.constant 1 : index
    %c0_97 = arith.constant 0 : index
    %c2_98 = arith.constant 2 : index
    %c0_99 = arith.constant 0 : index
    %460 = vector.load %arg1[%c1_96, %c0_97, %c2_98, %c0_99] : memref<2x3x21x29xf32, #tpu.memory_space<vmem>>, vector<1x1x19x27xf32>
    %461 = vector.shape_cast %460 : vector<1x1x19x27xf32> to vector<19x27xf32>
    %c1_100 = arith.constant 1 : index
    %c0_101 = arith.constant 0 : index
    %c2_102 = arith.constant 2 : index
    %c2_103 = arith.constant 2 : index
    %462 = vector.load %arg1[%c1_100, %c0_101, %c2_102, %c2_103] : memref<2x3x21x29xf32, #tpu.memory_space<vmem>>, vector<1x1x19x27xf32>
    %463 = vector.shape_cast %462 : vector<1x1x19x27xf32> to vector<19x27xf32>
    %c1_104 = arith.constant 1 : index
    %c1_105 = arith.constant 1 : index
    %c0_106 = arith.constant 0 : index
    %c0_107 = arith.constant 0 : index
    %464 = vector.load %arg1[%c1_104, %c1_105, %c0_106, %c0_107] : memref<2x3x21x29xf32, #tpu.memory_space<vmem>>, vector<1x1x19x27xf32>
    %465 = vector.shape_cast %464 : vector<1x1x19x27xf32> to vector<19x27xf32>
    %c1_108 = arith.constant 1 : index
    %c1_109 = arith.constant 1 : index
    %c0_110 = arith.constant 0 : index
    %c2_111 = arith.constant 2 : index
    %466 = vector.load %arg1[%c1_108, %c1_109, %c0_110, %c2_111] : memref<2x3x21x29xf32, #tpu.memory_space<vmem>>, vector<1x1x19x27xf32>
    %467 = vector.shape_cast %466 : vector<1x1x19x27xf32> to vector<19x27xf32>
    %c1_112 = arith.constant 1 : index
    %c1_113 = arith.constant 1 : index
    %c2_114 = arith.constant 2 : index
    %c0_115 = arith.constant 0 : index
    %468 = vector.load %arg1[%c1_112, %c1_113, %c2_114, %c0_115] : memref<2x3x21x29xf32, #tpu.memory_space<vmem>>, vector<1x1x19x27xf32>
    %469 = vector.shape_cast %468 : vector<1x1x19x27xf32> to vector<19x27xf32>
    %c1_116 = arith.constant 1 : index
    %c1_117 = arith.constant 1 : index
    %c2_118 = arith.constant 2 : index
    %c2_119 = arith.constant 2 : index
    %470 = vector.load %arg1[%c1_116, %c1_117, %c2_118, %c2_119] : memref<2x3x21x29xf32, #tpu.memory_space<vmem>>, vector<1x1x19x27xf32>
    %471 = vector.shape_cast %470 : vector<1x1x19x27xf32> to vector<19x27xf32>
    %c1_120 = arith.constant 1 : index
    %c2_121 = arith.constant 2 : index
    %c0_122 = arith.constant 0 : index
    %c0_123 = arith.constant 0 : index
    %472 = vector.load %arg1[%c1_120, %c2_121, %c0_122, %c0_123] : memref<2x3x21x29xf32, #tpu.memory_space<vmem>>, vector<1x1x19x27xf32>
    %473 = vector.shape_cast %472 : vector<1x1x19x27xf32> to vector<19x27xf32>
    %c1_124 = arith.constant 1 : index
    %c2_125 = arith.constant 2 : index
    %c0_126 = arith.constant 0 : index
    %c2_127 = arith.constant 2 : index
    %474 = vector.load %arg1[%c1_124, %c2_125, %c0_126, %c2_127] : memref<2x3x21x29xf32, #tpu.memory_space<vmem>>, vector<1x1x19x27xf32>
    %475 = vector.shape_cast %474 : vector<1x1x19x27xf32> to vector<19x27xf32>
    %c1_128 = arith.constant 1 : index
    %c2_129 = arith.constant 2 : index
    %c2_130 = arith.constant 2 : index
    %c0_131 = arith.constant 0 : index
    %476 = vector.load %arg1[%c1_128, %c2_129, %c2_130, %c0_131] : memref<2x3x21x29xf32, #tpu.memory_space<vmem>>, vector<1x1x19x27xf32>
    %477 = vector.shape_cast %476 : vector<1x1x19x27xf32> to vector<19x27xf32>
    %c1_132 = arith.constant 1 : index
    %c2_133 = arith.constant 2 : index
    %c2_134 = arith.constant 2 : index
    %c2_135 = arith.constant 2 : index
    %478 = vector.load %arg1[%c1_132, %c2_133, %c2_134, %c2_135] : memref<2x3x21x29xf32, #tpu.memory_space<vmem>>, vector<1x1x19x27xf32>
    %479 = vector.shape_cast %478 : vector<1x1x19x27xf32> to vector<19x27xf32>
    %c0_136 = arith.constant 0 : index
    %480 = memref.load %arg3[%c0_136] : memref<8xf32, #tpu.memory_space<smem>>
    %481 = vector.broadcast %480 : f32 to vector<19x27xf32>
    %c3_137 = arith.constant 3 : index
    %482 = memref.load %arg2[%c3_137] : memref<96xf32, #tpu.memory_space<smem>>
    %483 = vector.broadcast %482 : f32 to vector<19x27xf32>
    %484 = arith.mulf %457, %483 : vector<19x27xf32>
    %485 = arith.addf %481, %484 : vector<19x27xf32>
    %c2_138 = arith.constant 2 : index
    %486 = memref.load %arg2[%c2_138] : memref<96xf32, #tpu.memory_space<smem>>
    %487 = vector.broadcast %486 : f32 to vector<19x27xf32>
    %488 = arith.mulf %459, %487 : vector<19x27xf32>
    %489 = arith.addf %485, %488 : vector<19x27xf32>
    %c1_139 = arith.constant 1 : index
    %490 = memref.load %arg2[%c1_139] : memref<96xf32, #tpu.memory_space<smem>>
    %491 = vector.broadcast %490 : f32 to vector<19x27xf32>
    %492 = arith.mulf %461, %491 : vector<19x27xf32>
    %493 = arith.addf %489, %492 : vector<19x27xf32>
    %c0_140 = arith.constant 0 : index
    %494 = memref.load %arg2[%c0_140] : memref<96xf32, #tpu.memory_space<smem>>
    %495 = vector.broadcast %494 : f32 to vector<19x27xf32>
    %496 = arith.mulf %463, %495 : vector<19x27xf32>
    %497 = arith.addf %493, %496 : vector<19x27xf32>
    %c35_141 = arith.constant 35 : index
    %498 = memref.load %arg2[%c35_141] : memref<96xf32, #tpu.memory_space<smem>>
    %499 = vector.broadcast %498 : f32 to vector<19x27xf32>
    %500 = arith.mulf %465, %499 : vector<19x27xf32>
    %501 = arith.addf %497, %500 : vector<19x27xf32>
    %c34_142 = arith.constant 34 : index
    %502 = memref.load %arg2[%c34_142] : memref<96xf32, #tpu.memory_space<smem>>
    %503 = vector.broadcast %502 : f32 to vector<19x27xf32>
    %504 = arith.mulf %467, %503 : vector<19x27xf32>
    %505 = arith.addf %501, %504 : vector<19x27xf32>
    %c33_143 = arith.constant 33 : index
    %506 = memref.load %arg2[%c33_143] : memref<96xf32, #tpu.memory_space<smem>>
    %507 = vector.broadcast %506 : f32 to vector<19x27xf32>
    %508 = arith.mulf %469, %507 : vector<19x27xf32>
    %509 = arith.addf %505, %508 : vector<19x27xf32>
    %c32_144 = arith.constant 32 : index
    %510 = memref.load %arg2[%c32_144] : memref<96xf32, #tpu.memory_space<smem>>
    %511 = vector.broadcast %510 : f32 to vector<19x27xf32>
    %512 = arith.mulf %471, %511 : vector<19x27xf32>
    %513 = arith.addf %509, %512 : vector<19x27xf32>
    %c67_145 = arith.constant 67 : index
    %514 = memref.load %arg2[%c67_145] : memref<96xf32, #tpu.memory_space<smem>>
    %515 = vector.broadcast %514 : f32 to vector<19x27xf32>
    %516 = arith.mulf %473, %515 : vector<19x27xf32>
    %517 = arith.addf %513, %516 : vector<19x27xf32>
    %c66_146 = arith.constant 66 : index
    %518 = memref.load %arg2[%c66_146] : memref<96xf32, #tpu.memory_space<smem>>
    %519 = vector.broadcast %518 : f32 to vector<19x27xf32>
    %520 = arith.mulf %475, %519 : vector<19x27xf32>
    %521 = arith.addf %517, %520 : vector<19x27xf32>
    %c65_147 = arith.constant 65 : index
    %522 = memref.load %arg2[%c65_147] : memref<96xf32, #tpu.memory_space<smem>>
    %523 = vector.broadcast %522 : f32 to vector<19x27xf32>
    %524 = arith.mulf %477, %523 : vector<19x27xf32>
    %525 = arith.addf %521, %524 : vector<19x27xf32>
    %c64_148 = arith.constant 64 : index
    %526 = memref.load %arg2[%c64_148] : memref<96xf32, #tpu.memory_space<smem>>
    %527 = vector.broadcast %526 : f32 to vector<19x27xf32>
    %528 = arith.mulf %479, %527 : vector<19x27xf32>
    %529 = arith.addf %525, %528 : vector<19x27xf32>
    %530 = math.tanh %529 : vector<19x27xf32>
    %c1_149 = arith.constant 1 : index
    %c0_150 = arith.constant 0 : index
    %c0_151 = arith.constant 0 : index
    %c0_152 = arith.constant 0 : index
    %531 = vector.load %arg4[%c1_149, %c0_150, %c0_151, %c0_152] : memref<2x8x19x27xf32, #tpu.memory_space<vmem>>, vector<1x1x19x27xf32>
    %532 = vector.shape_cast %531 : vector<1x1x19x27xf32> to vector<19x27xf32>
    %533 = vector.shape_cast %530 : vector<19x27xf32> to vector<1x1x19x27xf32>
    tpu.vector_store %arg4[%c1_149, %c0_150, %c0_151, %c0_152], %533 {strides = array<i32>} : memref<2x8x19x27xf32, #tpu.memory_space<vmem>>, vector<1x1x19x27xf32>,
    %c1_153 = arith.constant 1 : index
    %534 = memref.load %arg3[%c1_153] : memref<8xf32, #tpu.memory_space<smem>>
    %535 = vector.broadcast %534 : f32 to vector<19x27xf32>
    %c7_154 = arith.constant 7 : index
    %536 = memref.load %arg2[%c7_154] : memref<96xf32, #tpu.memory_space<smem>>
    %537 = vector.broadcast %536 : f32 to vector<19x27xf32>
    %538 = arith.mulf %457, %537 : vector<19x27xf32>
    %539 = arith.addf %535, %538 : vector<19x27xf32>
    %c6_155 = arith.constant 6 : index
    %540 = memref.load %arg2[%c6_155] : memref<96xf32, #tpu.memory_space<smem>>
    %541 = vector.broadcast %540 : f32 to vector<19x27xf32>
    %542 = arith.mulf %459, %541 : vector<19x27xf32>
    %543 = arith.addf %539, %542 : vector<19x27xf32>
    %c5_156 = arith.constant 5 : index
    %544 = memref.load %arg2[%c5_156] : memref<96xf32, #tpu.memory_space<smem>>
    %545 = vector.broadcast %544 : f32 to vector<19x27xf32>
    %546 = arith.mulf %461, %545 : vector<19x27xf32>
    %547 = arith.addf %543, %546 : vector<19x27xf32>
    %c4_157 = arith.constant 4 : index
    %548 = memref.load %arg2[%c4_157] : memref<96xf32, #tpu.memory_space<smem>>
    %549 = vector.broadcast %548 : f32 to vector<19x27xf32>
    %550 = arith.mulf %463, %549 : vector<19x27xf32>
    %551 = arith.addf %547, %550 : vector<19x27xf32>
    %c39_158 = arith.constant 39 : index
    %552 = memref.load %arg2[%c39_158] : memref<96xf32, #tpu.memory_space<smem>>
    %553 = vector.broadcast %552 : f32 to vector<19x27xf32>
    %554 = arith.mulf %465, %553 : vector<19x27xf32>
    %555 = arith.addf %551, %554 : vector<19x27xf32>
    %c38_159 = arith.constant 38 : index
    %556 = memref.load %arg2[%c38_159] : memref<96xf32, #tpu.memory_space<smem>>
    %557 = vector.broadcast %556 : f32 to vector<19x27xf32>
    %558 = arith.mulf %467, %557 : vector<19x27xf32>
    %559 = arith.addf %555, %558 : vector<19x27xf32>
    %c37_160 = arith.constant 37 : index
    %560 = memref.load %arg2[%c37_160] : memref<96xf32, #tpu.memory_space<smem>>
    %561 = vector.broadcast %560 : f32 to vector<19x27xf32>
    %562 = arith.mulf %469, %561 : vector<19x27xf32>
    %563 = arith.addf %559, %562 : vector<19x27xf32>
    %c36_161 = arith.constant 36 : index
    %564 = memref.load %arg2[%c36_161] : memref<96xf32, #tpu.memory_space<smem>>
    %565 = vector.broadcast %564 : f32 to vector<19x27xf32>
    %566 = arith.mulf %471, %565 : vector<19x27xf32>
    %567 = arith.addf %563, %566 : vector<19x27xf32>
    %c71_162 = arith.constant 71 : index
    %568 = memref.load %arg2[%c71_162] : memref<96xf32, #tpu.memory_space<smem>>
    %569 = vector.broadcast %568 : f32 to vector<19x27xf32>
    %570 = arith.mulf %473, %569 : vector<19x27xf32>
    %571 = arith.addf %567, %570 : vector<19x27xf32>
    %c70_163 = arith.constant 70 : index
    %572 = memref.load %arg2[%c70_163] : memref<96xf32, #tpu.memory_space<smem>>
    %573 = vector.broadcast %572 : f32 to vector<19x27xf32>
    %574 = arith.mulf %475, %573 : vector<19x27xf32>
    %575 = arith.addf %571, %574 : vector<19x27xf32>
    %c69_164 = arith.constant 69 : index
    %576 = memref.load %arg2[%c69_164] : memref<96xf32, #tpu.memory_space<smem>>
    %577 = vector.broadcast %576 : f32 to vector<19x27xf32>
    %578 = arith.mulf %477, %577 : vector<19x27xf32>
    %579 = arith.addf %575, %578 : vector<19x27xf32>
    %c68_165 = arith.constant 68 : index
    %580 = memref.load %arg2[%c68_165] : memref<96xf32, #tpu.memory_space<smem>>
    %581 = vector.broadcast %580 : f32 to vector<19x27xf32>
    %582 = arith.mulf %479, %581 : vector<19x27xf32>
    %583 = arith.addf %579, %582 : vector<19x27xf32>
    %584 = math.tanh %583 : vector<19x27xf32>
    %c1_166 = arith.constant 1 : index
    %c1_167 = arith.constant 1 : index
    %c0_168 = arith.constant 0 : index
    %c0_169 = arith.constant 0 : index
    %585 = vector.load %arg4[%c1_166, %c1_167, %c0_168, %c0_169] : memref<2x8x19x27xf32, #tpu.memory_space<vmem>>, vector<1x1x19x27xf32>
    %586 = vector.shape_cast %585 : vector<1x1x19x27xf32> to vector<19x27xf32>
    %587 = vector.shape_cast %584 : vector<19x27xf32> to vector<1x1x19x27xf32>
    tpu.vector_store %arg4[%c1_166, %c1_167, %c0_168, %c0_169], %587 {strides = array<i32>} : memref<2x8x19x27xf32, #tpu.memory_space<vmem>>, vector<1x1x19x27xf32>,
    %c2_170 = arith.constant 2 : index
    %588 = memref.load %arg3[%c2_170] : memref<8xf32, #tpu.memory_space<smem>>
    %589 = vector.broadcast %588 : f32 to vector<19x27xf32>
    %c11_171 = arith.constant 11 : index
    %590 = memref.load %arg2[%c11_171] : memref<96xf32, #tpu.memory_space<smem>>
    %591 = vector.broadcast %590 : f32 to vector<19x27xf32>
    %592 = arith.mulf %457, %591 : vector<19x27xf32>
    %593 = arith.addf %589, %592 : vector<19x27xf32>
    %c10_172 = arith.constant 10 : index
    %594 = memref.load %arg2[%c10_172] : memref<96xf32, #tpu.memory_space<smem>>
    %595 = vector.broadcast %594 : f32 to vector<19x27xf32>
    %596 = arith.mulf %459, %595 : vector<19x27xf32>
    %597 = arith.addf %593, %596 : vector<19x27xf32>
    %c9_173 = arith.constant 9 : index
    %598 = memref.load %arg2[%c9_173] : memref<96xf32, #tpu.memory_space<smem>>
    %599 = vector.broadcast %598 : f32 to vector<19x27xf32>
    %600 = arith.mulf %461, %599 : vector<19x27xf32>
    %601 = arith.addf %597, %600 : vector<19x27xf32>
    %c8_174 = arith.constant 8 : index
    %602 = memref.load %arg2[%c8_174] : memref<96xf32, #tpu.memory_space<smem>>
    %603 = vector.broadcast %602 : f32 to vector<19x27xf32>
    %604 = arith.mulf %463, %603 : vector<19x27xf32>
    %605 = arith.addf %601, %604 : vector<19x27xf32>
    %c43_175 = arith.constant 43 : index
    %606 = memref.load %arg2[%c43_175] : memref<96xf32, #tpu.memory_space<smem>>
    %607 = vector.broadcast %606 : f32 to vector<19x27xf32>
    %608 = arith.mulf %465, %607 : vector<19x27xf32>
    %609 = arith.addf %605, %608 : vector<19x27xf32>
    %c42_176 = arith.constant 42 : index
    %610 = memref.load %arg2[%c42_176] : memref<96xf32, #tpu.memory_space<smem>>
    %611 = vector.broadcast %610 : f32 to vector<19x27xf32>
    %612 = arith.mulf %467, %611 : vector<19x27xf32>
    %613 = arith.addf %609, %612 : vector<19x27xf32>
    %c41_177 = arith.constant 41 : index
    %614 = memref.load %arg2[%c41_177] : memref<96xf32, #tpu.memory_space<smem>>
    %615 = vector.broadcast %614 : f32 to vector<19x27xf32>
    %616 = arith.mulf %469, %615 : vector<19x27xf32>
    %617 = arith.addf %613, %616 : vector<19x27xf32>
    %c40_178 = arith.constant 40 : index
    %618 = memref.load %arg2[%c40_178] : memref<96xf32, #tpu.memory_space<smem>>
    %619 = vector.broadcast %618 : f32 to vector<19x27xf32>
    %620 = arith.mulf %471, %619 : vector<19x27xf32>
    %621 = arith.addf %617, %620 : vector<19x27xf32>
    %c75_179 = arith.constant 75 : index
    %622 = memref.load %arg2[%c75_179] : memref<96xf32, #tpu.memory_space<smem>>
    %623 = vector.broadcast %622 : f32 to vector<19x27xf32>
    %624 = arith.mulf %473, %623 : vector<19x27xf32>
    %625 = arith.addf %621, %624 : vector<19x27xf32>
    %c74_180 = arith.constant 74 : index
    %626 = memref.load %arg2[%c74_180] : memref<96xf32, #tpu.memory_space<smem>>
    %627 = vector.broadcast %626 : f32 to vector<19x27xf32>
    %628 = arith.mulf %475, %627 : vector<19x27xf32>
    %629 = arith.addf %625, %628 : vector<19x27xf32>
    %c73_181 = arith.constant 73 : index
    %630 = memref.load %arg2[%c73_181] : memref<96xf32, #tpu.memory_space<smem>>
    %631 = vector.broadcast %630 : f32 to vector<19x27xf32>
    %632 = arith.mulf %477, %631 : vector<19x27xf32>
    %633 = arith.addf %629, %632 : vector<19x27xf32>
    %c72_182 = arith.constant 72 : index
    %634 = memref.load %arg2[%c72_182] : memref<96xf32, #tpu.memory_space<smem>>
    %635 = vector.broadcast %634 : f32 to vector<19x27xf32>
    %636 = arith.mulf %479, %635 : vector<19x27xf32>
    %637 = arith.addf %633, %636 : vector<19x27xf32>
    %638 = math.tanh %637 : vector<19x27xf32>
    %c1_183 = arith.constant 1 : index
    %c2_184 = arith.constant 2 : index
    %c0_185 = arith.constant 0 : index
    %c0_186 = arith.constant 0 : index
    %639 = vector.load %arg4[%c1_183, %c2_184, %c0_185, %c0_186] : memref<2x8x19x27xf32, #tpu.memory_space<vmem>>, vector<1x1x19x27xf32>
    %640 = vector.shape_cast %639 : vector<1x1x19x27xf32> to vector<19x27xf32>
    %641 = vector.shape_cast %638 : vector<19x27xf32> to vector<1x1x19x27xf32>
    tpu.vector_store %arg4[%c1_183, %c2_184, %c0_185, %c0_186], %641 {strides = array<i32>} : memref<2x8x19x27xf32, #tpu.memory_space<vmem>>, vector<1x1x19x27xf32>,
    %c3_187 = arith.constant 3 : index
    %642 = memref.load %arg3[%c3_187] : memref<8xf32, #tpu.memory_space<smem>>
    %643 = vector.broadcast %642 : f32 to vector<19x27xf32>
    %c15_188 = arith.constant 15 : index
    %644 = memref.load %arg2[%c15_188] : memref<96xf32, #tpu.memory_space<smem>>
    %645 = vector.broadcast %644 : f32 to vector<19x27xf32>
    %646 = arith.mulf %457, %645 : vector<19x27xf32>
    %647 = arith.addf %643, %646 : vector<19x27xf32>
    %c14_189 = arith.constant 14 : index
    %648 = memref.load %arg2[%c14_189] : memref<96xf32, #tpu.memory_space<smem>>
    %649 = vector.broadcast %648 : f32 to vector<19x27xf32>
    %650 = arith.mulf %459, %649 : vector<19x27xf32>
    %651 = arith.addf %647, %650 : vector<19x27xf32>
    %c13_190 = arith.constant 13 : index
    %652 = memref.load %arg2[%c13_190] : memref<96xf32, #tpu.memory_space<smem>>
    %653 = vector.broadcast %652 : f32 to vector<19x27xf32>
    %654 = arith.mulf %461, %653 : vector<19x27xf32>
    %655 = arith.addf %651, %654 : vector<19x27xf32>
    %c12_191 = arith.constant 12 : index
    %656 = memref.load %arg2[%c12_191] : memref<96xf32, #tpu.memory_space<smem>>
    %657 = vector.broadcast %656 : f32 to vector<19x27xf32>
    %658 = arith.mulf %463, %657 : vector<19x27xf32>
    %659 = arith.addf %655, %658 : vector<19x27xf32>
    %c47_192 = arith.constant 47 : index
    %660 = memref.load %arg2[%c47_192] : memref<96xf32, #tpu.memory_space<smem>>
    %661 = vector.broadcast %660 : f32 to vector<19x27xf32>
    %662 = arith.mulf %465, %661 : vector<19x27xf32>
    %663 = arith.addf %659, %662 : vector<19x27xf32>
    %c46_193 = arith.constant 46 : index
    %664 = memref.load %arg2[%c46_193] : memref<96xf32, #tpu.memory_space<smem>>
    %665 = vector.broadcast %664 : f32 to vector<19x27xf32>
    %666 = arith.mulf %467, %665 : vector<19x27xf32>
    %667 = arith.addf %663, %666 : vector<19x27xf32>
    %c45_194 = arith.constant 45 : index
    %668 = memref.load %arg2[%c45_194] : memref<96xf32, #tpu.memory_space<smem>>
    %669 = vector.broadcast %668 : f32 to vector<19x27xf32>
    %670 = arith.mulf %469, %669 : vector<19x27xf32>
    %671 = arith.addf %667, %670 : vector<19x27xf32>
    %c44_195 = arith.constant 44 : index
    %672 = memref.load %arg2[%c44_195] : memref<96xf32, #tpu.memory_space<smem>>
    %673 = vector.broadcast %672 : f32 to vector<19x27xf32>
    %674 = arith.mulf %471, %673 : vector<19x27xf32>
    %675 = arith.addf %671, %674 : vector<19x27xf32>
    %c79_196 = arith.constant 79 : index
    %676 = memref.load %arg2[%c79_196] : memref<96xf32, #tpu.memory_space<smem>>
    %677 = vector.broadcast %676 : f32 to vector<19x27xf32>
    %678 = arith.mulf %473, %677 : vector<19x27xf32>
    %679 = arith.addf %675, %678 : vector<19x27xf32>
    %c78_197 = arith.constant 78 : index
    %680 = memref.load %arg2[%c78_197] : memref<96xf32, #tpu.memory_space<smem>>
    %681 = vector.broadcast %680 : f32 to vector<19x27xf32>
    %682 = arith.mulf %475, %681 : vector<19x27xf32>
    %683 = arith.addf %679, %682 : vector<19x27xf32>
    %c77_198 = arith.constant 77 : index
    %684 = memref.load %arg2[%c77_198] : memref<96xf32, #tpu.memory_space<smem>>
    %685 = vector.broadcast %684 : f32 to vector<19x27xf32>
    %686 = arith.mulf %477, %685 : vector<19x27xf32>
    %687 = arith.addf %683, %686 : vector<19x27xf32>
    %c76_199 = arith.constant 76 : index
    %688 = memref.load %arg2[%c76_199] : memref<96xf32, #tpu.memory_space<smem>>
    %689 = vector.broadcast %688 : f32 to vector<19x27xf32>
    %690 = arith.mulf %479, %689 : vector<19x27xf32>
    %691 = arith.addf %687, %690 : vector<19x27xf32>
    %692 = math.tanh %691 : vector<19x27xf32>
    %c1_200 = arith.constant 1 : index
    %c3_201 = arith.constant 3 : index
    %c0_202 = arith.constant 0 : index
    %c0_203 = arith.constant 0 : index
    %693 = vector.load %arg4[%c1_200, %c3_201, %c0_202, %c0_203] : memref<2x8x19x27xf32, #tpu.memory_space<vmem>>, vector<1x1x19x27xf32>
    %694 = vector.shape_cast %693 : vector<1x1x19x27xf32> to vector<19x27xf32>
    %695 = vector.shape_cast %692 : vector<19x27xf32> to vector<1x1x19x27xf32>
    tpu.vector_store %arg4[%c1_200, %c3_201, %c0_202, %c0_203], %695 {strides = array<i32>} : memref<2x8x19x27xf32, #tpu.memory_space<vmem>>, vector<1x1x19x27xf32>,
    %c4_204 = arith.constant 4 : index
    %696 = memref.load %arg3[%c4_204] : memref<8xf32, #tpu.memory_space<smem>>
    %697 = vector.broadcast %696 : f32 to vector<19x27xf32>
    %c19_205 = arith.constant 19 : index
    %698 = memref.load %arg2[%c19_205] : memref<96xf32, #tpu.memory_space<smem>>
    %699 = vector.broadcast %698 : f32 to vector<19x27xf32>
    %700 = arith.mulf %457, %699 : vector<19x27xf32>
    %701 = arith.addf %697, %700 : vector<19x27xf32>
    %c18_206 = arith.constant 18 : index
    %702 = memref.load %arg2[%c18_206] : memref<96xf32, #tpu.memory_space<smem>>
    %703 = vector.broadcast %702 : f32 to vector<19x27xf32>
    %704 = arith.mulf %459, %703 : vector<19x27xf32>
    %705 = arith.addf %701, %704 : vector<19x27xf32>
    %c17_207 = arith.constant 17 : index
    %706 = memref.load %arg2[%c17_207] : memref<96xf32, #tpu.memory_space<smem>>
    %707 = vector.broadcast %706 : f32 to vector<19x27xf32>
    %708 = arith.mulf %461, %707 : vector<19x27xf32>
    %709 = arith.addf %705, %708 : vector<19x27xf32>
    %c16_208 = arith.constant 16 : index
    %710 = memref.load %arg2[%c16_208] : memref<96xf32, #tpu.memory_space<smem>>
    %711 = vector.broadcast %710 : f32 to vector<19x27xf32>
    %712 = arith.mulf %463, %711 : vector<19x27xf32>
    %713 = arith.addf %709, %712 : vector<19x27xf32>
    %c51_209 = arith.constant 51 : index
    %714 = memref.load %arg2[%c51_209] : memref<96xf32, #tpu.memory_space<smem>>
    %715 = vector.broadcast %714 : f32 to vector<19x27xf32>
    %716 = arith.mulf %465, %715 : vector<19x27xf32>
    %717 = arith.addf %713, %716 : vector<19x27xf32>
    %c50_210 = arith.constant 50 : index
    %718 = memref.load %arg2[%c50_210] : memref<96xf32, #tpu.memory_space<smem>>
    %719 = vector.broadcast %718 : f32 to vector<19x27xf32>
    %720 = arith.mulf %467, %719 : vector<19x27xf32>
    %721 = arith.addf %717, %720 : vector<19x27xf32>
    %c49_211 = arith.constant 49 : index
    %722 = memref.load %arg2[%c49_211] : memref<96xf32, #tpu.memory_space<smem>>
    %723 = vector.broadcast %722 : f32 to vector<19x27xf32>
    %724 = arith.mulf %469, %723 : vector<19x27xf32>
    %725 = arith.addf %721, %724 : vector<19x27xf32>
    %c48_212 = arith.constant 48 : index
    %726 = memref.load %arg2[%c48_212] : memref<96xf32, #tpu.memory_space<smem>>
    %727 = vector.broadcast %726 : f32 to vector<19x27xf32>
    %728 = arith.mulf %471, %727 : vector<19x27xf32>
    %729 = arith.addf %725, %728 : vector<19x27xf32>
    %c83_213 = arith.constant 83 : index
    %730 = memref.load %arg2[%c83_213] : memref<96xf32, #tpu.memory_space<smem>>
    %731 = vector.broadcast %730 : f32 to vector<19x27xf32>
    %732 = arith.mulf %473, %731 : vector<19x27xf32>
    %733 = arith.addf %729, %732 : vector<19x27xf32>
    %c82_214 = arith.constant 82 : index
    %734 = memref.load %arg2[%c82_214] : memref<96xf32, #tpu.memory_space<smem>>
    %735 = vector.broadcast %734 : f32 to vector<19x27xf32>
    %736 = arith.mulf %475, %735 : vector<19x27xf32>
    %737 = arith.addf %733, %736 : vector<19x27xf32>
    %c81_215 = arith.constant 81 : index
    %738 = memref.load %arg2[%c81_215] : memref<96xf32, #tpu.memory_space<smem>>
    %739 = vector.broadcast %738 : f32 to vector<19x27xf32>
    %740 = arith.mulf %477, %739 : vector<19x27xf32>
    %741 = arith.addf %737, %740 : vector<19x27xf32>
    %c80_216 = arith.constant 80 : index
    %742 = memref.load %arg2[%c80_216] : memref<96xf32, #tpu.memory_space<smem>>
    %743 = vector.broadcast %742 : f32 to vector<19x27xf32>
    %744 = arith.mulf %479, %743 : vector<19x27xf32>
    %745 = arith.addf %741, %744 : vector<19x27xf32>
    %746 = math.tanh %745 : vector<19x27xf32>
    %c1_217 = arith.constant 1 : index
    %c4_218 = arith.constant 4 : index
    %c0_219 = arith.constant 0 : index
    %c0_220 = arith.constant 0 : index
    %747 = vector.load %arg4[%c1_217, %c4_218, %c0_219, %c0_220] : memref<2x8x19x27xf32, #tpu.memory_space<vmem>>, vector<1x1x19x27xf32>
    %748 = vector.shape_cast %747 : vector<1x1x19x27xf32> to vector<19x27xf32>
    %749 = vector.shape_cast %746 : vector<19x27xf32> to vector<1x1x19x27xf32>
    tpu.vector_store %arg4[%c1_217, %c4_218, %c0_219, %c0_220], %749 {strides = array<i32>} : memref<2x8x19x27xf32, #tpu.memory_space<vmem>>, vector<1x1x19x27xf32>,
    %c5_221 = arith.constant 5 : index
    %750 = memref.load %arg3[%c5_221] : memref<8xf32, #tpu.memory_space<smem>>
    %751 = vector.broadcast %750 : f32 to vector<19x27xf32>
    %c23_222 = arith.constant 23 : index
    %752 = memref.load %arg2[%c23_222] : memref<96xf32, #tpu.memory_space<smem>>
    %753 = vector.broadcast %752 : f32 to vector<19x27xf32>
    %754 = arith.mulf %457, %753 : vector<19x27xf32>
    %755 = arith.addf %751, %754 : vector<19x27xf32>
    %c22_223 = arith.constant 22 : index
    %756 = memref.load %arg2[%c22_223] : memref<96xf32, #tpu.memory_space<smem>>
    %757 = vector.broadcast %756 : f32 to vector<19x27xf32>
    %758 = arith.mulf %459, %757 : vector<19x27xf32>
    %759 = arith.addf %755, %758 : vector<19x27xf32>
    %c21_224 = arith.constant 21 : index
    %760 = memref.load %arg2[%c21_224] : memref<96xf32, #tpu.memory_space<smem>>
    %761 = vector.broadcast %760 : f32 to vector<19x27xf32>
    %762 = arith.mulf %461, %761 : vector<19x27xf32>
    %763 = arith.addf %759, %762 : vector<19x27xf32>
    %c20_225 = arith.constant 20 : index
    %764 = memref.load %arg2[%c20_225] : memref<96xf32, #tpu.memory_space<smem>>
    %765 = vector.broadcast %764 : f32 to vector<19x27xf32>
    %766 = arith.mulf %463, %765 : vector<19x27xf32>
    %767 = arith.addf %763, %766 : vector<19x27xf32>
    %c55_226 = arith.constant 55 : index
    %768 = memref.load %arg2[%c55_226] : memref<96xf32, #tpu.memory_space<smem>>
    %769 = vector.broadcast %768 : f32 to vector<19x27xf32>
    %770 = arith.mulf %465, %769 : vector<19x27xf32>
    %771 = arith.addf %767, %770 : vector<19x27xf32>
    %c54_227 = arith.constant 54 : index
    %772 = memref.load %arg2[%c54_227] : memref<96xf32, #tpu.memory_space<smem>>
    %773 = vector.broadcast %772 : f32 to vector<19x27xf32>
    %774 = arith.mulf %467, %773 : vector<19x27xf32>
    %775 = arith.addf %771, %774 : vector<19x27xf32>
    %c53_228 = arith.constant 53 : index
    %776 = memref.load %arg2[%c53_228] : memref<96xf32, #tpu.memory_space<smem>>
    %777 = vector.broadcast %776 : f32 to vector<19x27xf32>
    %778 = arith.mulf %469, %777 : vector<19x27xf32>
    %779 = arith.addf %775, %778 : vector<19x27xf32>
    %c52_229 = arith.constant 52 : index
    %780 = memref.load %arg2[%c52_229] : memref<96xf32, #tpu.memory_space<smem>>
    %781 = vector.broadcast %780 : f32 to vector<19x27xf32>
    %782 = arith.mulf %471, %781 : vector<19x27xf32>
    %783 = arith.addf %779, %782 : vector<19x27xf32>
    %c87_230 = arith.constant 87 : index
    %784 = memref.load %arg2[%c87_230] : memref<96xf32, #tpu.memory_space<smem>>
    %785 = vector.broadcast %784 : f32 to vector<19x27xf32>
    %786 = arith.mulf %473, %785 : vector<19x27xf32>
    %787 = arith.addf %783, %786 : vector<19x27xf32>
    %c86_231 = arith.constant 86 : index
    %788 = memref.load %arg2[%c86_231] : memref<96xf32, #tpu.memory_space<smem>>
    %789 = vector.broadcast %788 : f32 to vector<19x27xf32>
    %790 = arith.mulf %475, %789 : vector<19x27xf32>
    %791 = arith.addf %787, %790 : vector<19x27xf32>
    %c85_232 = arith.constant 85 : index
    %792 = memref.load %arg2[%c85_232] : memref<96xf32, #tpu.memory_space<smem>>
    %793 = vector.broadcast %792 : f32 to vector<19x27xf32>
    %794 = arith.mulf %477, %793 : vector<19x27xf32>
    %795 = arith.addf %791, %794 : vector<19x27xf32>
    %c84_233 = arith.constant 84 : index
    %796 = memref.load %arg2[%c84_233] : memref<96xf32, #tpu.memory_space<smem>>
    %797 = vector.broadcast %796 : f32 to vector<19x27xf32>
    %798 = arith.mulf %479, %797 : vector<19x27xf32>
    %799 = arith.addf %795, %798 : vector<19x27xf32>
    %800 = math.tanh %799 : vector<19x27xf32>
    %c1_234 = arith.constant 1 : index
    %c5_235 = arith.constant 5 : index
    %c0_236 = arith.constant 0 : index
    %c0_237 = arith.constant 0 : index
    %801 = vector.load %arg4[%c1_234, %c5_235, %c0_236, %c0_237] : memref<2x8x19x27xf32, #tpu.memory_space<vmem>>, vector<1x1x19x27xf32>
    %802 = vector.shape_cast %801 : vector<1x1x19x27xf32> to vector<19x27xf32>
    %803 = vector.shape_cast %800 : vector<19x27xf32> to vector<1x1x19x27xf32>
    tpu.vector_store %arg4[%c1_234, %c5_235, %c0_236, %c0_237], %803 {strides = array<i32>} : memref<2x8x19x27xf32, #tpu.memory_space<vmem>>, vector<1x1x19x27xf32>,
    %c6_238 = arith.constant 6 : index
    %804 = memref.load %arg3[%c6_238] : memref<8xf32, #tpu.memory_space<smem>>
    %805 = vector.broadcast %804 : f32 to vector<19x27xf32>
    %c27_239 = arith.constant 27 : index
    %806 = memref.load %arg2[%c27_239] : memref<96xf32, #tpu.memory_space<smem>>
    %807 = vector.broadcast %806 : f32 to vector<19x27xf32>
    %808 = arith.mulf %457, %807 : vector<19x27xf32>
    %809 = arith.addf %805, %808 : vector<19x27xf32>
    %c26_240 = arith.constant 26 : index
    %810 = memref.load %arg2[%c26_240] : memref<96xf32, #tpu.memory_space<smem>>
    %811 = vector.broadcast %810 : f32 to vector<19x27xf32>
    %812 = arith.mulf %459, %811 : vector<19x27xf32>
    %813 = arith.addf %809, %812 : vector<19x27xf32>
    %c25_241 = arith.constant 25 : index
    %814 = memref.load %arg2[%c25_241] : memref<96xf32, #tpu.memory_space<smem>>
    %815 = vector.broadcast %814 : f32 to vector<19x27xf32>
    %816 = arith.mulf %461, %815 : vector<19x27xf32>
    %817 = arith.addf %813, %816 : vector<19x27xf32>
    %c24_242 = arith.constant 24 : index
    %818 = memref.load %arg2[%c24_242] : memref<96xf32, #tpu.memory_space<smem>>
    %819 = vector.broadcast %818 : f32 to vector<19x27xf32>
    %820 = arith.mulf %463, %819 : vector<19x27xf32>
    %821 = arith.addf %817, %820 : vector<19x27xf32>
    %c59_243 = arith.constant 59 : index
    %822 = memref.load %arg2[%c59_243] : memref<96xf32, #tpu.memory_space<smem>>
    %823 = vector.broadcast %822 : f32 to vector<19x27xf32>
    %824 = arith.mulf %465, %823 : vector<19x27xf32>
    %825 = arith.addf %821, %824 : vector<19x27xf32>
    %c58_244 = arith.constant 58 : index
    %826 = memref.load %arg2[%c58_244] : memref<96xf32, #tpu.memory_space<smem>>
    %827 = vector.broadcast %826 : f32 to vector<19x27xf32>
    %828 = arith.mulf %467, %827 : vector<19x27xf32>
    %829 = arith.addf %825, %828 : vector<19x27xf32>
    %c57_245 = arith.constant 57 : index
    %830 = memref.load %arg2[%c57_245] : memref<96xf32, #tpu.memory_space<smem>>
    %831 = vector.broadcast %830 : f32 to vector<19x27xf32>
    %832 = arith.mulf %469, %831 : vector<19x27xf32>
    %833 = arith.addf %829, %832 : vector<19x27xf32>
    %c56_246 = arith.constant 56 : index
    %834 = memref.load %arg2[%c56_246] : memref<96xf32, #tpu.memory_space<smem>>
    %835 = vector.broadcast %834 : f32 to vector<19x27xf32>
    %836 = arith.mulf %471, %835 : vector<19x27xf32>
    %837 = arith.addf %833, %836 : vector<19x27xf32>
    %c91_247 = arith.constant 91 : index
    %838 = memref.load %arg2[%c91_247] : memref<96xf32, #tpu.memory_space<smem>>
    %839 = vector.broadcast %838 : f32 to vector<19x27xf32>
    %840 = arith.mulf %473, %839 : vector<19x27xf32>
    %841 = arith.addf %837, %840 : vector<19x27xf32>
    %c90_248 = arith.constant 90 : index
    %842 = memref.load %arg2[%c90_248] : memref<96xf32, #tpu.memory_space<smem>>
    %843 = vector.broadcast %842 : f32 to vector<19x27xf32>
    %844 = arith.mulf %475, %843 : vector<19x27xf32>
    %845 = arith.addf %841, %844 : vector<19x27xf32>
    %c89_249 = arith.constant 89 : index
    %846 = memref.load %arg2[%c89_249] : memref<96xf32, #tpu.memory_space<smem>>
    %847 = vector.broadcast %846 : f32 to vector<19x27xf32>
    %848 = arith.mulf %477, %847 : vector<19x27xf32>
    %849 = arith.addf %845, %848 : vector<19x27xf32>
    %c88_250 = arith.constant 88 : index
    %850 = memref.load %arg2[%c88_250] : memref<96xf32, #tpu.memory_space<smem>>
    %851 = vector.broadcast %850 : f32 to vector<19x27xf32>
    %852 = arith.mulf %479, %851 : vector<19x27xf32>
    %853 = arith.addf %849, %852 : vector<19x27xf32>
    %854 = math.tanh %853 : vector<19x27xf32>
    %c1_251 = arith.constant 1 : index
    %c6_252 = arith.constant 6 : index
    %c0_253 = arith.constant 0 : index
    %c0_254 = arith.constant 0 : index
    %855 = vector.load %arg4[%c1_251, %c6_252, %c0_253, %c0_254] : memref<2x8x19x27xf32, #tpu.memory_space<vmem>>, vector<1x1x19x27xf32>
    %856 = vector.shape_cast %855 : vector<1x1x19x27xf32> to vector<19x27xf32>
    %857 = vector.shape_cast %854 : vector<19x27xf32> to vector<1x1x19x27xf32>
    tpu.vector_store %arg4[%c1_251, %c6_252, %c0_253, %c0_254], %857 {strides = array<i32>} : memref<2x8x19x27xf32, #tpu.memory_space<vmem>>, vector<1x1x19x27xf32>,
    %c7_255 = arith.constant 7 : index
    %858 = memref.load %arg3[%c7_255] : memref<8xf32, #tpu.memory_space<smem>>
    %859 = vector.broadcast %858 : f32 to vector<19x27xf32>
    %c31_256 = arith.constant 31 : index
    %860 = memref.load %arg2[%c31_256] : memref<96xf32, #tpu.memory_space<smem>>
    %861 = vector.broadcast %860 : f32 to vector<19x27xf32>
    %862 = arith.mulf %457, %861 : vector<19x27xf32>
    %863 = arith.addf %859, %862 : vector<19x27xf32>
    %c30_257 = arith.constant 30 : index
    %864 = memref.load %arg2[%c30_257] : memref<96xf32, #tpu.memory_space<smem>>
    %865 = vector.broadcast %864 : f32 to vector<19x27xf32>
    %866 = arith.mulf %459, %865 : vector<19x27xf32>
    %867 = arith.addf %863, %866 : vector<19x27xf32>
    %c29_258 = arith.constant 29 : index
    %868 = memref.load %arg2[%c29_258] : memref<96xf32, #tpu.memory_space<smem>>
    %869 = vector.broadcast %868 : f32 to vector<19x27xf32>
    %870 = arith.mulf %461, %869 : vector<19x27xf32>
    %871 = arith.addf %867, %870 : vector<19x27xf32>
    %c28_259 = arith.constant 28 : index
    %872 = memref.load %arg2[%c28_259] : memref<96xf32, #tpu.memory_space<smem>>
    %873 = vector.broadcast %872 : f32 to vector<19x27xf32>
    %874 = arith.mulf %463, %873 : vector<19x27xf32>
    %875 = arith.addf %871, %874 : vector<19x27xf32>
    %c63_260 = arith.constant 63 : index
    %876 = memref.load %arg2[%c63_260] : memref<96xf32, #tpu.memory_space<smem>>
    %877 = vector.broadcast %876 : f32 to vector<19x27xf32>
    %878 = arith.mulf %465, %877 : vector<19x27xf32>
    %879 = arith.addf %875, %878 : vector<19x27xf32>
    %c62_261 = arith.constant 62 : index
    %880 = memref.load %arg2[%c62_261] : memref<96xf32, #tpu.memory_space<smem>>
    %881 = vector.broadcast %880 : f32 to vector<19x27xf32>
    %882 = arith.mulf %467, %881 : vector<19x27xf32>
    %883 = arith.addf %879, %882 : vector<19x27xf32>
    %c61_262 = arith.constant 61 : index
    %884 = memref.load %arg2[%c61_262] : memref<96xf32, #tpu.memory_space<smem>>
    %885 = vector.broadcast %884 : f32 to vector<19x27xf32>
    %886 = arith.mulf %469, %885 : vector<19x27xf32>
    %887 = arith.addf %883, %886 : vector<19x27xf32>
    %c60_263 = arith.constant 60 : index
    %888 = memref.load %arg2[%c60_263] : memref<96xf32, #tpu.memory_space<smem>>
    %889 = vector.broadcast %888 : f32 to vector<19x27xf32>
    %890 = arith.mulf %471, %889 : vector<19x27xf32>
    %891 = arith.addf %887, %890 : vector<19x27xf32>
    %c95_264 = arith.constant 95 : index
    %892 = memref.load %arg2[%c95_264] : memref<96xf32, #tpu.memory_space<smem>>
    %893 = vector.broadcast %892 : f32 to vector<19x27xf32>
    %894 = arith.mulf %473, %893 : vector<19x27xf32>
    %895 = arith.addf %891, %894 : vector<19x27xf32>
    %c94_265 = arith.constant 94 : index
    %896 = memref.load %arg2[%c94_265] : memref<96xf32, #tpu.memory_space<smem>>
    %897 = vector.broadcast %896 : f32 to vector<19x27xf32>
    %898 = arith.mulf %475, %897 : vector<19x27xf32>
    %899 = arith.addf %895, %898 : vector<19x27xf32>
    %c93_266 = arith.constant 93 : index
    %900 = memref.load %arg2[%c93_266] : memref<96xf32, #tpu.memory_space<smem>>
    %901 = vector.broadcast %900 : f32 to vector<19x27xf32>
    %902 = arith.mulf %477, %901 : vector<19x27xf32>
    %903 = arith.addf %899, %902 : vector<19x27xf32>
    %c92_267 = arith.constant 92 : index
    %904 = memref.load %arg2[%c92_267] : memref<96xf32, #tpu.memory_space<smem>>
    %905 = vector.broadcast %904 : f32 to vector<19x27xf32>
    %906 = arith.mulf %479, %905 : vector<19x27xf32>
    %907 = arith.addf %903, %906 : vector<19x27xf32>
    %908 = math.tanh %907 : vector<19x27xf32>
    %c1_268 = arith.constant 1 : index
    %c7_269 = arith.constant 7 : index
    %c0_270 = arith.constant 0 : index
    %c0_271 = arith.constant 0 : index
    %909 = vector.load %arg4[%c1_268, %c7_269, %c0_270, %c0_271] : memref<2x8x19x27xf32, #tpu.memory_space<vmem>>, vector<1x1x19x27xf32>
    %910 = vector.shape_cast %909 : vector<1x1x19x27xf32> to vector<19x27xf32>
    %911 = vector.shape_cast %908 : vector<19x27xf32> to vector<1x1x19x27xf32>
    tpu.vector_store %arg4[%c1_268, %c7_269, %c0_270, %c0_271], %911 {strides = array<i32>} : memref<2x8x19x27xf32, #tpu.memory_space<vmem>>, vector<1x1x19x27xf32>,
    return
  }
  func.func @transform_0(%arg0: i32) -> (i32, i32, i32, i32) {
    %c0_i32 = arith.constant 0 : i32
    %c0_i32_0 = arith.constant 0 : i32
    %c0_i32_1 = arith.constant 0 : i32
    %c0_i32_2 = arith.constant 0 : i32
    return %arg0, %c0_i32, %c0_i32_0, %c0_i32_1 : i32, i32, i32, i32
  }
  func.func @transform_1(%arg0: i32) -> i32 {
    %c0_i32 = arith.constant 0 : i32
    %c0_i32_0 = arith.constant 0 : i32
    return %c0_i32 : i32
  }
  func.func @transform_2(%arg0: i32) -> i32 {
    %c0_i32 = arith.constant 0 : i32
    %c0_i32_0 = arith.constant 0 : i32
    return %c0_i32 : i32
  }
  func.func @transform_3(%arg0: i32) -> (i32, i32, i32, i32) {
    %c0_i32 = arith.constant 0 : i32
    %c0_i32_0 = arith.constant 0 : i32
    %c0_i32_1 = arith.constant 0 : i32
    %c0_i32_2 = arith.constant 0 : i32
    return %arg0, %c0_i32, %c0_i32_0, %c0_i32_1 : i32, i32, i32, i32
  }
}

</mosaic_0001>

<bundles_post_ra>
// kernel: _convt_tanh.1
= control target key start
LH: loop header
LB: loop body
LE: loop exit
PB: predicated region body
PF: predicated region fallthrough
CT: control target
= control target key end

     0   :  { %8 = vsyncpa [#allocation3], 0  ;;  %s5464_s0 = inlined_call_operand.vmem [shape: f32[2,3,21,29], index: 0, kind: input, shape index: {}]   ;;  %s5465_s1 = inlined_call_operand.vmem [shape: f32[96], index: 1, kind: input, shape index: {}]   ;;  %s5466_s2 = inlined_call_operand.vmem [shape: f32[8], index: 2, kind: input, shape index: {}]   ;;  %s5467_s3 = inlined_call_operand.vmem [shape: f32[2,8,19,27], index: 3, kind: output, shape index: {}]  }
   0x1   :  { %s18_s14 = sshll.u32 %s5465_s1, 4  ;;  %s19_s14 = int_to_ptr.vmem [resolvable:$true] %s18_s14 }
   0x2   :  { %9 = vsyncpa [#allocation5], 0  ;;  %s28_s17 = sshll.u32 %s5466_s2, 4  ;;  %s3369_s18 = scalar_lea.vmem %s19_s14, 16  ;;  %s29_s17 = int_to_ptr.vmem [resolvable:$true] %s28_s17 }
   0x3   :  { %p3370_p0 = scmp.ne.s32.totalorder %s19_s14, %s3369_s18  ;;  %p3374_p1 = scmp.lt.s32.totalorder %s19_s14, %s19_s14 }
   0x4   :  { %p3375_p2 = scmp.lt.s32.totalorder %s3369_s18, %s3369_s18 }
   0x6   :  { %p3376_p3 = por %p3375_p2, %p3374_p1 }
   0x8   :  { %p3377_p4 = pnand %p3376_p3, %p3370_p0 }
   0xa   :  { %3380 = shalt.err (!%p3377_p4)
}
   0xb   :  { %s3397_s19 = smov [#allocation2]   ;;  %s3381_s20 = scalar_lea.vmem %s29_s17, 16 }
   0xc   :  { %21 = dma.vmem_to_smem %s19_s14, 16, %s3397_s19, [#allocation3]  }
   0xd   :  { %p3382_p5 = scmp.ne.s32.totalorder %s29_s17, %s3381_s20  ;;  %p3386_p6 = scmp.lt.s32.totalorder %s29_s17, %s29_s17 }
   0xe   :  { %p3387_p7 = scmp.lt.s32.totalorder %s3381_s20, %s3381_s20 }
  0x10   :  { %p3388_p8 = por %p3387_p7, %p3386_p6 }
  0x12   :  { %p3389_p9 = pnand %p3388_p8, %p3382_p5 }
  0x14   :  { %3392 = shalt.err (!%p3389_p9)
}
  0x15   :  { %s3398_s1 = smov [#allocation4]  }
  0x16   :  { %31 = dma.vmem_to_smem %s29_s17, 16, %s3398_s1, [#allocation5]  }
  0x17   :  { %3393 = dma.done.wait [#allocation3], 16  }
  0x18   :  { %3394 = vsyncadd [#allocation3], 4294967280 }
  0x19   :  { %3395 = dma.done.wait [#allocation5], 16  }
  0x1a   :  { %3396 = vsyncadd [#allocation5], 4294967280 }
  0x1b   :  { %38 = sfence }
  0x1c   :  { %s2932_s2 = sld [smem:[#allocation2 + $0x2]]  ;;  %s97_s21 = sld [smem:[#allocation2]]  ;;  %v3429_v0 = vld [vmem:[%s5464_s0 + $0x10] sm:$0x7]  ;;  %v3434_v1 = vld [vmem:[%s5464_s0] sm:$0xff]  ;;  %v3444_v4 = vld [vmem:[%s5464_s0 + $0x8] sm:$0xff] }
  0x1d   :  { %v3439_v3 = vld [vmem:[%s5464_s0 + $0x2] sm:$0xff]  ;;  %s2935_s30 = sld [smem:[#allocation2 + $0x22]]  ;;  %s3399_s4 = smov 126   ;;  %v3455_v10 = vld [vmem:[%s5464_s0 + $0x12] sm:$0x7]  ;;  %v3460_v11 = vld [vmem:[%s5464_s0 + $0xa] sm:$0xff] }
  0x1e   :  { %s2937_s9 = sld [smem:[#allocation2 + $0x20]]  ;;  %v3469_v14 = vld [vmem:[%s5464_s0 + $0x20] sm:$0xff]  ;;  %v3474_v16 = vld [vmem:[%s5464_s0 + $0x18] sm:$0xff]  ;;  %v3488_v21 = vld [vmem:[%s5464_s0 + $0x28] sm:$0x7]  ;;  %s2939_s18 = sld [smem:[#allocation2 + $0x42]] }
  0x1f   :  { %v3483_v19 = vld [vmem:[%s5464_s0 + $0x1a] sm:$0xff]  ;;  %v3497_v24 = vld [vmem:[%s5464_s0 + $0x2a] sm:$0x7]  ;;  %v3502_v25 = vld [vmem:[%s5464_s0 + $0x22] sm:$0xff]  ;;  %s2948_s10 = sld [smem:[#allocation2 + $0x26]]  ;;  %s2950_s11 = sld [smem:[#allocation2 + $0x24]] }
  0x20   :  { %v3511_v28 = vld [vmem:[%s5464_s0 + $0x38] sm:$0xff]  ;;  %v3516_v30 = vld [vmem:[%s5464_s0 + $0x30] sm:$0xff]  ;;  %v3530_v35 = vld [vmem:[%s5464_s0 + $0x40] sm:$0x7]  ;;  %s2952_s12 = sld [smem:[#allocation2 + $0x46]]  ;;  %s2954_s13 = sld [smem:[#allocation2 + $0x44]] }
  0x21   :  { %v3525_v33 = vld [vmem:[%s5464_s0 + $0x32] sm:$0xff]  ;;  %v3539_v38 = vld [vmem:[%s5464_s0 + $0x42] sm:$0x7]  ;;  %v3544_v39 = vld [vmem:[%s5464_s0 + $0x3a] sm:$0xff]  ;;  %s2960_s14 = sld [smem:[#allocation2 + $0xa]]  ;;  %s2962_s15 = sld [smem:[#allocation2 + $0x8]] }
  0x22   :  { %v70_v2 = vstv %s2932_s2  ;;  %v98_v7 = vstv %s97_s21  ;;  %s2941_s21 = sld [smem:[#allocation2 + $0x40]]  ;;  %s2964_s16 = sld [smem:[#allocation2 + $0x2a]]  ;;  %vm232_vm0 = vcmask 220160   ;;  %vm235_vm1 = vcmask 215040  }
  0x23   :  { %v73_v5 = vmul.f32 %v70_v2, %v3429_v0  ;;  %v71_v6 = vmul.f32 %v70_v2, %v3434_v1  ;;  %v99_v8 = vmul.f32 %v98_v7, %v3439_v3  ;;  %v72_v9 = vmul.f32 %v70_v2, %v3444_v4  ;;  %s2966_s17 = sld [smem:[#allocation2 + $0x28]]  ;;  %s2976_s20 = sld [smem:[#allocation2 + $0xe]] }
  0x24   :  { %v101_v12 = vmul.f32 %v98_v7, %v3455_v10  ;;  %v100_v13 = vmul.f32 %v98_v7, %v3460_v11  ;;  %v126_v15 = vstv %s2935_s30  ;;  %v154_v20 = vstv %s2937_s9  ;;  %s2944_s30 = sld [smem:[#allocation2 + $0x6]]  ;;  %s2946_s9 = sld [smem:[#allocation2 + $0x4]] }
  0x25   :  { %81 = vrot.lane.b32.xlu1 %v73_v5, %s3399_s4  ;;  %77 = vrot.lane.b32.xlu0 %v71_v6, %s3399_s4  ;;  %v128_v17 = vmul.f32 %v3469_v14, %v126_v15  ;;  %v127_v18 = vmul.f32 %v3474_v16, %v126_v15  ;;  %v155_v22 = vmul.f32 %v3483_v19, %v154_v20  ;;  %v182_v29 = vstv %s2939_s18  ;;  %s2968_s18 = sld [smem:[#allocation2 + $0x4a]]  ;;  %s2970_s19 = sld [smem:[#allocation2 + $0x48]] }
  0x26   :  { %v129_v23 = vmul.f32 %v3488_v21, %v126_v15  ;;  %v157_v26 = vmul.f32 %v3497_v24, %v154_v20  ;;  %v156_v27 = vmul.f32 %v3502_v25, %v154_v20  ;;  %v184_v31 = vmul.f32 %v3511_v28, %v182_v29  ;;  %s2931_s1 = sld [smem:[#allocation2 + $0x3]]  ;;  %s2978_s2 = sld [smem:[#allocation2 + $0xc]] }
  0x27   :  { %v183_v32 = vmul.f32 %v3516_v30, %v182_v29  ;;  %v185_v37 = vmul.f32 %v3530_v35, %v182_v29  ;;  %v304_v50 = vstv %s2948_s10  ;;  %v332_v53 = vstv %s2950_s11  ;;  %s2933_s22 = sld [smem:[#allocation2 + $0x1]]  ;;  %s2980_s23 = sld [smem:[#allocation2 + $0x2e]] }
  0x28   :  { %v210_v34 = vstv %s2941_s21  ;;  %v306_v51 = vmul.f32 %v3469_v14, %v304_v50  ;;  %v305_v52 = vmul.f32 %v3474_v16, %v304_v50  ;;  %v333_v54 = vmul.f32 %v3483_v19, %v332_v53  ;;  %s59_s21 = sld [smem:[#allocation4]]  ;;  %s2982_s24 = sld [smem:[#allocation2 + $0x2c]] }
  0x29   :  { %105 = vrot.lane.b32.xlu1 %v99_v8, %s3399_s4  ;;  %79 = vrot.lane.b32.xlu0 %v72_v9, %s3399_s4  ;;  %v211_v36 = vmul.f32 %v3525_v33, %v210_v34  ;;  %v213_v40 = vmul.f32 %v3539_v38, %v210_v34  ;;  %v212_v41 = vmul.f32 %v3544_v39, %v210_v34  ;;  %v360_v58 = vstv %s2952_s12  ;;  %s2934_s25 = sld [smem:[#allocation2 + $0x23]]  ;;  %s2936_s26 = sld [smem:[#allocation2 + $0x21]] }
  0x2a   :  { %v248_v42 = vstv %s2944_s30  ;;  %v276_v45 = vstv %s2946_s9  ;;  %v307_v55 = vmul.f32 %v3488_v21, %v304_v50  ;;  %v335_v56 = vmul.f32 %v3497_v24, %v332_v53  ;;  %s3643_s27 = sld [smem:[#allocation2 + $0x4e]]  ;;  %s2986_s28 = sld [smem:[#allocation2 + $0x4c]] }
  0x2b   :  { %v250_v43 = vmul.f32 %v248_v42, %v3444_v4  ;;  %v249_v44 = vmul.f32 %v248_v42, %v3434_v1  ;;  %v277_v46 = vmul.f32 %v276_v45, %v3439_v3  ;;  %v251_v47 = vmul.f32 %v248_v42, %v3429_v0  ;;  %s2938_s29 = sld [smem:[#allocation2 + $0x43]]  ;;  %s2940_s30 = sld [smem:[#allocation2 + $0x41]] }
  0x2c   :  { %v279_v48 = vmul.f32 %v276_v45, %v3455_v10  ;;  %v278_v49 = vmul.f32 %v276_v45, %v3460_v11  ;;  %v334_v57 = vmul.f32 %v3502_v25, %v332_v53  ;;  %v362_v59 = vmul.f32 %v3511_v28, %v360_v58  ;;  %s2992_s5 = sld [smem:[#allocation2 + $0x12]]  ;;  %s2943_s6 = sld [smem:[#allocation2 + $0x7]] }
  0x2d   :  { %109 = vrot.lane.b32.xlu1 %v101_v12, %s3399_s4  ;;  %107 = vrot.lane.b32.xlu0 %v100_v13, %s3399_s4  ;;  %v361_v60 = vmul.f32 %v3516_v30, %v360_v58  ;;  %v388_v61 = vstv %s2954_s13  ;;  %v363_v63 = vmul.f32 %v3530_v35, %v360_v58  ;;  %v425_v6 = vstv %s2960_s14  ;;  %s2994_s7 = sld [smem:[#allocation2 + $0x10]]  ;;  %s2942_s8 = sld [smem:[#allocation4 + $0x1]] }
  0x2e   :  { %v389_v62 = vmul.f32 %v3525_v33, %v388_v61  ;;  %v391_v2 = vmul.f32 %v3539_v38, %v388_v61  ;;  %v390_v5 = vmul.f32 %v3544_v39, %v388_v61  ;;  %v427_v7 = vmul.f32 %v425_v6, %v3444_v4  ;;  %s3677_s9 = sld [smem:[#allocation2 + $0x5]]  ;;  %s3685_s10 = sld [smem:[#allocation2 + $0x32]] }
  0x2f   :  { %v426_v8 = vmul.f32 %v425_v6, %v3434_v1  ;;  %v453_v9 = vstv %s2962_s15  ;;  %v428_v13 = vmul.f32 %v425_v6, %v3429_v0  ;;  %v90_v53 = vstv %s2933_s22  ;;  %s3693_s11 = sld [smem:[#allocation2 + $0x30]]  ;;  %s3696_s12 = sld [smem:[#allocation2 + $0x27]] }
  0x30   :  { %v454_v12 = vmul.f32 %v453_v9, %v3439_v3  ;;  %v456_v15 = vmul.f32 %v453_v9, %v3455_v10  ;;  %s3703_s13 = sld [smem:[#allocation2 + $0x25]]  ;;  %s3714_s14 = sld [smem:[#allocation2 + $0x52]] }
  0x31   :  { %135 = vrot.lane.b32.xlu1 %v128_v17, %s3399_s4  ;;  %133 = vrot.lane.b32.xlu0 %v127_v18, %s3399_s4  ;;  %v455_v17 = vmul.f32 %v453_v9, %v3460_v11  ;;  %v481_v18 = vstv %s2964_s16  ;;  %v92_v9 = vmul.f32 %v90_v53, %v3460_v11  ;;  %s3008_s22 = sld [smem:[#allocation2 + $0x16]]  ;;  %s3024_s15 = sld [smem:[#allocation2 + $0x1a]] }
  0x32   :  { %v483_v20 = vmul.f32 %v3469_v14, %v481_v18  ;;  %s3851_s16 = sld [smem:[#allocation2 + $0xf]] }
  0x35   :  { %161 = vrot.lane.b32.xlu1 %v155_v22, %s3399_s4  ;;  %137 = vrot.lane.b32.xlu0 %v129_v23, %s3399_s4  ;;  %v482_v22 = vmul.f32 %v3474_v16, %v481_v18  ;;  %v509_v23 = vstv %s2966_s17  ;;  %s3727_s17 = sld [smem:[#allocation2 + $0x47]] }
  0x36   :  { %v512_v29 = vmul.f32 %v3497_v24, %v509_v23 }
  0x39   :  { %165 = vrot.lane.b32.xlu1 %v157_v26, %s3399_s4  ;;  %163 = vrot.lane.b32.xlu0 %v156_v27, %s3399_s4  ;;  %v510_v26 = vmul.f32 %v3483_v19, %v509_v23  ;;  %v484_v27 = vmul.f32 %v3488_v21, %v481_v18 }
  0x3d   :  { %191 = vrot.lane.b32.xlu1 %v184_v31, %s3399_s4  ;;  %189 = vrot.lane.b32.xlu0 %v183_v32, %s3399_s4  ;;  %v511_v31 = vmul.f32 %v3502_v25, %v509_v23  ;;  %v537_v32 = vstv %s2968_s18  ;;  %s3730_s18 = sld [smem:[#allocation2 + $0x50]] }
  0x3e   :  { %v539_v34 = vmul.f32 %v3511_v28, %v537_v32 }
  0x41   :  { %217 = vrot.lane.b32.xlu1 %v211_v36, %s3399_s4  ;;  %193 = vrot.lane.b32.xlu0 %v185_v37, %s3399_s4  ;;  %v538_v36 = vmul.f32 %v3516_v30, %v537_v32  ;;  %v565_v37 = vstv %s2970_s19  ;;  %s4057_s19 = sld [smem:[#allocation2 + $0x3e]] }
  0x42   :  { %v568_v42 = vmul.f32 %v3539_v38, %v565_v37 }
  0x45   :  { %221 = vrot.lane.b32.xlu1 %v213_v40, %s3399_s4  ;;  %219 = vrot.lane.b32.xlu0 %v212_v41, %s3399_s4  ;;  %v566_v40 = vmul.f32 %v3525_v33, %v565_v37  ;;  %v540_v41 = vmul.f32 %v3530_v35, %v537_v32 }
  0x49   :  { %257 = vrot.lane.b32.xlu1 %v250_v43, %s3399_s4  ;;  %255 = vrot.lane.b32.xlu0 %v249_v44, %s3399_s4  ;;  %v567_v43 = vmul.f32 %v3544_v39, %v565_v37  ;;  %v602_v44 = vstv %s2976_s20  ;;  %s3866_s20 = sld [smem:[#allocation4 + $0x3]] }
  0x4a   :  { %v604_v45 = vmul.f32 %v602_v44, %v3444_v4 }
  0x4d   :  { %283 = vrot.lane.b32.xlu1 %v277_v46, %s3399_s4  ;;  %259 = vrot.lane.b32.xlu0 %v251_v47, %s3399_s4  ;;  %v603_v46 = vmul.f32 %v602_v44, %v3434_v1  ;;  %v62_v47 = vstv %s2931_s1  ;;  %s3868_s1 = sld [smem:[#allocation2 + $0xd]] }
  0x51   :  { %287 = vrot.lane.b32.xlu1 %v279_v48, %s3399_s4  ;;  %285 = vrot.lane.b32.xlu0 %v278_v49, %s3399_s4  ;;  %v630_v48 = vstv %s2978_s2  ;;  %v63_v49 = vmul.f32 %v62_v47, %v3434_v1  ;;  %s4077_s2 = sld [smem:[#allocation2 + $0x31]] }
  0x52   :  { %v631_v50 = vmul.f32 %v630_v48, %v3439_v3  ;;  %v632_v58 = vmul.f32 %v630_v48, %v3460_v11 }
  0x55   :  { %313 = vrot.lane.b32.xlu1 %v306_v51, %s3399_s4  ;;  %311 = vrot.lane.b32.xlu0 %v305_v52, %s3399_s4  ;;  %v605_v51 = vmul.f32 %v602_v44, %v3429_v0  ;;  %v60_v52 = vstv %s59_s21  ;;  %s2953_s21 = sld [smem:[#allocation2 + $0x45]] }
  0x59   :  { %339 = vrot.lane.b32.xlu1 %v333_v54, %s3399_s4  ;;  %315 = vrot.lane.b32.xlu0 %v307_v55, %s3399_s4  ;;  %v65_v54 = vmul.f32 %v62_v47, %v3429_v0  ;;  %v66_v55 = vadd.f32 %v63_v49, %v60_v52  ;;  %v714_v49 = vstv %s3643_s27  ;;  %s3775_s27 = sld [smem:[#allocation2 + $0x36]] }
  0x5d   :  { %343 = vrot.lane.b32.xlu1 %v335_v56, %s3399_s4  ;;  %341 = vrot.lane.b32.xlu0 %v334_v57, %s3399_s4  ;;  %v64_v56 = vmul.f32 %v62_v47, %v3444_v4  ;;  %v633_v57 = vmul.f32 %v630_v48, %v3455_v10 }
  0x61   :  { %369 = vrot.lane.b32.xlu1 %v362_v59, %s3399_s4  ;;  %367 = vrot.lane.b32.xlu0 %v361_v60, %s3399_s4  ;;  %v91_v59 = vmul.f32 %v90_v53, %v3439_v3  ;;  %v658_v60 = vstv %s2980_s23  ;;  %s2959_s23 = sld [smem:[#allocation2 + $0xb]] }
  0x62   :  { %v660_v6 = vmul.f32 %v3469_v14, %v658_v60 }
  0x65   :  { %395 = vrot.lane.b32.xlu1 %v389_v62, %s3399_s4  ;;  %371 = vrot.lane.b32.xlu0 %v363_v63, %s3399_s4  ;;  %v68_v63 = vadd.f32 %v65_v54, %v60_v52  ;;  %v716_v54 = vmul.f32 %v3511_v28, %v714_v49 }
  0x69   :  { %399 = vrot.lane.b32.xlu1 %v391_v2, %s3399_s4  ;;  %397 = vrot.lane.b32.xlu0 %v390_v5, %s3399_s4  ;;  %v67_v5 = vadd.f32 %v64_v56, %v60_v52 }
  0x6d   :  { %434 = vrot.lane.b32.xlu1 %v427_v7, %s3399_s4  ;;  %432 = vrot.lane.b32.xlu0 %v426_v8, %s3399_s4  ;;  %v659_v7 = vmul.f32 %v3474_v16, %v658_v60 }
  0x71   :  { %460 = vrot.lane.b32.xlu1 %v454_v12, %s3399_s4  ;;  %436 = vrot.lane.b32.xlu0 %v428_v13, %s3399_s4  ;;  %v686_v12 = vstv %s2982_s24  ;;  %s3010_s24 = sld [smem:[#allocation2 + $0x14]] }
  0x72   :  { %v687_v23 = vmul.f32 %v3483_v19, %v686_v12 }
  0x75   :  { %464 = vrot.lane.b32.xlu1 %v456_v15, %s3399_s4  ;;  %462 = vrot.lane.b32.xlu0 %v455_v17, %s3399_s4  ;;  %v118_v17 = vstv %s2934_s25  ;;  %s2958_s25 = sld [smem:[#allocation4 + $0x2]] }
  0x76   :  { %v119_v32 = vmul.f32 %v3474_v16, %v118_v17 }
  0x79   :  { %490 = vrot.lane.b32.xlu1 %v483_v20, %s3399_s4  ;;  %488 = vrot.lane.b32.xlu0 %v482_v22, %s3399_s4  ;;  %v93_v22 = vmul.f32 %v90_v53, %v3455_v10 }
  0x7d   :  { %516 = vrot.lane.b32.xlu1 %v510_v26, %s3399_s4  ;;  %492 = vrot.lane.b32.xlu0 %v484_v27, %s3399_s4  ;;  %v661_v26 = vmul.f32 %v3488_v21, %v658_v60  ;;  %v120_v27 = vmul.f32 %v3469_v14, %v118_v17 }
  0x81   :  { %520 = vrot.lane.b32.xlu1 %v512_v29, %s3399_s4  ;;  %518 = vrot.lane.b32.xlu0 %v511_v31, %s3399_s4 }
  0x85   :  { %546 = vrot.lane.b32.xlu1 %v539_v34, %s3399_s4  ;;  %544 = vrot.lane.b32.xlu0 %v538_v36, %s3399_s4  ;;  %v146_v34 = vstv %s2936_s26  ;;  %s3767_s26 = sld [smem:[#allocation2 + $0x9]] }
  0x86   :  { %v147_v44 = vmul.f32 %v3483_v19, %v146_v34  ;;  %v149_v53 = vmul.f32 %v3497_v24, %v146_v34  ;;  %v148_v56 = vmul.f32 %v3502_v25, %v146_v34  ;;  %v779_v34 = vstv %s2992_s5  ;;  %s3805_s5 = sld [smem:[#allocation2 + $0x56]] }
  0x89   :  { %572 = vrot.lane.b32.xlu1 %v566_v40, %s3399_s4  ;;  %548 = vrot.lane.b32.xlu0 %v540_v41, %s3399_s4 }
  0x8d   :  { %576 = vrot.lane.b32.xlu1 %v568_v42, %s3399_s4  ;;  %574 = vrot.lane.b32.xlu0 %v567_v43, %s3399_s4  ;;  %v689_v42 = vmul.f32 %v3497_v24, %v686_v12  ;;  %v688_v43 = vmul.f32 %v3502_v25, %v686_v12 }
  0x91   :  { %611 = vrot.lane.b32.xlu1 %v604_v45, %s3399_s4  ;;  %609 = vrot.lane.b32.xlu0 %v603_v46, %s3399_s4  ;;  %v121_v45 = vmul.f32 %v3488_v21, %v118_v17 }
  0x95   :  { %637 = vrot.lane.b32.xlu1 %v631_v50, %s3399_s4  ;;  %613 = vrot.lane.b32.xlu0 %v605_v51, %s3399_s4 }
  0x97   :  { %v82_v61 = vpop.permute.xlu1 %81  ;;  %v78_v62 = vpop.permute.xlu0 %77 }
  0x98   :  { %v86_v2 = vadd.f32 %v78_v62, %v66_v55  ;;  %v88_v18 = vadd.f32 %v82_v61, %v68_v63  ;;  %v715_v55 = vmul.f32 %v3516_v30, %v714_v49  ;;  %v174_v61 = vstv %s2938_s29  ;;  %s3785_s29 = sld [smem:[#allocation2 + $0x34]] }
  0x99   :  { %641 = vrot.lane.b32.xlu1 %v633_v57, %s3399_s4  ;;  %639 = vrot.lane.b32.xlu0 %v632_v58, %s3399_s4  ;;  %v742_v57 = vstv %s2986_s28  ;;  %s3782_s28 = sld [smem:[#allocation2 + $0x2b]] }
  0x9a   :  { %v94_v8 = vadd.f32 %v91_v59, %v86_v2  ;;  %v96_v40 = vadd.f32 %v93_v22, %v88_v18  ;;  %v745_v22 = vmul.f32 %v3539_v38, %v742_v57 }
  0x9b   :  { %v106_v13 = vpop.permute.xlu1 %105  ;;  %v80_v15 = vpop.permute.xlu0 %79 }
  0x9c   :  { %v87_v20 = vadd.f32 %v80_v15, %v67_v5  ;;  %v114_v29 = vadd.f32 %v106_v13, %v94_v8  ;;  %v717_v5 = vmul.f32 %v3530_v35, %v714_v49  ;;  %v175_v8 = vmul.f32 %v3516_v30, %v174_v61 }
  0x9d   :  { %667 = vrot.lane.b32.xlu1 %v660_v6, %s3399_s4  ;;  %665 = vrot.lane.b32.xlu0 %v659_v7, %s3399_s4  ;;  %v743_v6 = vmul.f32 %v3525_v33, %v742_v57  ;;  %v176_v7 = vmul.f32 %v3511_v28, %v174_v61  ;;  %v202_v15 = vstv %s2940_s30  ;;  %v807_v49 = vstv %s2994_s7  ;;  %s3795_s30 = sld [smem:[#allocation2 + $0x29]]  ;;  %s3916_s7 = sld [smem:[#allocation2 + $0x2f]] }
  0x9e   :  { %v95_v31 = vadd.f32 %v92_v9, %v87_v20  ;;  %v122_v48 = vadd.f32 %v119_v32, %v114_v29 }
  0x9f   :  { %v110_v36 = vpop.permute.xlu1 %109  ;;  %v108_v37 = vpop.permute.xlu0 %107 }
  0xa0   :  { %v115_v41 = vadd.f32 %v108_v37, %v95_v31  ;;  %v116_v46 = vadd.f32 %v110_v36, %v96_v40 }
  0xa1   :  { %693 = vrot.lane.b32.xlu1 %v687_v23, %s3399_s4  ;;  %669 = vrot.lane.b32.xlu0 %v661_v26, %s3399_s4  ;;  %v744_v23 = vmul.f32 %v3544_v39, %v742_v57  ;;  %v203_v26 = vmul.f32 %v3525_v33, %v202_v15  ;;  %v238_v57 = vstv %s2942_s8  ;;  %s3817_s8 = sld [smem:[#allocation2 + $0x4b]] }
  0xa2   :  { %v123_v47 = vadd.f32 %v120_v27, %v115_v41  ;;  %v124_v60 = vadd.f32 %v121_v45, %v116_v46  ;;  %v177_v27 = vmul.f32 %v3530_v35, %v174_v61  ;;  %v205_v41 = vmul.f32 %v3539_v38, %v202_v15 }
  0xa3   :  { %v136_v50 = vpop.permute.xlu1 %135  ;;  %v134_v51 = vpop.permute.xlu0 %133  ;;  %v240_v45 = vstv %s2943_s6  ;;  %s4135_s6 = sld [smem:[#allocation2 + $0x17]] }
  0xa4   :  { %v142_v52 = vadd.f32 %v134_v51, %v122_v48  ;;  %v143_v58 = vadd.f32 %v136_v50, %v123_v47 }
  0xa5   :  { %697 = vrot.lane.b32.xlu1 %v689_v42, %s3399_s4  ;;  %695 = vrot.lane.b32.xlu0 %v688_v43, %s3399_s4  ;;  %v781_v42 = vmul.f32 %v779_v34, %v3444_v4  ;;  %v780_v43 = vmul.f32 %v779_v34, %v3434_v1 }
  0xa6   :  { %v150_v59 = vadd.f32 %v147_v44, %v142_v52  ;;  %v151_v13 = vadd.f32 %v148_v56, %v143_v58  ;;  %v204_v44 = vmul.f32 %v3544_v39, %v202_v15  ;;  %v782_v56 = vmul.f32 %v779_v34, %v3429_v0 }
  0xa7   :  { %v162_v62 = vpop.permute.xlu1 %161  ;;  %v138_v63 = vpop.permute.xlu0 %137  ;;  %v835_v15 = vstv %s3685_s10  ;;  %v863_v34 = vstv %s3693_s11  ;;  %s4355_s10 = sld [smem:[#allocation2 + $0x3b]]  ;;  %s4358_s11 = sld [smem:[#allocation2 + $0x24]] }
  0xa8   :  { %v144_v2 = vadd.f32 %v138_v63, %v124_v60  ;;  %v170_v9 = vadd.f32 %v162_v62, %v150_v59  ;;  %v242_v60 = vmul.f32 %v240_v45, %v3444_v4  ;;  %v268_v63 = vstv %s3677_s9  ;;  %s3820_s9 = sld [smem:[#allocation2 + $0x54]] }
  0xa9   :  { %723 = vrot.lane.b32.xlu1 %v716_v54, %s3399_s4  ;;  %721 = vrot.lane.b32.xlu0 %v715_v55, %s3399_s4  ;;  %v241_v54 = vmul.f32 %v240_v45, %v3434_v1  ;;  %v808_v55 = vmul.f32 %v807_v49, %v3439_v3 }
  0xaa   :  { %v152_v12 = vadd.f32 %v149_v53, %v144_v2  ;;  %v178_v32 = vadd.f32 %v175_v8, %v170_v9  ;;  %v810_v8 = vmul.f32 %v807_v49, %v3455_v10  ;;  %v809_v9 = vmul.f32 %v807_v49, %v3460_v11 }
  0xab   :  { %v166_v17 = vpop.permute.xlu1 %165  ;;  %v164_v18 = vpop.permute.xlu0 %163 }
  0xac   :  { %v171_v20 = vadd.f32 %v164_v18, %v151_v13  ;;  %v172_v29 = vadd.f32 %v166_v17, %v152_v12  ;;  %v245_v12 = vadd.f32 %v242_v60, %v238_v57  ;;  %v269_v13 = vmul.f32 %v268_v63, %v3439_v3 }
  0xad   :  { %749 = vrot.lane.b32.xlu1 %v743_v6, %s3399_s4  ;;  %725 = vrot.lane.b32.xlu0 %v717_v5, %s3399_s4  ;;  %v244_v6 = vadd.f32 %v241_v54, %v238_v57 }
  0xae   :  { %v179_v31 = vadd.f32 %v176_v7, %v171_v20  ;;  %v180_v48 = vadd.f32 %v177_v27, %v172_v29  ;;  %v243_v7 = vmul.f32 %v240_v45, %v3429_v0  ;;  %v271_v27 = vmul.f32 %v268_v63, %v3455_v10 }
  0xaf   :  { %v192_v36 = vpop.permute.xlu1 %191  ;;  %v190_v37 = vpop.permute.xlu0 %189 }
  0xb0   :  { %v198_v40 = vadd.f32 %v190_v37, %v178_v32  ;;  %v199_v46 = vadd.f32 %v192_v36, %v179_v31  ;;  %v270_v32 = vmul.f32 %v268_v63, %v3460_v11  ;;  %v891_v63 = vstv %s3714_s14  ;;  %s2969_s14 = sld [smem:[#allocation2 + $0x49]] }
  0xb1   :  { %753 = vrot.lane.b32.xlu1 %v745_v22, %s3399_s4  ;;  %751 = vrot.lane.b32.xlu0 %v744_v23, %s3399_s4  ;;  %v246_v22 = vadd.f32 %v243_v7, %v238_v57  ;;  %v837_v23 = vmul.f32 %v3469_v14, %v835_v15  ;;  %v865_v57 = vmul.f32 %v3502_v25, %v863_v34 }
  0xb2   :  { %v206_v47 = vadd.f32 %v203_v26, %v198_v40  ;;  %v207_v59 = vadd.f32 %v204_v44, %v199_v46  ;;  %v836_v26 = vmul.f32 %v3474_v16, %v835_v15  ;;  %v296_v40 = vstv %s3696_s12  ;;  %s3040_s12 = sld [smem:[#allocation2 + $0x1e]] }
  0xb3   :  { %v218_v50 = vpop.permute.xlu1 %217  ;;  %v194_v51 = vpop.permute.xlu0 %193  ;;  %v838_v44 = vmul.f32 %v3488_v21, %v835_v15  ;;  %v298_v45 = vmul.f32 %v3469_v14, %v296_v40  ;;  %v324_v46 = vstv %s3703_s13  ;;  %s3939_s13 = sld [smem:[#allocation2 + $0x2d]] }
  0xb4   :  { %v226_v52 = vadd.f32 %v218_v50, %v206_v47  ;;  %v200_v53 = vadd.f32 %v194_v51, %v180_v48  ;;  %v297_v50 = vmul.f32 %v3474_v16, %v296_v40  ;;  %v326_v7 = vmul.f32 %v3502_v25, %v324_v46 }
  0xb5   :  { %788 = vrot.lane.b32.xlu1 %v781_v42, %s3399_s4  ;;  %786 = vrot.lane.b32.xlu0 %v780_v43, %s3399_s4  ;;  %v864_v43 = vmul.f32 %v3483_v19, %v863_v34 }
  0xb6   :  { %3201 = vtanh.f32 %v226_v52  ;;  %v208_v58 = vadd.f32 %v205_v41, %v200_v53 }
  0xb7   :  { %v222_v61 = vpop.permute.xlu1 %221  ;;  %v220_v62 = vpop.permute.xlu0 %219 }
  0xb8   :  { %v228_v2 = vadd.f32 %v222_v61, %v208_v58  ;;  %v227_v5 = vadd.f32 %v220_v62, %v207_v59  ;;  %v325_v58 = vmul.f32 %v3483_v19, %v324_v46  ;;  %v299_v59 = vmul.f32 %v3488_v21, %v296_v40 }
  0xb9   :  { %814 = vrot.lane.b32.xlu1 %v808_v55, %s3399_s4  ;;  %790 = vrot.lane.b32.xlu0 %v782_v56, %s3399_s4  ;;  %v866_v55 = vmul.f32 %v3497_v24, %v863_v34  ;;  %v380_v40 = vstv %s2953_s21  ;;  %s4087_s21 = sld [smem:[#allocation2 + $0x5e]] }
  0xba   :  { %3203 = vtanh.f32 %v228_v2 }
  0xbb   :  { %3205 = vtanh.f32 %v227_v5  ;;  %v258_v17 = vpop.permute.xlu1 %257  ;;  %v256_v18 = vpop.permute.xlu0 %255 }
  0xbc   :  { %v264_v20 = vadd.f32 %v256_v18, %v244_v6  ;;  %v265_v29 = vadd.f32 %v258_v17, %v245_v12  ;;  %v327_v12 = vmul.f32 %v3497_v24, %v324_v46 }
  0xbd   :  { %818 = vrot.lane.b32.xlu1 %v810_v8, %s3399_s4  ;;  %816 = vrot.lane.b32.xlu0 %v809_v9, %s3399_s4  ;;  %v893_v8 = vmul.f32 %v3511_v28, %v891_v63  ;;  %v892_v9 = vmul.f32 %v3516_v30, %v891_v63 }
  0xbe   :  { %v272_v31 = vadd.f32 %v269_v13, %v264_v20  ;;  %v273_v49 = vadd.f32 %v270_v32, %v265_v29  ;;  %v352_v13 = vstv %s3727_s17  ;;  %v919_v20 = vstv %s3730_s18  ;;  %s3853_s17 = sld [smem:[#allocation2 + $0x18]]  ;;  %s3959_s18 = sld [smem:[#allocation2 + $0x5a]] }
  0xbf   :  { %v284_v36 = vpop.permute.xlu1 %283  ;;  %v260_v37 = vpop.permute.xlu0 %259  ;;  %v920_v29 = vmul.f32 %v3525_v33, %v919_v20  ;;  %v354_v32 = vmul.f32 %v3511_v28, %v352_v13  ;;  %v921_v46 = vmul.f32 %v3544_v39, %v919_v20 }
  0xc0   :  { %v3202_v41 = vpop.eup %3201  ;;  %v266_v42 = vadd.f32 %v260_v37, %v246_v22  ;;  %v292_v47 = vadd.f32 %v284_v36, %v272_v31  ;;  %v894_v31 = vmul.f32 %v3530_v35, %v891_v63  ;;  %v984_v63 = vstv %s3010_s24  ;;  %s3984_s24 = sld [smem:[#allocation2 + $0x58]] }
  0xc1   :  { %233 = vst.msk [vmem:[%s5467_s3] sm:$0xff] %vm232_vm0, %v3202_v41  ;;  %844 = vrot.lane.b32.xlu1 %v837_v23, %s3399_s4  ;;  %842 = vrot.lane.b32.xlu0 %v836_v26, %s3399_s4 }
  0xc2   :  { %v274_v48 = vadd.f32 %v271_v27, %v266_v42  ;;  %v300_v62 = vadd.f32 %v297_v50, %v292_v47  ;;  %v353_v27 = vmul.f32 %v3516_v30, %v352_v13  ;;  %v381_v47 = vmul.f32 %v3525_v33, %v380_v40 }
  0xc3   :  { %v288_v51 = vpop.permute.xlu1 %287  ;;  %v286_v52 = vpop.permute.xlu0 %285 }
  0xc4   :  { %v3204_v53 = vpop.eup %3203  ;;  %v293_v54 = vadd.f32 %v286_v52, %v273_v49  ;;  %v294_v60 = vadd.f32 %v288_v51, %v274_v48  ;;  %v956_v51 = vstv %s3008_s22  ;;  %s4199_s22 = sld [smem:[#allocation2 + $0x20]] }
  0xc5   :  { %v3206_v56 = vpop.eup %3205  ;;  %236 = vst.msk [vmem:[%s5467_s3 + $0x10] sm:$0x7] %vm235_vm1, %v3204_v53  ;;  %870 = vrot.lane.b32.xlu1 %v864_v43, %s3399_s4  ;;  %846 = vrot.lane.b32.xlu0 %v838_v44, %s3399_s4  ;;  %v355_v44 = vmul.f32 %v3530_v35, %v352_v13  ;;  %v415_v13 = vstv %s2958_s25  ;;  %s4102_s25 = sld [smem:[#allocation2 + $0x5c]] }
  0xc6   :  { %234 = vst.msk [vmem:[%s5467_s3 + $0x8] sm:$0xff] %vm232_vm0, %v3206_v56  ;;  %v301_v61 = vadd.f32 %v298_v45, %v293_v54  ;;  %v302_v18 = vadd.f32 %v299_v59, %v294_v60  ;;  %v922_v45 = vmul.f32 %v3539_v38, %v919_v20  ;;  %v958_v56 = vmul.f32 %v956_v51, %v3444_v4 }
  0xc7   :  { %v314_v2 = vpop.permute.xlu1 %313  ;;  %v312_v5 = vpop.permute.xlu0 %311  ;;  %v417_v59 = vstv %s2959_s23  ;;  %s3981_s23 = sld [smem:[#allocation2 + $0x4f]] }
  0xc8   :  { %v320_v6 = vadd.f32 %v312_v5, %v300_v62  ;;  %v321_v15 = vadd.f32 %v314_v2, %v301_v61 }
  0xc9   :  { %874 = vrot.lane.b32.xlu1 %v866_v55, %s3399_s4  ;;  %872 = vrot.lane.b32.xlu0 %v865_v57, %s3399_s4  ;;  %v382_v55 = vmul.f32 %v3544_v39, %v380_v40  ;;  %v957_v57 = vmul.f32 %v956_v51, %v3434_v1 }
  0xca   :  { %v328_v17 = vadd.f32 %v325_v58, %v320_v6  ;;  %v329_v37 = vadd.f32 %v326_v7, %v321_v15  ;;  %v383_v58 = vmul.f32 %v3539_v38, %v380_v40 }
  0xcb   :  { %v340_v22 = vpop.permute.xlu1 %339  ;;  %v316_v23 = vpop.permute.xlu0 %315 }
  0xcc   :  { %v322_v26 = vadd.f32 %v316_v23, %v302_v18  ;;  %v348_v34 = vadd.f32 %v340_v22, %v328_v17  ;;  %v419_v18 = vmul.f32 %v417_v59, %v3444_v4  ;;  %v445_v22 = vstv %s3767_s26  ;;  %s4311_s26 = sld [smem:[#allocation2 + $0x6]] }
  0xcd   :  { %900 = vrot.lane.b32.xlu1 %v893_v8, %s3399_s4  ;;  %898 = vrot.lane.b32.xlu0 %v892_v9, %s3399_s4  ;;  %v418_v8 = vmul.f32 %v417_v59, %v3434_v1  ;;  %v985_v9 = vmul.f32 %v984_v63, %v3439_v3 }
  0xce   :  { %v330_v36 = vadd.f32 %v327_v12, %v322_v26  ;;  %v356_v50 = vadd.f32 %v353_v27, %v348_v34  ;;  %v959_v12 = vmul.f32 %v956_v51, %v3429_v0  ;;  %v422_v4 = vadd.f32 %v419_v18, %v415_v13 }
  0xcf   :  { %v344_v41 = vpop.permute.xlu1 %343  ;;  %v342_v42 = vpop.permute.xlu0 %341  ;;  %v421_v27 = vadd.f32 %v418_v8, %v415_v13  ;;  %v446_v34 = vmul.f32 %v445_v22, %v3439_v3  ;;  %v473_v3 = vstv %s3782_s28  ;;  %v1068_v8 = vstv %s3805_s5  ;;  %s3898_s28 = sld [smem:[#allocation2 + $0x3a]] }
  0xd0   :  { %v349_v43 = vadd.f32 %v342_v42, %v329_v37  ;;  %v350_v48 = vadd.f32 %v344_v41, %v330_v36  ;;  %v1012_v36 = vstv %s3775_s27  ;;  %s4127_s5 = sld [smem:[#allocation2 + $0x2]]  ;;  %s4219_s27 = sld [smem:[#allocation2 + $0x35]] }
  0xd1   :  { %926 = vrot.lane.b32.xlu1 %v920_v29, %s3399_s4  ;;  %902 = vrot.lane.b32.xlu0 %v894_v31, %s3399_s4  ;;  %v420_v29 = vmul.f32 %v417_v59, %v3429_v0  ;;  %v987_v31 = vmul.f32 %v984_v63, %v3455_v10  ;;  %v1014_v42 = vmul.f32 %v3469_v14, %v1012_v36 }
  0xd2   :  { %v357_v49 = vadd.f32 %v354_v32, %v349_v43  ;;  %v358_v62 = vadd.f32 %v355_v44, %v350_v48  ;;  %v986_v32 = vmul.f32 %v984_v63, %v3460_v11  ;;  %v1013_v43 = vmul.f32 %v3474_v16, %v1012_v36 }
  0xd3   :  { %v370_v52 = vpop.permute.xlu1 %369  ;;  %v368_v53 = vpop.permute.xlu0 %367  ;;  %v423_v41 = vadd.f32 %v420_v29, %v415_v13  ;;  %v447_v44 = vmul.f32 %v445_v22, %v3460_v11  ;;  %v1040_v48 = vstv %s3785_s29  ;;  %v1015_v11 = vmul.f32 %v3488_v21, %v1012_v36  ;;  %s4621_s29 = sld [smem:[#allocation2 + $0x4e]] }
  0xd4   :  { %v376_v54 = vadd.f32 %v368_v53, %v356_v50  ;;  %v377_v60 = vadd.f32 %v370_v52, %v357_v49  ;;  %v474_v53 = vmul.f32 %v3474_v16, %v473_v3 }
  0xd5   :  { %930 = vrot.lane.b32.xlu1 %v922_v45, %s3399_s4  ;;  %928 = vrot.lane.b32.xlu0 %v921_v46, %s3399_s4 }
  0xd6   :  { %v384_v61 = vadd.f32 %v381_v47, %v376_v54  ;;  %v385_v17 = vadd.f32 %v382_v55, %v377_v60  ;;  %v448_v47 = vmul.f32 %v445_v22, %v3455_v10  ;;  %v1041_v10 = vmul.f32 %v3483_v19, %v1040_v48 }
  0xd7   :  { %v396_v2 = vpop.permute.xlu1 %395  ;;  %v372_v5 = vpop.permute.xlu0 %371  ;;  %v475_v54 = vmul.f32 %v3469_v14, %v473_v3  ;;  %v1043_v14 = vmul.f32 %v3497_v24, %v1040_v48 }
  0xd8   :  { %v404_v6 = vadd.f32 %v396_v2, %v384_v61  ;;  %v378_v7 = vadd.f32 %v372_v5, %v358_v62  ;;  %v476_v62 = vmul.f32 %v3488_v21, %v473_v3  ;;  %v1042_v2 = vmul.f32 %v3502_v25, %v1040_v48 }
  0xd9   :  { %965 = vrot.lane.b32.xlu1 %v958_v56, %s3399_s4  ;;  %963 = vrot.lane.b32.xlu0 %v957_v57, %s3399_s4  ;;  %v501_v57 = vstv %s3795_s30  ;;  %s3001_s30 = sld [smem:[#allocation2 + $0x51]] }
  0xda   :  { %3207 = vtanh.f32 %v404_v6  ;;  %v386_v15 = vadd.f32 %v383_v58, %v378_v7  ;;  %v502_v5 = vmul.f32 %v3483_v19, %v501_v57  ;;  %v1070_v19 = vmul.f32 %v3511_v28, %v1068_v8 }
  0xdb   :  { %v400_v1 = vpop.permute.xlu1 %399  ;;  %v398_v20 = vpop.permute.xlu0 %397  ;;  %v504_v18 = vmul.f32 %v3497_v24, %v501_v57 }
  0xdc   :  { %v406_v23 = vadd.f32 %v400_v1, %v386_v15  ;;  %v405_v26 = vadd.f32 %v398_v20, %v385_v17  ;;  %v503_v15 = vmul.f32 %v3502_v25, %v501_v57  ;;  %v1069_v17 = vmul.f32 %v3516_v30, %v1068_v8 }
  0xdd   :  { %991 = vrot.lane.b32.xlu1 %v985_v9, %s3399_s4  ;;  %967 = vrot.lane.b32.xlu0 %v959_v12, %s3399_s4  ;;  %v529_v1 = vstv %s3817_s8  ;;  %v1161_v57 = vstv %s3853_s17  ;;  %s3919_s8 = sld [smem:[#allocation2 + $0x38]]  ;;  %s2990_s17 = sld [smem:[#allocation4 + $0x4]] }
  0xde   :  { %3209 = vtanh.f32 %v406_v23  ;;  %v530_v25 = vmul.f32 %v3516_v30, %v529_v1  ;;  %v531_v24 = vmul.f32 %v3511_v28, %v529_v1 }
  0xdf   :  { %3211 = vtanh.f32 %v405_v26  ;;  %v435_v37 = vpop.permute.xlu1 %434  ;;  %v433_v0 = vpop.permute.xlu0 %432  ;;  %v1096_v26 = vstv %s3820_s9  ;;  %s4251_s9 = sld [smem:[#allocation2 + $0x57]] }
  0xe0   :  { %v441_v40 = vadd.f32 %v433_v0, %v421_v27  ;;  %v442_v45 = vadd.f32 %v435_v37, %v422_v4  ;;  %v1071_v4 = vmul.f32 %v3530_v35, %v1068_v8  ;;  %v557_v0 = vstv %s2969_s14  ;;  %s4264_s14 = sld [smem:[#allocation2 + $0x40]] }
  0xe1   :  { %995 = vrot.lane.b32.xlu1 %v987_v31, %s3399_s4  ;;  %993 = vrot.lane.b32.xlu0 %v986_v32, %s3399_s4  ;;  %v1097_v32 = vmul.f32 %v3525_v33, %v1096_v26  ;;  %v1099_v33 = vmul.f32 %v3539_v38, %v1096_v26  ;;  %v1098_v28 = vmul.f32 %v3544_v39, %v1096_v26  ;;  %v3873_v39 = vld [vmem:[%s5464_s0 + $0x3a] sm:$0xff] }
  0xe2   :  { %v449_v46 = vadd.f32 %v446_v34, %v441_v40  ;;  %v450_v16 = vadd.f32 %v447_v44, %v442_v45 }
  0xe3   :  { %v461_v49 = vpop.permute.xlu1 %460  ;;  %v437_v50 = vpop.permute.xlu0 %436 }
  0xe4   :  { %v3208_v51 = vpop.eup %3207  ;;  %v443_v52 = vadd.f32 %v437_v50, %v423_v41  ;;  %v469_v55 = vadd.f32 %v461_v49, %v449_v46  ;;  %v1133_v46 = vstv %s3024_s15  ;;  %v559_v49 = vmul.f32 %v3873_v39, %v557_v0  ;;  %v3881_v50 = vld [vmem:[%s5464_s0 + $0x8] sm:$0xff]  ;;  %s2991_s15 = sld [smem:[#allocation2 + $0x13]] }
  0xe5   :  { %2955 = vst.msk [vmem:[%s5467_s3 + $0x18] sm:$0xff] %vm232_vm0, %v3208_v51  ;;  %1021 = vrot.lane.b32.xlu1 %v1014_v42, %s3399_s4  ;;  %1019 = vrot.lane.b32.xlu0 %v1013_v43, %s3399_s4  ;;  %v532_v42 = vmul.f32 %v3530_v35, %v529_v1  ;;  %v3863_v43 = vld [vmem:[%s5464_s0 + $0x32] sm:$0xff]  ;;  %v1135_v51 = vmul.f32 %v3881_v50, %v1133_v46 }
  0xe6   :  { %v451_v56 = vadd.f32 %v448_v47, %v443_v52  ;;  %v477_v7 = vadd.f32 %v474_v53, %v469_v55  ;;  %v558_v44 = vmul.f32 %v3863_v43, %v557_v0  ;;  %v3887_v52 = vld [vmem:[%s5464_s0] sm:$0xff]  ;;  %v3928_v1 = vld [vmem:[%s5464_s0 + $0x12] sm:$0x7] }
  0xe7   :  { %v465_v58 = vpop.permute.xlu1 %464  ;;  %v463_v59 = vpop.permute.xlu0 %462  ;;  %v1134_v53 = vmul.f32 %v3887_v52, %v1133_v46 }
  0xe8   :  { %v3210_v60 = vpop.eup %3209  ;;  %v470_v61 = vadd.f32 %v463_v59, %v450_v16  ;;  %v471_v21 = vadd.f32 %v465_v58, %v451_v56 }
  0xe9   :  { %v3212_v63 = vpop.eup %3211  ;;  %2957 = vst.msk [vmem:[%s5467_s3 + $0x28] sm:$0x7] %vm235_vm1, %v3210_v60  ;;  %1047 = vrot.lane.b32.xlu1 %v1041_v10, %s3399_s4  ;;  %1023 = vrot.lane.b32.xlu0 %v1015_v11, %s3399_s4  ;;  %v3893_v10 = vld [vmem:[%s5464_s0 + $0x42] sm:$0x7] }
  0xea   :  { %2956 = vst.msk [vmem:[%s5467_s3 + $0x20] sm:$0xff] %vm232_vm0, %v3212_v63  ;;  %v478_v6 = vadd.f32 %v475_v54, %v470_v61  ;;  %v479_v23 = vadd.f32 %v476_v62, %v471_v21  ;;  %v560_v11 = vmul.f32 %v3893_v10, %v557_v0  ;;  %v594_v54 = vstv %s3851_s16  ;;  %v3906_v63 = vld [vmem:[%s5464_s0 + $0x2] sm:$0xff]  ;;  %s3042_s16 = sld [smem:[#allocation2 + $0x1c]] }
  0xeb   :  { %v491_v9 = vpop.permute.xlu1 %490  ;;  %v489_v12 = vpop.permute.xlu0 %488  ;;  %v595_v62 = vmul.f32 %v3887_v52, %v594_v54  ;;  %v592_v21 = vstv %s3866_s20  ;;  %v596_v8 = vmul.f32 %v3881_v50, %v594_v54  ;;  %s4064_s20 = sld [smem:[#allocation2 + $0x33]] }
  0xec   :  { %v497_v13 = vadd.f32 %v489_v12, %v477_v7  ;;  %v498_v20 = vadd.f32 %v491_v9, %v478_v6 }
  0xed   :  { %1051 = vrot.lane.b32.xlu1 %v1043_v14, %s3399_s4  ;;  %1049 = vrot.lane.b32.xlu0 %v1042_v2, %s3399_s4  ;;  %v1162_v14 = vmul.f32 %v3906_v63, %v1161_v57  ;;  %v3912_v2 = vld [vmem:[%s5464_s0 + $0x10] sm:$0x7]  ;;  %v599_v26 = vadd.f32 %v596_v8, %v592_v21  ;;  %v1245_v8 = vstv %s3959_s18  ;;  %s4049_s18 = sld [smem:[#allocation2 + $0x11]] }
  0xee   :  { %v505_v22 = vadd.f32 %v502_v5, %v497_v13  ;;  %v506_v37 = vadd.f32 %v503_v15, %v498_v20  ;;  %v1136_v5 = vmul.f32 %v3912_v2, %v1133_v46  ;;  %v622_v13 = vstv %s3868_s1  ;;  %v3971_v46 = vld [vmem:[%s5464_s0 + $0x1a] sm:$0xff]  ;;  %s4067_s1 = sld [smem:[#allocation2 + $0x3c]] }
  0xef   :  { %v517_v27 = vpop.permute.xlu1 %516  ;;  %v493_v29 = vpop.permute.xlu0 %492  ;;  %v1164_v20 = vmul.f32 %v3928_v1, %v1161_v57 }
  0xf0   :  { %v499_v31 = vadd.f32 %v493_v29, %v479_v23  ;;  %v525_v34 = vadd.f32 %v517_v27, %v505_v22  ;;  %v3934_v22 = vld [vmem:[%s5464_s0 + $0xa] sm:$0xff]  ;;  %v623_v27 = vmul.f32 %v3906_v63, %v622_v13  ;;  %v1189_v29 = vstv %s3898_s28  ;;  %s4523_s28 = sld [smem:[#allocation2 + $0x48]] }
  0xf1   :  { %1077 = vrot.lane.b32.xlu1 %v1070_v19, %s3399_s4  ;;  %1075 = vrot.lane.b32.xlu0 %v1069_v17, %s3399_s4  ;;  %v598_v17 = vadd.f32 %v595_v62, %v592_v21  ;;  %v1163_v23 = vmul.f32 %v3934_v22, %v1161_v57  ;;  %v624_v0 = vmul.f32 %v3934_v22, %v622_v13  ;;  %v4002_v62 = vld [vmem:[%s5464_s0 + $0x22] sm:$0xff] }
  0xf2   :  { %v507_v36 = vadd.f32 %v504_v18, %v499_v31  ;;  %v533_v35 = vadd.f32 %v530_v25, %v525_v34  ;;  %v597_v18 = vmul.f32 %v3912_v2, %v594_v54  ;;  %v678_v54 = vstv %s3939_s13  ;;  %s4158_s13 = sld [smem:[#allocation2 + $0x15]] }
  0xf3   :  { %v521_v40 = vpop.permute.xlu1 %520  ;;  %v519_v30 = vpop.permute.xlu0 %518 }
  0xf4   :  { %v526_v41 = vadd.f32 %v519_v30, %v506_v37  ;;  %v527_v3 = vadd.f32 %v521_v40, %v507_v36  ;;  %v3952_v36 = vld [vmem:[%s5464_s0 + $0x18] sm:$0xff]  ;;  %v650_v40 = vstv %s3916_s7  ;;  %s4011_s7 = sld [smem:[#allocation2 + $0x4d]] }
  0xf5   :  { %1103 = vrot.lane.b32.xlu1 %v1097_v32, %s3399_s4  ;;  %1079 = vrot.lane.b32.xlu0 %v1071_v4, %s3399_s4  ;;  %v600_v4 = vadd.f32 %v597_v18, %v592_v21  ;;  %v1190_v37 = vmul.f32 %v3952_v36, %v1189_v29  ;;  %v4025_v18 = vld [vmem:[%s5464_s0 + $0x30] sm:$0xff] }
  0xf6   :  { %v534_v45 = vadd.f32 %v531_v24, %v526_v41  ;;  %v535_v16 = vadd.f32 %v532_v42, %v527_v3  ;;  %v3946_v24 = vld [vmem:[%s5464_s0 + $0x20] sm:$0xff]  ;;  %v625_v42 = vmul.f32 %v3928_v1, %v622_v13 }
  0xf7   :  { %v547_v47 = vpop.permute.xlu1 %546  ;;  %v545_v48 = vpop.permute.xlu0 %544  ;;  %v1191_v34 = vmul.f32 %v3946_v24, %v1189_v29 }
  0xf8   :  { %v553_v38 = vadd.f32 %v545_v48, %v533_v35  ;;  %v554_v55 = vadd.f32 %v547_v47, %v534_v45  ;;  %v651_v35 = vmul.f32 %v3952_v36, %v650_v40  ;;  %v3977_v48 = vld [vmem:[%s5464_s0 + $0x28] sm:$0x7] }
  0xf9   :  { %1107 = vrot.lane.b32.xlu1 %v1099_v33, %s3399_s4  ;;  %1105 = vrot.lane.b32.xlu0 %v1098_v28, %s3399_s4  ;;  %v1217_v33 = vstv %s3919_s8  ;;  %s4145_s8 = sld [smem:[#allocation4 + $0x5]] }
  0xfa   :  { %v561_v56 = vadd.f32 %v558_v44, %v553_v38  ;;  %v562_v7 = vadd.f32 %v559_v49, %v554_v55  ;;  %v1218_v47 = vmul.f32 %v3971_v46, %v1217_v33  ;;  %v1192_v38 = vmul.f32 %v3977_v48, %v1189_v29 }
  0xfb   :  { %v573_v58 = vpop.permute.xlu1 %572  ;;  %v549_v59 = vpop.permute.xlu0 %548  ;;  %v652_v49 = vmul.f32 %v3946_v24, %v650_v40 }
  0xfc   :  { %v581_v60 = vadd.f32 %v573_v58, %v561_v56  ;;  %v555_v61 = vadd.f32 %v549_v59, %v535_v16  ;;  %v653_v58 = vmul.f32 %v3977_v48, %v650_v40  ;;  %v4038_v40 = vld [vmem:[%s5464_s0 + $0x40] sm:$0x7] }
  0xfd   :  { %1142 = vrot.lane.b32.xlu1 %v1135_v51, %s3399_s4  ;;  %1140 = vrot.lane.b32.xlu0 %v1134_v53, %s3399_s4 }
  0xfe   :  { %3213 = vtanh.f32 %v581_v60  ;;  %v563_v6 = vadd.f32 %v560_v11, %v555_v61  ;;  %v3996_v60 = vld [vmem:[%s5464_s0 + $0x2a] sm:$0x7] }
  0xff   :  { %v577_v9 = vpop.permute.xlu1 %576  ;;  %v575_v12 = vpop.permute.xlu0 %574  ;;  %v1220_v61 = vmul.f32 %v3996_v60, %v1217_v33 }
 0x100   :  { %v583_v15 = vadd.f32 %v577_v9, %v563_v6  ;;  %v582_v19 = vadd.f32 %v575_v12, %v562_v7 }
 0x101   :  { %1168 = vrot.lane.b32.xlu1 %v1162_v14, %s3399_s4  ;;  %1144 = vrot.lane.b32.xlu0 %v1136_v5, %s3399_s4  ;;  %v1219_v14 = vmul.f32 %v4002_v62, %v1217_v33  ;;  %v679_v5 = vmul.f32 %v3971_v46, %v678_v54 }
 0x102   :  { %3215 = vtanh.f32 %v583_v15  ;;  %v680_v15 = vmul.f32 %v4002_v62, %v678_v54 }
 0x103   :  { %3217 = vtanh.f32 %v582_v19  ;;  %v612_v31 = vpop.permute.xlu1 %611  ;;  %v610_v25 = vpop.permute.xlu0 %609  ;;  %v4019_v19 = vld [vmem:[%s5464_s0 + $0x38] sm:$0xff] }
 0x104   :  { %v618_v32 = vadd.f32 %v610_v25, %v598_v17  ;;  %v619_v30 = vadd.f32 %v612_v31, %v599_v26  ;;  %v1247_v17 = vmul.f32 %v4019_v19, %v1245_v8  ;;  %v706_v26 = vstv %s3981_s23  ;;  %s4426_s23 = sld [smem:[#allocation2 + $0x8]] }
 0x105   :  { %1172 = vrot.lane.b32.xlu1 %v1164_v20, %s3399_s4  ;;  %1170 = vrot.lane.b32.xlu0 %v1163_v23, %s3399_s4  ;;  %v1246_v20 = vmul.f32 %v4025_v18, %v1245_v8  ;;  %v681_v23 = vmul.f32 %v3996_v60, %v678_v54  ;;  %v1273_v25 = vstv %s3984_s24  ;;  %s4099_s24 = sld [smem:[#allocation2 + $0x53]] }
 0x106   :  { %v626_v41 = vadd.f32 %v623_v27, %v618_v32  ;;  %v627_v11 = vadd.f32 %v624_v0, %v619_v30  ;;  %v1274_v0 = vmul.f32 %v3863_v43, %v1273_v25  ;;  %v1248_v30 = vmul.f32 %v4038_v40, %v1245_v8 }
 0x107   :  { %v638_v28 = vpop.permute.xlu1 %637  ;;  %v614_v44 = vpop.permute.xlu0 %613  ;;  %v1338_v8 = vstv %s3042_s16  ;;  %s4390_s16 = sld [smem:[#allocation2 + $0x5b]] }
 0x108   :  { %v3214_v3 = vpop.eup %3213  ;;  %v620_v45 = vadd.f32 %v614_v44, %v600_v4  ;;  %v646_v51 = vadd.f32 %v638_v28, %v626_v41  ;;  %v708_v41 = vmul.f32 %v4019_v19, %v706_v26  ;;  %v734_v44 = vstv %s4011_s7  ;;  %s4137_s7 = sld [smem:[#allocation2]] }
 0x109   :  { %2971 = vst.msk [vmem:[%s5467_s3 + $0x30] sm:$0xff] %vm232_vm0, %v3214_v3  ;;  %1198 = vrot.lane.b32.xlu1 %v1191_v34, %s3399_s4  ;;  %1196 = vrot.lane.b32.xlu0 %v1190_v37, %s3399_s4  ;;  %v707_v37 = vmul.f32 %v4025_v18, %v706_v26 }
 0x10a   :  { %v628_v53 = vadd.f32 %v625_v42, %v620_v45  ;;  %v654_v7 = vadd.f32 %v651_v35, %v646_v51  ;;  %v735_v51 = vmul.f32 %v3863_v43, %v734_v44 }
 0x10b   :  { %v642_v55 = vpop.permute.xlu1 %641  ;;  %v640_v56 = vpop.permute.xlu0 %639 }
 0x10c   :  { %v3216_v16 = vpop.eup %3215  ;;  %v647_v57 = vadd.f32 %v640_v56, %v627_v11  ;;  %v648_v21 = vadd.f32 %v642_v55, %v628_v53  ;;  %v1310_v55 = vstv %s3040_s12  ;;  %s4368_s12 = sld [smem:[#allocation2 + $0x39]] }
 0x10d   :  { %v3218_v59 = vpop.eup %3217  ;;  %2973 = vst.msk [vmem:[%s5467_s3 + $0x40] sm:$0x7] %vm235_vm1, %v3216_v16  ;;  %1224 = vrot.lane.b32.xlu1 %v1218_v47, %s3399_s4  ;;  %1200 = vrot.lane.b32.xlu0 %v1192_v38, %s3399_s4  ;;  %v709_v47 = vmul.f32 %v4038_v40, %v706_v26  ;;  %v1276_v38 = vmul.f32 %v3893_v10, %v1273_v25  ;;  %v769_v26 = vstv %s2990_s17  ;;  %s4393_s17 = sld [smem:[#allocation2 + $0x44]] }
 0x10e   :  { %2972 = vst.msk [vmem:[%s5467_s3 + $0x38] sm:$0xff] %vm232_vm0, %v3218_v59  ;;  %v655_v6 = vadd.f32 %v652_v49, %v647_v57  ;;  %v656_v31 = vadd.f32 %v653_v58, %v648_v21  ;;  %v1275_v49 = vmul.f32 %v3873_v39, %v1273_v25  ;;  %v736_v58 = vmul.f32 %v3873_v39, %v734_v44 }
 0x10f   :  { %v668_v9 = vpop.permute.xlu1 %667  ;;  %v666_v12 = vpop.permute.xlu0 %665  ;;  %v1312_v59 = vmul.f32 %v3881_v50, %v1310_v55 }
 0x110   :  { %v674_v13 = vadd.f32 %v666_v12, %v654_v7  ;;  %v675_v27 = vadd.f32 %v668_v9, %v655_v6 }
 0x111   :  { %1228 = vrot.lane.b32.xlu1 %v1220_v61, %s3399_s4  ;;  %1226 = vrot.lane.b32.xlu0 %v1219_v14, %s3399_s4  ;;  %v1311_v61 = vmul.f32 %v3887_v52, %v1310_v55  ;;  %v737_v14 = vmul.f32 %v3893_v10, %v734_v44  ;;  %v1366_v44 = vstv %s4057_s19  ;;  %s4186_s19 = sld [smem:[#allocation2 + $0x37]] }
 0x112   :  { %v682_v29 = vadd.f32 %v679_v5, %v674_v13  ;;  %v683_v28 = vadd.f32 %v680_v15, %v675_v27  ;;  %v771_v5 = vstv %s2991_s15  ;;  %s4669_s15 = sld [smem:[#allocation2 + $0x10]] }
 0x113   :  { %v694_v32 = vpop.permute.xlu1 %693  ;;  %v670_v4 = vpop.permute.xlu0 %669 }
 0x114   :  { %v676_v34 = vadd.f32 %v670_v4, %v656_v31  ;;  %v702_v42 = vadd.f32 %v694_v32, %v682_v29  ;;  %v773_v31 = vmul.f32 %v3881_v50, %v771_v5  ;;  %v799_v4 = vstv %s4049_s18  ;;  %s4178_s18 = sld [smem:[#allocation2 + $0x22]] }
 0x115   :  { %1254 = vrot.lane.b32.xlu1 %v1247_v17, %s3399_s4  ;;  %1252 = vrot.lane.b32.xlu0 %v1246_v20, %s3399_s4  ;;  %v772_v17 = vmul.f32 %v3887_v52, %v771_v5  ;;  %v1339_v20 = vmul.f32 %v3906_v63, %v1338_v8 }
 0x116   :  { %v684_v33 = vadd.f32 %v681_v23, %v676_v34  ;;  %v710_v54 = vadd.f32 %v707_v37, %v702_v42  ;;  %v1313_v23 = vmul.f32 %v3912_v2, %v1310_v55  ;;  %v1340_v42 = vmul.f32 %v3934_v22, %v1338_v8 }
 0x117   :  { %v698_v3 = vpop.permute.xlu1 %697  ;;  %v696_v45 = vpop.permute.xlu0 %695  ;;  %v802_v55 = vmul.f32 %v3928_v1, %v799_v4 }
 0x118   :  { %v703_v35 = vadd.f32 %v696_v45, %v683_v28  ;;  %v704_v53 = vadd.f32 %v698_v3, %v684_v33  ;;  %v776_v33 = vadd.f32 %v773_v31, %v769_v26  ;;  %v800_v28 = vmul.f32 %v3906_v63, %v799_v4 }
 0x119   :  { %1280 = vrot.lane.b32.xlu1 %v1274_v0, %s3399_s4  ;;  %1256 = vrot.lane.b32.xlu0 %v1248_v30, %s3399_s4  ;;  %v775_v0 = vadd.f32 %v772_v17, %v769_v26  ;;  %v774_v30 = vmul.f32 %v3912_v2, %v771_v5  ;;  %v1369_v5 = vmul.f32 %v3977_v48, %v1366_v44 }
 0x11a   :  { %v711_v11 = vadd.f32 %v708_v41, %v703_v35  ;;  %v712_v7 = vadd.f32 %v709_v47, %v704_v53  ;;  %v1341_v41 = vmul.f32 %v3928_v1, %v1338_v8  ;;  %v827_v53 = vstv %s4064_s20  ;;  %s4902_s20 = sld [smem:[#allocation2 + $0x29]] }
 0x11b   :  { %v724_v56 = vpop.permute.xlu1 %723  ;;  %v722_v16 = vpop.permute.xlu0 %721  ;;  %v777_v47 = vadd.f32 %v774_v30, %v769_v26 }
 0x11c   :  { %v730_v57 = vadd.f32 %v722_v16, %v710_v54  ;;  %v731_v21 = vadd.f32 %v724_v56, %v711_v11  ;;  %v1394_v56 = vstv %s4067_s1  ;;  %s4570_s1 = sld [smem:[#allocation2 + $0x3]] }
 0x11d   :  { %1284 = vrot.lane.b32.xlu1 %v1276_v38, %s3399_s4  ;;  %1282 = vrot.lane.b32.xlu0 %v1275_v49, %s3399_s4  ;;  %v1368_v38 = vmul.f32 %v3946_v24, %v1366_v44  ;;  %v1367_v49 = vmul.f32 %v3952_v36, %v1366_v44  ;;  %v1397_v26 = vmul.f32 %v3996_v60, %v1394_v56 }
 0x11e   :  { %v738_v6 = vadd.f32 %v735_v51, %v730_v57  ;;  %v739_v29 = vadd.f32 %v736_v58, %v731_v21  ;;  %v801_v51 = vmul.f32 %v3934_v22, %v799_v4  ;;  %v829_v21 = vmul.f32 %v3946_v24, %v827_v53 }
 0x11f   :  { %v750_v9 = vpop.permute.xlu1 %749  ;;  %v726_v12 = vpop.permute.xlu0 %725  ;;  %v1422_v4 = vstv %s4087_s21  ;;  %s4291_s21 = sld [smem:[#allocation2 + $0x55]] }
 0x120   :  { %v758_v13 = vadd.f32 %v750_v9, %v738_v6  ;;  %v732_v15 = vadd.f32 %v726_v12, %v712_v7  ;;  %v855_v9 = vstv %s4077_s2  ;;  %s3033_s2 = sld [smem:[#allocation2 + $0x59]] }
 0x121   :  { %1319 = vrot.lane.b32.xlu1 %v1312_v59, %s3399_s4  ;;  %1317 = vrot.lane.b32.xlu0 %v1311_v61, %s3399_s4  ;;  %v828_v61 = vmul.f32 %v3952_v36, %v827_v53  ;;  %v857_v30 = vmul.f32 %v4002_v62, %v855_v9 }
 0x122   :  { %3219 = vtanh.f32 %v758_v13  ;;  %v740_v27 = vadd.f32 %v737_v14, %v732_v15  ;;  %v1395_v14 = vmul.f32 %v3971_v46, %v1394_v56 }
 0x123   :  { %v754_v25 = vpop.permute.xlu1 %753  ;;  %v752_v32 = vpop.permute.xlu0 %751 }
 0x124   :  { %v760_v34 = vadd.f32 %v754_v25, %v740_v27  ;;  %v759_v37 = vadd.f32 %v752_v32, %v739_v29  ;;  %v1396_v27 = vmul.f32 %v4002_v62, %v1394_v56  ;;  %v856_v29 = vmul.f32 %v3971_v46, %v855_v9 }
 0x125   :  { %1345 = vrot.lane.b32.xlu1 %v1339_v20, %s3399_s4  ;;  %1321 = vrot.lane.b32.xlu0 %v1313_v23, %s3399_s4  ;;  %v830_v20 = vmul.f32 %v3977_v48, %v827_v53 }
 0x126   :  { %3221 = vtanh.f32 %v760_v34 }
 0x127   :  { %3223 = vtanh.f32 %v759_v37  ;;  %v789_v3 = vpop.permute.xlu1 %788  ;;  %v787_v45 = vpop.permute.xlu0 %786 }
 0x128   :  { %v795_v35 = vadd.f32 %v787_v45, %v775_v0  ;;  %v796_v11 = vadd.f32 %v789_v3, %v776_v33  ;;  %v858_v33 = vmul.f32 %v3996_v60, %v855_v9 }
 0x129   :  { %1349 = vrot.lane.b32.xlu1 %v1341_v41, %s3399_s4  ;;  %1347 = vrot.lane.b32.xlu0 %v1340_v42, %s3399_s4  ;;  %v1424_v41 = vmul.f32 %v4019_v19, %v1422_v4  ;;  %v1423_v42 = vmul.f32 %v4025_v18, %v1422_v4 }
 0x12a   :  { %v803_v54 = vadd.f32 %v800_v28, %v795_v35  ;;  %v804_v8 = vadd.f32 %v801_v51, %v796_v11  ;;  %v883_v28 = vstv %s4099_s24  ;;  %v1450_v35 = vstv %s4102_s25  ;;  %s4582_s24 = sld [smem:[#allocation2 + $0x1]]  ;;  %s4591_s25 = sld [smem:[#allocation2 + $0x2e]] }
 0x12b   :  { %v815_v16 = vpop.permute.xlu1 %814  ;;  %v791_v57 = vpop.permute.xlu0 %790  ;;  %v884_v51 = vmul.f32 %v4025_v18, %v883_v28  ;;  %v1451_v53 = vmul.f32 %v3863_v43, %v1450_v35  ;;  %v1425_v11 = vmul.f32 %v4038_v40, %v1422_v4 }
 0x12c   :  { %v3220_v58 = vpop.eup %3219  ;;  %v797_v59 = vadd.f32 %v791_v57, %v777_v47  ;;  %v823_v6 = vadd.f32 %v815_v16, %v803_v54  ;;  %v885_v54 = vmul.f32 %v4019_v19, %v883_v28  ;;  %v911_v57 = vstv %s3001_s30  ;;  %s4832_s30 = sld [smem:[#allocation2 + $0x16]] }
 0x12d   :  { %2987 = vst.msk [vmem:[%s5467_s3 + $0x48] sm:$0xff] %vm232_vm0, %v3220_v58  ;;  %1375 = vrot.lane.b32.xlu1 %v1368_v38, %s3399_s4  ;;  %1373 = vrot.lane.b32.xlu0 %v1367_v49, %s3399_s4 }
 0x12e   :  { %v805_v7 = vadd.f32 %v802_v55, %v797_v59  ;;  %v831_v32 = vadd.f32 %v828_v61, %v823_v6  ;;  %v912_v6 = vmul.f32 %v3863_v43, %v911_v57 }
 0x12f   :  { %v819_v12 = vpop.permute.xlu1 %818  ;;  %v817_v13 = vpop.permute.xlu0 %816 }
 0x130   :  { %v3222_v15 = vpop.eup %3221  ;;  %v824_v17 = vadd.f32 %v817_v13, %v804_v8  ;;  %v825_v31 = vadd.f32 %v819_v12, %v805_v7  ;;  %v4150_v12 = vld [vmem:[%s5464_s0 + $0x50] sm:$0xff]  ;;  %v1508_v13 = vstv %s4127_s5  ;;  %s4740_s5 = sld [smem:[#allocation2 + $0x25]] }
 0x131   :  { %v3224_v23 = vpop.eup %3223  ;;  %2989 = vst.msk [vmem:[%s5467_s3 + $0x58] sm:$0x7] %vm235_vm1, %v3222_v15  ;;  %1401 = vrot.lane.b32.xlu1 %v1395_v14, %s3399_s4  ;;  %1377 = vrot.lane.b32.xlu0 %v1369_v5, %s3399_s4  ;;  %v886_v14 = vmul.f32 %v4038_v40, %v883_v28  ;;  %v1453_v5 = vmul.f32 %v3893_v10, %v1450_v35  ;;  %v4156_v15 = vld [vmem:[%s5464_s0 + $0x48] sm:$0xff] }
 0x132   :  { %2988 = vst.msk [vmem:[%s5467_s3 + $0x50] sm:$0xff] %vm232_vm0, %v3224_v23  ;;  %v832_v25 = vadd.f32 %v829_v21, %v824_v17  ;;  %v833_v45 = vadd.f32 %v830_v20, %v825_v31  ;;  %v1452_v21 = vmul.f32 %v3873_v39, %v1450_v35  ;;  %v914_v31 = vmul.f32 %v3893_v10, %v911_v57 }
 0x133   :  { %v845_v34 = vpop.permute.xlu1 %844  ;;  %v843_v37 = vpop.permute.xlu0 %842  ;;  %v946_v35 = vstv %s4145_s8  ;;  %s4339_s8 = sld [smem:[#allocation2 + $0x19]] }
 0x134   :  { %v851_v0 = vadd.f32 %v843_v37, %v831_v32  ;;  %v852_v44 = vadd.f32 %v845_v34, %v832_v25  ;;  %v948_v25 = vstv %s4135_s6  ;;  %v4170_v37 = vld [vmem:[%s5464_s0 + $0x4a] sm:$0xff]  ;;  %s4239_s6 = sld [smem:[#allocation2 + $0x42]] }
 0x135   :  { %1405 = vrot.lane.b32.xlu1 %v1397_v26, %s3399_s4  ;;  %1403 = vrot.lane.b32.xlu0 %v1396_v27, %s3399_s4  ;;  %v913_v26 = vmul.f32 %v3873_v39, %v911_v57  ;;  %v1510_v27 = vmul.f32 %v4150_v12, %v1508_v13 }
 0x136   :  { %v859_v3 = vadd.f32 %v856_v29, %v851_v0  ;;  %v860_v16 = vadd.f32 %v857_v30, %v852_v44  ;;  %v1509_v29 = vmul.f32 %v4156_v15, %v1508_v13  ;;  %v1536_v0 = vstv %s4137_s7  ;;  %v4176_v30 = vld [vmem:[%s5464_s0 + $0x58] sm:$0x7]  ;;  %s3022_s7 = sld [smem:[#allocation4 + $0x6]] }
 0x137   :  { %v871_v47 = vpop.permute.xlu1 %870  ;;  %v847_v38 = vpop.permute.xlu0 %846  ;;  %v949_v44 = vmul.f32 %v3887_v52, %v948_v25 }
 0x138   :  { %v853_v49 = vadd.f32 %v847_v38, %v833_v45  ;;  %v879_v55 = vadd.f32 %v871_v47, %v859_v3  ;;  %v1537_v3 = vmul.f32 %v4170_v37, %v1536_v0  ;;  %v1511_v45 = vmul.f32 %v4176_v30, %v1508_v13 }
 0x139   :  { %1431 = vrot.lane.b32.xlu1 %v1424_v41, %s3399_s4  ;;  %1429 = vrot.lane.b32.xlu0 %v1423_v42, %s3399_s4  ;;  %v952_v57 = vadd.f32 %v949_v44, %v946_v35 }
 0x13a   :  { %v861_v56 = vadd.f32 %v858_v33, %v853_v49  ;;  %v887_v9 = vadd.f32 %v884_v51, %v879_v55  ;;  %v950_v49 = vmul.f32 %v3881_v50, %v948_v25  ;;  %v4192_v51 = vld [vmem:[%s5464_s0 + $0x5a] sm:$0x7]  ;;  %v976_v55 = vstv %s4158_s13  ;;  %s4378_s13 = sld [smem:[#allocation2 + $0x46]] }
 0x13b   :  { %v875_v58 = vpop.permute.xlu1 %874  ;;  %v873_v59 = vpop.permute.xlu0 %872 }
 0x13c   :  { %v880_v61 = vadd.f32 %v873_v59, %v860_v16  ;;  %v881_v7 = vadd.f32 %v875_v58, %v861_v56  ;;  %v951_v58 = vmul.f32 %v3912_v2, %v948_v25  ;;  %v1539_v59 = vmul.f32 %v4192_v51, %v1536_v0 }
 0x13d   :  { %1457 = vrot.lane.b32.xlu1 %v1451_v53, %s3399_s4  ;;  %1433 = vrot.lane.b32.xlu0 %v1425_v11, %s3399_s4  ;;  %v4197_v53 = vld [vmem:[%s5464_s0 + $0x52] sm:$0xff]  ;;  %v979_v25 = vmul.f32 %v3928_v1, %v976_v55 }
 0x13e   :  { %v888_v8 = vadd.f32 %v885_v54, %v880_v61  ;;  %v889_v34 = vadd.f32 %v886_v14, %v881_v7  ;;  %v1538_v61 = vmul.f32 %v4197_v53, %v1536_v0  ;;  %v953_v14 = vadd.f32 %v950_v49, %v946_v35  ;;  %v4217_v7 = vld [vmem:[%s5464_s0 + $0x60] sm:$0xff]  ;;  %v4256_v49 = vld [vmem:[%s5464_s0 + $0x72] sm:$0x7] }
 0x13f   :  { %v901_v17 = vpop.permute.xlu1 %900  ;;  %v899_v20 = vpop.permute.xlu0 %898 }
 0x140   :  { %v907_v23 = vadd.f32 %v899_v20, %v887_v9  ;;  %v908_v32 = vadd.f32 %v901_v17, %v888_v8  ;;  %v954_v17 = vadd.f32 %v951_v58, %v946_v35 }
 0x141   :  { %1461 = vrot.lane.b32.xlu1 %v1453_v5, %s3399_s4  ;;  %1459 = vrot.lane.b32.xlu0 %v1452_v21, %s3399_s4  ;;  %v977_v5 = vmul.f32 %v3906_v63, %v976_v55  ;;  %v4211_v21 = vld [vmem:[%s5464_s0 + $0x68] sm:$0xff] }
 0x142   :  { %v915_v4 = vadd.f32 %v912_v6, %v907_v23  ;;  %v916_v38 = vadd.f32 %v913_v26, %v908_v32  ;;  %v1564_v6 = vstv %s4178_s18  ;;  %v978_v26 = vmul.f32 %v3934_v22, %v976_v55  ;;  %v4231_v32 = vld [vmem:[%s5464_s0 + $0x62] sm:$0xff]  ;;  %s4785_s18 = sld [smem:[#allocation2 + $0x50]] }
 0x143   :  { %v927_v41 = vpop.permute.xlu1 %926  ;;  %v903_v42 = vpop.permute.xlu0 %902  ;;  %v1566_v20 = vmul.f32 %v4211_v21, %v1564_v6  ;;  %v1565_v23 = vmul.f32 %v4217_v7, %v1564_v6 }
 0x144   :  { %v935_v33 = vadd.f32 %v927_v41, %v915_v4  ;;  %v909_v28 = vadd.f32 %v903_v42, %v889_v34  ;;  %v1592_v4 = vstv %s4199_s22  ;;  %v4237_v34 = vld [vmem:[%s5464_s0 + $0x70] sm:$0x7]  ;;  %s4424_s22 = sld [smem:[#allocation2 + $0x1f]] }
 0x145   :  { %1517 = vrot.lane.b32.xlu1 %v1510_v27, %s3399_s4  ;;  %1515 = vrot.lane.b32.xlu0 %v1509_v29, %s3399_s4  ;;  %v1004_v27 = vstv %s4186_s19  ;;  %v1593_v44 = vmul.f32 %v4231_v32, %v1592_v4  ;;  %s4892_s19 = sld [smem:[#allocation2 + $0x1a]] }
 0x146   :  { %3225 = vtanh.f32 %v935_v33  ;;  %v917_v47 = vadd.f32 %v914_v31, %v909_v28  ;;  %v1005_v28 = vmul.f32 %v3952_v36, %v1004_v27  ;;  %v1007_v58 = vmul.f32 %v3977_v48, %v1004_v27 }
 0x147   :  { %v931_v11 = vpop.permute.xlu1 %930  ;;  %v929_v54 = vpop.permute.xlu0 %928 }
 0x148   :  { %v937_v56 = vadd.f32 %v931_v11, %v917_v47  ;;  %v936_v16 = vadd.f32 %v929_v54, %v916_v38  ;;  %v4261_v11 = vld [vmem:[%s5464_s0 + $0x6a] sm:$0xff]  ;;  %v1032_v54 = vstv %s4219_s27  ;;  %s4319_s27 = sld [smem:[#allocation2 + $0x1b]] }
 0x149   :  { %1543 = vrot.lane.b32.xlu1 %v1537_v3, %s3399_s4  ;;  %1519 = vrot.lane.b32.xlu0 %v1511_v45, %s3399_s4  ;;  %v1567_v3 = vmul.f32 %v4237_v34, %v1564_v6  ;;  %v1006_v45 = vmul.f32 %v3946_v24, %v1004_v27 }
 0x14a   :  { %3227 = vtanh.f32 %v937_v56 }
 0x14b   :  { %3229 = vtanh.f32 %v936_v16  ;;  %v966_v8 = vpop.permute.xlu1 %965  ;;  %v964_v9 = vpop.permute.xlu0 %963 }
 0x14c   :  { %v972_v13 = vadd.f32 %v964_v9, %v952_v57  ;;  %v973_v29 = vadd.f32 %v966_v8, %v953_v14  ;;  %v1594_v14 = vmul.f32 %v4261_v11, %v1592_v4 }
 0x14d   :  { %1547 = vrot.lane.b32.xlu1 %v1539_v59, %s3399_s4  ;;  %1545 = vrot.lane.b32.xlu0 %v1538_v61, %s3399_s4  ;;  %v1595_v61 = vmul.f32 %v4256_v49, %v1592_v4  ;;  %v1035_v4 = vmul.f32 %v3996_v60, %v1032_v54 }
 0x14e   :  { %v980_v31 = vadd.f32 %v977_v5, %v972_v13  ;;  %v981_v38 = vadd.f32 %v978_v26, %v973_v29  ;;  %v1033_v5 = vmul.f32 %v3971_v46, %v1032_v54  ;;  %v4283_v13 = vld [vmem:[%s5464_s0 + $0x80] sm:$0xff]  ;;  %v1034_v29 = vmul.f32 %v4002_v62, %v1032_v54 }
 0x14f   :  { %v992_v0 = vpop.permute.xlu1 %991  ;;  %v968_v41 = vpop.permute.xlu0 %967 }
 0x150   :  { %v3226_v42 = vpop.eup %3225  ;;  %v974_v33 = vadd.f32 %v968_v41, %v954_v17  ;;  %v1000_v35 = vadd.f32 %v992_v0, %v980_v31  ;;  %v1620_v17 = vstv %s4239_s6  ;;  %v1060_v0 = vstv %s4251_s9  ;;  %s3090_s6 = sld [smem:[#allocation2 + $0x4]]  ;;  %s4348_s9 = sld [smem:[#allocation2 + $0x26]] }
 0x151   :  { %3003 = vst.msk [vmem:[%s5467_s3 + $0x60] sm:$0xff] %vm232_vm0, %v3226_v42  ;;  %1573 = vrot.lane.b32.xlu1 %v1566_v20, %s3399_s4  ;;  %1571 = vrot.lane.b32.xlu0 %v1565_v23, %s3399_s4  ;;  %v4289_v20 = vld [vmem:[%s5464_s0 + $0x78] sm:$0xff]  ;;  %v1622_v31 = vmul.f32 %v4283_v13, %v1620_v17 }
 0x152   :  { %v982_v47 = vadd.f32 %v979_v25, %v974_v33  ;;  %v1008_v9 = vadd.f32 %v1005_v28, %v1000_v35  ;;  %v1621_v25 = vmul.f32 %v4289_v20, %v1620_v17  ;;  %v4303_v28 = vld [vmem:[%s5464_s0 + $0x7a] sm:$0xff] }
 0x153   :  { %v996_v55 = vpop.permute.xlu1 %995  ;;  %v994_v56 = vpop.permute.xlu0 %993 }
 0x154   :  { %v3228_v16 = vpop.eup %3227  ;;  %v1001_v57 = vadd.f32 %v994_v56, %v981_v38  ;;  %v1002_v6 = vadd.f32 %v996_v55, %v982_v47  ;;  %v1061_v38 = vmul.f32 %v4025_v18, %v1060_v0  ;;  %v1062_v56 = vmul.f32 %v4019_v19, %v1060_v0 }
 0x155   :  { %v3230_v59 = vpop.eup %3229  ;;  %3005 = vst.msk [vmem:[%s5467_s3 + $0x70] sm:$0x7] %vm235_vm1, %v3228_v16  ;;  %1599 = vrot.lane.b32.xlu1 %v1593_v44, %s3399_s4  ;;  %1575 = vrot.lane.b32.xlu0 %v1567_v3, %s3399_s4  ;;  %v1648_v44 = vstv %s4264_s14  ;;  %s4667_s14 = sld [smem:[#allocation2 + $0x7]] }
 0x156   :  { %3004 = vst.msk [vmem:[%s5467_s3 + $0x68] sm:$0xff] %vm232_vm0, %v3230_v59  ;;  %v1009_v8 = vadd.f32 %v1006_v45, %v1001_v57  ;;  %v1010_v33 = vadd.f32 %v1007_v58, %v1002_v6  ;;  %v4309_v3 = vld [vmem:[%s5464_s0 + $0x88] sm:$0x7]  ;;  %v1649_v54 = vmul.f32 %v4303_v28, %v1648_v44 }
 0x157   :  { %v1022_v23 = vpop.permute.xlu1 %1021  ;;  %v1020_v26 = vpop.permute.xlu0 %1019  ;;  %v1623_v55 = vmul.f32 %v4309_v3, %v1620_v17  ;;  %v4324_v59 = vld [vmem:[%s5464_s0 + $0x8a] sm:$0x7] }
 0x158   :  { %v1028_v27 = vadd.f32 %v1020_v26, %v1008_v9  ;;  %v1029_v41 = vadd.f32 %v1022_v23, %v1009_v8  ;;  %v1063_v9 = vmul.f32 %v4038_v40, %v1060_v0  ;;  %v1651_v17 = vmul.f32 %v4324_v59, %v1648_v44 }
 0x159   :  { %1603 = vrot.lane.b32.xlu1 %v1595_v61, %s3399_s4  ;;  %1601 = vrot.lane.b32.xlu0 %v1594_v14, %s3399_s4  ;;  %v4329_v61 = vld [vmem:[%s5464_s0 + $0x82] sm:$0xff]  ;;  %v1088_v14 = vstv %s4291_s21  ;;  %s3104_s21 = sld [smem:[#allocation2 + $0xa]] }
 0x15a   :  { %v1036_v42 = vadd.f32 %v1033_v5, %v1028_v27  ;;  %v1037_v58 = vadd.f32 %v1034_v29, %v1029_v41  ;;  %v1650_v23 = vmul.f32 %v4329_v61, %v1648_v44  ;;  %v1089_v26 = vmul.f32 %v3863_v43, %v1088_v14 }
 0x15b   :  { %v1048_v45 = vpop.permute.xlu1 %1047  ;;  %v1024_v35 = vpop.permute.xlu0 %1023  ;;  %v1091_v44 = vmul.f32 %v3893_v10, %v1088_v14 }
 0x15c   :  { %v1030_v47 = vadd.f32 %v1024_v35, %v1010_v33  ;;  %v1056_v16 = vadd.f32 %v1048_v45, %v1036_v42  ;;  %v1090_v42 = vmul.f32 %v3873_v39, %v1088_v14  ;;  %v1125_v45 = vstv %s4319_s27  ;;  %s4441_s27 = sld [smem:[#allocation2 + $0x1d]] }
 0x15d   :  { %1629 = vrot.lane.b32.xlu1 %v1622_v31, %s3399_s4  ;;  %1627 = vrot.lane.b32.xlu0 %v1621_v25, %s3399_s4  ;;  %v1685_v25 = vstv %s4311_s26  ;;  %v1123_v14 = vstv %s3022_s7  ;;  %s4439_s26 = sld [smem:[#allocation4 + $0x7]]  ;;  %s4636_s7 = sld [smem:[#allocation2 + $0x4c]] }
 0x15e   :  { %v1038_v57 = vadd.f32 %v1035_v4, %v1030_v47  ;;  %v1064_v31 = vadd.f32 %v1061_v38, %v1056_v16  ;;  %v1687_v33 = vmul.f32 %v4150_v12, %v1685_v25  ;;  %v1686_v43 = vmul.f32 %v4156_v15, %v1685_v25 }
 0x15f   :  { %v1052_v5 = vpop.permute.xlu1 %1051  ;;  %v1050_v6 = vpop.permute.xlu0 %1049 }
 0x160   :  { %v1057_v8 = vadd.f32 %v1050_v6, %v1037_v58  ;;  %v1058_v27 = vadd.f32 %v1052_v5, %v1038_v57  ;;  %v1126_v57 = vmul.f32 %v3887_v52, %v1125_v45  ;;  %v1688_v58 = vmul.f32 %v4176_v30, %v1685_v25 }
 0x161   :  { %1655 = vrot.lane.b32.xlu1 %v1649_v54, %s3399_s4  ;;  %1631 = vrot.lane.b32.xlu0 %v1623_v55, %s3399_s4  ;;  %v1713_v54 = vstv %s3090_s6  ;;  %s4461_s6 = sld [smem:[#allocation2 + $0x2a]] }
 0x162   :  { %v1065_v29 = vadd.f32 %v1062_v56, %v1057_v8  ;;  %v1066_v38 = vadd.f32 %v1063_v9, %v1058_v27  ;;  %v1714_v10 = vmul.f32 %v4170_v37, %v1713_v54  ;;  %v1127_v8 = vmul.f32 %v3881_v50, %v1125_v45 }
 0x163   :  { %v1078_v4 = vpop.permute.xlu1 %1077  ;;  %v1076_v41 = vpop.permute.xlu0 %1075  ;;  %v1129_v27 = vadd.f32 %v1126_v57, %v1123_v14  ;;  %v1715_v25 = vmul.f32 %v4197_v53, %v1713_v54 }
 0x164   :  { %v1084_v0 = vadd.f32 %v1076_v41, %v1064_v31  ;;  %v1085_v35 = vadd.f32 %v1078_v4, %v1065_v29  ;;  %v1128_v29 = vmul.f32 %v3912_v2, %v1125_v45  ;;  %v1716_v31 = vmul.f32 %v4192_v51, %v1713_v54 }
 0x165   :  { %1659 = vrot.lane.b32.xlu1 %v1651_v17, %s3399_s4  ;;  %1657 = vrot.lane.b32.xlu0 %v1650_v23, %s3399_s4  ;;  %v1153_v17 = vstv %s4339_s8  ;;  %v1130_v50 = vadd.f32 %v1127_v8, %v1123_v14  ;;  %v1741_v41 = vstv %s4348_s9  ;;  %s4471_s9 = sld [smem:[#allocation2 + $0x3f]]  ;;  %s4972_s8 = sld [smem:[#allocation2 + $0x3e]] }
 0x166   :  { %v1092_v47 = vadd.f32 %v1089_v26, %v1084_v0  ;;  %v1093_v6 = vadd.f32 %v1090_v42, %v1085_v35  ;;  %v1154_v4 = vmul.f32 %v3906_v63, %v1153_v17  ;;  %v1155_v45 = vmul.f32 %v3934_v22, %v1153_v17 }
 0x167   :  { %v1104_v55 = vpop.permute.xlu1 %1103  ;;  %v1080_v56 = vpop.permute.xlu0 %1079  ;;  %v1181_v63 = vstv %s4355_s10  ;;  %v1769_v54 = vstv %s4358_s11  ;;  %v1744_v22 = vmul.f32 %v4237_v34, %v1741_v41  ;;  %s4544_s11 = sld [smem:[#allocation2 + $0x5d]]  ;;  %s4760_s10 = sld [smem:[#allocation2 + $0x52]] }
 0x168   :  { %v1112_v39 = vadd.f32 %v1104_v55, %v1092_v47  ;;  %v1086_v16 = vadd.f32 %v1080_v56, %v1066_v38  ;;  %v1156_v38 = vmul.f32 %v3928_v1, %v1153_v17  ;;  %v1182_v57 = vmul.f32 %v3952_v36, %v1181_v63 }
 0x169   :  { %1694 = vrot.lane.b32.xlu1 %v1687_v33, %s3399_s4  ;;  %1692 = vrot.lane.b32.xlu0 %v1686_v43, %s3399_s4  ;;  %v1131_v33 = vadd.f32 %v1128_v29, %v1123_v14  ;;  %v1743_v43 = vmul.f32 %v4211_v21, %v1741_v41  ;;  %v1770_v1 = vmul.f32 %v4231_v32, %v1769_v54 }
 0x16a   :  { %3231 = vtanh.f32 %v1112_v39  ;;  %v1094_v5 = vadd.f32 %v1091_v44, %v1086_v16  ;;  %v1742_v44 = vmul.f32 %v4217_v7, %v1741_v41  ;;  %v1184_v17 = vmul.f32 %v3977_v48, %v1181_v63 }
 0x16b   :  { %v1108_v52 = vpop.permute.xlu1 %1107  ;;  %v1106_v9 = vpop.permute.xlu0 %1105 }
 0x16c   :  { %v1114_v23 = vadd.f32 %v1108_v52, %v1094_v5  ;;  %v1113_v26 = vadd.f32 %v1106_v9, %v1093_v6  ;;  %v1209_v5 = vstv %s4368_s12  ;;  %s4476_s12 = sld [smem:[#allocation2 + $0x28]] }
 0x16d   :  { %1720 = vrot.lane.b32.xlu1 %v1714_v10, %s3399_s4  ;;  %1696 = vrot.lane.b32.xlu0 %v1688_v58, %s3399_s4  ;;  %v1183_v10 = vmul.f32 %v3946_v24, %v1181_v63  ;;  %v1772_v24 = vmul.f32 %v4256_v49, %v1769_v54  ;;  %v1825_v63 = vstv %s4393_s17  ;;  %s4490_s17 = sld [smem:[#allocation2 + $0x3d]] }
 0x16e   :  { %3233 = vtanh.f32 %v1114_v23 }
 0x16f   :  { %3235 = vtanh.f32 %v1113_v26  ;;  %v1143_v0 = vpop.permute.xlu1 %1142  ;;  %v1141_v2 = vpop.permute.xlu0 %1140  ;;  %v1771_v26 = vmul.f32 %v4261_v11, %v1769_v54  ;;  %v1826_v54 = vmul.f32 %v4303_v28, %v1825_v63 }
 0x170   :  { %v1149_v42 = vadd.f32 %v1141_v2, %v1129_v27  ;;  %v1150_v35 = vadd.f32 %v1143_v0, %v1130_v50  ;;  %v1210_v27 = vmul.f32 %v3971_v46, %v1209_v5  ;;  %v1211_v0 = vmul.f32 %v4002_v62, %v1209_v5 }
 0x171   :  { %1724 = vrot.lane.b32.xlu1 %v1716_v31, %s3399_s4  ;;  %1722 = vrot.lane.b32.xlu0 %v1715_v25, %s3399_s4  ;;  %v1797_v25 = vstv %s4378_s13  ;;  %s3136_s13 = sld [smem:[#allocation2 + $0x12]] }
 0x172   :  { %v1157_v47 = vadd.f32 %v1154_v4, %v1149_v42  ;;  %v1158_v36 = vadd.f32 %v1155_v45, %v1150_v35  ;;  %v1799_v46 = vmul.f32 %v4283_v13, %v1797_v25  ;;  %v1798_v2 = vmul.f32 %v4289_v20, %v1797_v25 }
 0x173   :  { %v1169_v55 = vpop.permute.xlu1 %1168  ;;  %v1145_v56 = vpop.permute.xlu0 %1144  ;;  %v1212_v42 = vmul.f32 %v3996_v60, %v1209_v5 }
 0x174   :  { %v3232_v39 = vpop.eup %3231  ;;  %v1151_v16 = vadd.f32 %v1145_v56, %v1131_v33  ;;  %v1177_v58 = vadd.f32 %v1169_v55, %v1157_v47  ;;  %v1237_v33 = vstv %s4390_s16  ;;  %v1800_v55 = vmul.f32 %v4309_v3, %v1797_v25  ;;  %s4558_s16 = sld [smem:[#allocation2 + $0xe]] }
 0x175   :  { %3019 = vst.msk [vmem:[%s5467_s3 + $0x78] sm:$0xff] %vm232_vm0, %v3232_v39  ;;  %1750 = vrot.lane.b32.xlu1 %v1743_v43, %s3399_s4  ;;  %1748 = vrot.lane.b32.xlu0 %v1742_v44, %s3399_s4  ;;  %v1238_v62 = vmul.f32 %v4025_v18, %v1237_v33  ;;  %v1239_v60 = vmul.f32 %v4019_v19, %v1237_v33 }
 0x176   :  { %v1159_v14 = vadd.f32 %v1156_v38, %v1151_v16  ;;  %v1185_v31 = vadd.f32 %v1182_v57, %v1177_v58  ;;  %v1265_v57 = vstv %s3033_s2  ;;  %v1828_v58 = vmul.f32 %v4324_v59, %v1825_v63  ;;  %s4504_s2 = sld [smem:[#allocation2 + $0x4a]] }
 0x177   :  { %v1173_v6 = vpop.permute.xlu1 %1172  ;;  %v1171_v8 = vpop.permute.xlu0 %1170  ;;  %v1827_v19 = vmul.f32 %v4329_v61, %v1825_v63  ;;  %v1300_v63 = vstv %s4439_s26  ;;  %s4598_s26 = sld [smem:[#allocation2 + $0x23]] }
 0x178   :  { %v3234_v52 = vpop.eup %3233  ;;  %v1178_v9 = vadd.f32 %v1171_v8, %v1158_v36  ;;  %v1179_v48 = vadd.f32 %v1173_v6, %v1159_v14  ;;  %v4436_v14 = vld [vmem:[%s5464_s0 + $0x32] sm:$0xff]  ;;  %v1862_v8 = vstv %s3104_s21  ;;  %s3135_s21 = sld [smem:[#allocation2 + $0x13]] }
 0x179   :  { %v3236_v23 = vpop.eup %3235  ;;  %3021 = vst.msk [vmem:[%s5467_s3 + $0x88] sm:$0x7] %vm235_vm1, %v3234_v52  ;;  %1776 = vrot.lane.b32.xlu1 %v1770_v1, %s3399_s4  ;;  %1752 = vrot.lane.b32.xlu0 %v1744_v22, %s3399_s4  ;;  %v1266_v36 = vmul.f32 %v4436_v14, %v1265_v57 }
 0x17a   :  { %3020 = vst.msk [vmem:[%s5467_s3 + $0x80] sm:$0xff] %vm232_vm0, %v3236_v23  ;;  %v1186_v29 = vadd.f32 %v1183_v10, %v1178_v9  ;;  %v1187_v45 = vadd.f32 %v1184_v17, %v1179_v48  ;;  %v1240_v10 = vmul.f32 %v4038_v40, %v1237_v33  ;;  %v4446_v23 = vld [vmem:[%s5464_s0 + $0x3a] sm:$0xff]  ;;  %v4456_v48 = vld [vmem:[%s5464_s0 + $0x42] sm:$0x7] }
 0x17b   :  { %v1199_v50 = vpop.permute.xlu1 %1198  ;;  %v1197_v4 = vpop.permute.xlu0 %1196  ;;  %v3318_v33 = vld [vmem:[%s5464_s0] sm:$0xff] }
 0x17c   :  { %v1205_v41 = vadd.f32 %v1197_v4, %v1185_v31  ;;  %v1206_v43 = vadd.f32 %v1199_v50, %v1186_v29  ;;  %v1268_v29 = vmul.f32 %v4456_v48, %v1265_v57  ;;  %v1302_v31 = vstv %s4424_s22  ;;  %s4924_s22 = sld [smem:[#allocation2 + $0x4b]] }
 0x17d   :  { %1780 = vrot.lane.b32.xlu1 %v1772_v24, %s3399_s4  ;;  %1778 = vrot.lane.b32.xlu0 %v1771_v26, %s3399_s4  ;;  %v1267_v24 = vmul.f32 %v4446_v23, %v1265_v57  ;;  %v1864_v26 = vmul.f32 %v4150_v12, %v1862_v8  ;;  %v3320_v57 = vld [vmem:[%s5464_s0 + $0x10] sm:$0x7] }
 0x17e   :  { %v1213_v44 = vadd.f32 %v1210_v27, %v1205_v41  ;;  %v1214_v16 = vadd.f32 %v1211_v0, %v1206_v43  ;;  %v1863_v27 = vmul.f32 %v4156_v15, %v1862_v8  ;;  %v1890_v41 = vstv %s4426_s23  ;;  %s1497_s23 = sld [smem:[#allocation4]] }
 0x17f   :  { %v1225_v35 = vpop.permute.xlu1 %1224  ;;  %v1201_v47 = vpop.permute.xlu0 %1200  ;;  %v1303_v43 = vmul.f32 %v3318_v33, %v1302_v31 }
 0x180   :  { %v1207_v38 = vadd.f32 %v1201_v47, %v1187_v45  ;;  %v1233_v56 = vadd.f32 %v1225_v35, %v1213_v44  ;;  %v1891_v44 = vmul.f32 %v4170_v37, %v1890_v41  ;;  %v1865_v45 = vmul.f32 %v4176_v30, %v1862_v8 }
 0x181   :  { %1806 = vrot.lane.b32.xlu1 %v1799_v46, %s3399_s4  ;;  %1804 = vrot.lane.b32.xlu0 %v1798_v2, %s3399_s4 }
 0x182   :  { %v1215_v39 = vadd.f32 %v1212_v42, %v1207_v38  ;;  %v1241_v6 = vadd.f32 %v1238_v62, %v1233_v56  ;;  %v3319_v38 = vld [vmem:[%s5464_s0 + $0x8] sm:$0xff] }
 0x183   :  { %v1229_v1 = vpop.permute.xlu1 %1228  ;;  %v1227_v18 = vpop.permute.xlu0 %1226  ;;  %v1304_v62 = vmul.f32 %v3319_v38, %v1302_v31  ;;  %v1386_v38 = vstv %s4490_s17  ;;  %s4679_s17 = sld [smem:[#allocation2 + $0x5]] }
 0x184   :  { %v1234_v22 = vadd.f32 %v1227_v18, %v1214_v16  ;;  %v1235_v5 = vadd.f32 %v1229_v1, %v1215_v39  ;;  %v1306_v16 = vadd.f32 %v1303_v43, %v1300_v63  ;;  %v1305_v1 = vmul.f32 %v3320_v57, %v1302_v31  ;;  %v3323_v31 = vld [vmem:[%s5464_s0 + $0x12] sm:$0x7] }
 0x185   :  { %1832 = vrot.lane.b32.xlu1 %v1826_v54, %s3399_s4  ;;  %1808 = vrot.lane.b32.xlu0 %v1800_v55, %s3399_s4  ;;  %v1893_v18 = vmul.f32 %v4192_v51, %v1890_v41 }
 0x186   :  { %v1242_v40 = vadd.f32 %v1239_v60, %v1234_v22  ;;  %v1243_v4 = vadd.f32 %v1240_v10, %v1235_v5  ;;  %v1330_v60 = vstv %s4441_s27  ;;  %v1892_v22 = vmul.f32 %v4197_v53, %v1890_v41  ;;  %s4520_s27 = sld [smem:[#allocation2 + $0x5f]] }
 0x187   :  { %v1255_v52 = vpop.permute.xlu1 %1254  ;;  %v1253_v9 = vpop.permute.xlu0 %1252  ;;  %v1307_v10 = vadd.f32 %v1304_v62, %v1300_v63  ;;  %v1308_v8 = vadd.f32 %v1305_v1, %v1300_v63 }
 0x188   :  { %v1261_v17 = vadd.f32 %v1253_v9, %v1241_v6  ;;  %v1262_v25 = vadd.f32 %v1255_v52, %v1242_v40 }
 0x189   :  { %1836 = vrot.lane.b32.xlu1 %v1828_v58, %s3399_s4  ;;  %1834 = vrot.lane.b32.xlu0 %v1827_v19, %s3399_s4  ;;  %v3321_v58 = vld [vmem:[%s5464_s0 + $0x2] sm:$0xff] }
 0x18a   :  { %v1269_v50 = vadd.f32 %v1266_v36, %v1261_v17  ;;  %v1270_v47 = vadd.f32 %v1267_v24, %v1262_v25  ;;  %v1331_v19 = vmul.f32 %v3321_v58, %v1330_v60  ;;  %v1918_v36 = vstv %s4461_s6  ;;  %v3322_v17 = vld [vmem:[%s5464_s0 + $0xa] sm:$0xff]  ;;  %s4633_s6 = sld [smem:[#allocation2 + $0x43]] }
 0x18b   :  { %v1281_v0 = vpop.permute.xlu1 %1280  ;;  %v1257_v46 = vpop.permute.xlu0 %1256  ;;  %v1920_v52 = vmul.f32 %v4211_v21, %v1918_v36  ;;  %v1919_v9 = vmul.f32 %v4217_v7, %v1918_v36  ;;  %v1332_v24 = vmul.f32 %v3322_v17, %v1330_v60  ;;  %v1333_v25 = vmul.f32 %v3323_v31, %v1330_v60 }
 0x18c   :  { %v1289_v2 = vadd.f32 %v1281_v0, %v1269_v50  ;;  %v1263_v42 = vadd.f32 %v1257_v46, %v1243_v4  ;;  %v1946_v50 = vstv %s4476_s12  ;;  %v1921_v43 = vmul.f32 %v4237_v34, %v1918_v36  ;;  %s3081_s12 = sld [smem:[#allocation2 + $0x41]] }
 0x18d   :  { %1871 = vrot.lane.b32.xlu1 %v1864_v26, %s3399_s4  ;;  %1869 = vrot.lane.b32.xlu0 %v1863_v27, %s3399_s4  ;;  %v1358_v26 = vstv %s4471_s9  ;;  %v1947_v33 = vmul.f32 %v4231_v32, %v1946_v50  ;;  %v1949_v57 = vmul.f32 %v4256_v49, %v1946_v50  ;;  %v1948_v1 = vmul.f32 %v4261_v11, %v1946_v50  ;;  %s4850_s9 = sld [smem:[#allocation2 + $0xb]] }
 0x18e   :  { %3237 = vtanh.f32 %v1289_v2  ;;  %v1271_v35 = vadd.f32 %v1268_v29, %v1263_v42  ;;  %v3324_v2 = vld [vmem:[%s5464_s0 + $0x18] sm:$0xff]  ;;  %v1974_v36 = vstv %s4504_s2  ;;  %v2002_v50 = vstv %s4523_s28  ;;  %s3122_s2 = sld [smem:[#allocation2 + $0xc]]  ;;  %s4611_s28 = sld [smem:[#allocation2 + $0x21]] }
 0x18f   :  { %v1285_v54 = vpop.permute.xlu1 %1284  ;;  %v1283_v55 = vpop.permute.xlu0 %1282  ;;  %v1359_v42 = vmul.f32 %v3324_v2, %v1358_v26  ;;  %v1975_v17 = vmul.f32 %v4289_v20, %v1974_v36 }
 0x190   :  { %v1291_v56 = vadd.f32 %v1285_v54, %v1271_v35  ;;  %v1290_v39 = vadd.f32 %v1283_v55, %v1270_v47 }
 0x191   :  { %1897 = vrot.lane.b32.xlu1 %v1891_v44, %s3399_s4  ;;  %1873 = vrot.lane.b32.xlu0 %v1865_v45, %s3399_s4  ;;  %v3325_v44 = vld [vmem:[%s5464_s0 + $0x20] sm:$0xff] }
 0x192   :  { %3239 = vtanh.f32 %v1291_v56  ;;  %v1360_v45 = vmul.f32 %v3325_v44, %v1358_v26  ;;  %v3326_v56 = vld [vmem:[%s5464_s0 + $0x28] sm:$0x7] }
 0x193   :  { %3241 = vtanh.f32 %v1290_v39  ;;  %v1320_v5 = vpop.permute.xlu1 %1319  ;;  %v1318_v40 = vpop.permute.xlu0 %1317  ;;  %v1361_v39 = vmul.f32 %v3326_v56, %v1358_v26  ;;  %v2005_v56 = vmul.f32 %v4324_v59, %v2002_v50 }
 0x194   :  { %v1326_v6 = vadd.f32 %v1318_v40, %v1306_v16  ;;  %v1327_v27 = vadd.f32 %v1320_v5, %v1307_v10 }
 0x195   :  { %1901 = vrot.lane.b32.xlu1 %v1893_v18, %s3399_s4  ;;  %1899 = vrot.lane.b32.xlu0 %v1892_v22, %s3399_s4  ;;  %v3327_v18 = vld [vmem:[%s5464_s0 + $0x1a] sm:$0xff] }
 0x196   :  { %v1334_v29 = vadd.f32 %v1331_v19, %v1326_v6  ;;  %v1335_v47 = vadd.f32 %v1332_v24, %v1327_v27  ;;  %v1387_v22 = vmul.f32 %v3327_v18, %v1386_v38  ;;  %v3329_v24 = vld [vmem:[%s5464_s0 + $0x2a] sm:$0x7]  ;;  %v1414_v27 = vstv %s4520_s27  ;;  %s4601_s27 = sld [smem:[#allocation2 + $0x2c]] }
 0x197   :  { %v1346_v4 = vpop.permute.xlu1 %1345  ;;  %v1322_v41 = vpop.permute.xlu0 %1321  ;;  %v1389_v26 = vmul.f32 %v3329_v24, %v1386_v38 }
 0x198   :  { %v3238_v0 = vpop.eup %3237  ;;  %v1328_v46 = vadd.f32 %v1322_v41, %v1308_v8  ;;  %v1354_v63 = vadd.f32 %v1346_v4, %v1334_v29  ;;  %v3328_v8 = vld [vmem:[%s5464_s0 + $0x22] sm:$0xff] }
 0x199   :  { %3035 = vst.msk [vmem:[%s5467_s3 + $0x90] sm:$0xff] %vm232_vm0, %v3238_v0  ;;  %1927 = vrot.lane.b32.xlu1 %v1920_v52, %s3399_s4  ;;  %1925 = vrot.lane.b32.xlu0 %v1919_v9, %s3399_s4  ;;  %v1388_v52 = vmul.f32 %v3328_v8, %v1386_v38  ;;  %v1976_v9 = vmul.f32 %v4283_v13, %v1974_v36 }
 0x19a   :  { %v1336_v35 = vadd.f32 %v1333_v25, %v1328_v46  ;;  %v1362_v19 = vadd.f32 %v1359_v42, %v1354_v63  ;;  %v3330_v46 = vld [vmem:[%s5464_s0 + $0x30] sm:$0xff]  ;;  %v2003_v42 = vmul.f32 %v4303_v28, %v2002_v50 }
 0x19b   :  { %v1350_v62 = vpop.permute.xlu1 %1349  ;;  %v1348_v54 = vpop.permute.xlu0 %1347  ;;  %v1415_v2 = vmul.f32 %v3330_v46, %v1414_v27  ;;  %v1528_v46 = vstv %s4582_s24  ;;  %s5054_s24 = sld [smem:[#allocation2 + $0x11]] }
 0x19c   :  { %v3240_v55 = vpop.eup %3239  ;;  %v1355_v60 = vadd.f32 %v1348_v54, %v1335_v47  ;;  %v1356_v10 = vadd.f32 %v1350_v62, %v1336_v35  ;;  %v1442_v47 = vstv %s4544_s11  ;;  %s4992_s11 = sld [smem:[#allocation2 + $0x2d]] }
 0x19d   :  { %v3242_v16 = vpop.eup %3241  ;;  %3037 = vst.msk [vmem:[%s5467_s3 + $0xa0] sm:$0x7] %vm235_vm1, %v3240_v55  ;;  %1953 = vrot.lane.b32.xlu1 %v1947_v33, %s3399_s4  ;;  %1929 = vrot.lane.b32.xlu0 %v1921_v43, %s3399_s4  ;;  %v1977_v33 = vmul.f32 %v4309_v3, %v1974_v36  ;;  %v3331_v43 = vld [vmem:[%s5464_s0 + $0x38] sm:$0xff]  ;;  %v1444_v36 = vmul.f32 %v4446_v23, %v1442_v47 }
 0x19e   :  { %3036 = vst.msk [vmem:[%s5467_s3 + $0x98] sm:$0xff] %vm232_vm0, %v3242_v16  ;;  %v1363_v58 = vadd.f32 %v1360_v45, %v1355_v60  ;;  %v1364_v25 = vadd.f32 %v1361_v39, %v1356_v10  ;;  %v1416_v44 = vmul.f32 %v3331_v43, %v1414_v27  ;;  %v3332_v55 = vld [vmem:[%s5464_s0 + $0x40] sm:$0x7]  ;;  %v2004_v39 = vmul.f32 %v4329_v61, %v2002_v50 }
 0x19f   :  { %v1376_v5 = vpop.permute.xlu1 %1375  ;;  %v1374_v40 = vpop.permute.xlu0 %1373  ;;  %v1417_v60 = vmul.f32 %v3332_v55, %v1414_v27  ;;  %v1443_v16 = vmul.f32 %v4436_v14, %v1442_v47 }
 0x1a0   :  { %v1382_v6 = vadd.f32 %v1374_v40, %v1362_v19  ;;  %v1383_v29 = vadd.f32 %v1376_v5, %v1363_v58  ;;  %v1445_v40 = vmul.f32 %v4456_v48, %v1442_v47 }
 0x1a1   :  { %1957 = vrot.lane.b32.xlu1 %v1949_v57, %s3399_s4  ;;  %1955 = vrot.lane.b32.xlu0 %v1948_v1, %s3399_s4 }
 0x1a2   :  { %v1390_v31 = vadd.f32 %v1387_v22, %v1382_v6  ;;  %v1391_v35 = vadd.f32 %v1388_v52, %v1383_v29  ;;  %v2039_v22 = vstv %s4558_s16  ;;  %v1500_v6 = vstv %s4570_s1  ;;  %s4677_s16 = sld [smem:[#allocation4 + $0x1]]  ;;  %s4912_s1 = sld [smem:[#allocation2 + $0x1e]] }
 0x1a3   :  { %v1402_v4 = vpop.permute.xlu1 %1401  ;;  %v1378_v41 = vpop.permute.xlu0 %1377  ;;  %v2041_v5 = vmul.f32 %v4150_v12, %v2039_v22  ;;  %v2040_v14 = vmul.f32 %v4156_v15, %v2039_v22  ;;  %v1501_v29 = vmul.f32 %v4156_v15, %v1500_v6  ;;  %v1503_v43 = vmul.f32 %v4176_v30, %v1500_v6 }
 0x1a4   :  { %v1384_v0 = vadd.f32 %v1378_v41, %v1364_v25  ;;  %v1410_v45 = vadd.f32 %v1402_v4, %v1390_v31  ;;  %v2042_v31 = vmul.f32 %v4176_v30, %v2039_v22  ;;  %v1498_v25 = vstv %s1497_s23  ;;  %s4927_s23 = sld [smem:[#allocation2 + $0x18]] }
 0x1a5   :  { %1983 = vrot.lane.b32.xlu1 %v1976_v9, %s3399_s4  ;;  %1981 = vrot.lane.b32.xlu0 %v1975_v17, %s3399_s4  ;;  %v2067_v17 = vstv %s3122_s2  ;;  %v1502_v41 = vmul.f32 %v4150_v12, %v1500_v6  ;;  %s4699_s2 = sld [smem:[#allocation2 + $0x32]] }
 0x1a6   :  { %v1392_v63 = vadd.f32 %v1389_v26, %v1384_v0  ;;  %v1418_v18 = vadd.f32 %v1415_v2, %v1410_v45  ;;  %v2068_v48 = vmul.f32 %v4170_v37, %v2067_v17  ;;  %v2069_v45 = vmul.f32 %v4197_v53, %v2067_v17 }
 0x1a7   :  { %v1406_v38 = vpop.permute.xlu1 %1405  ;;  %v1404_v62 = vpop.permute.xlu0 %1403  ;;  %v1505_v12 = vadd.f32 %v1502_v41, %v1498_v25 }
 0x1a8   :  { %v1411_v54 = vadd.f32 %v1404_v62, %v1391_v35  ;;  %v1412_v57 = vadd.f32 %v1406_v38, %v1392_v63  ;;  %v1529_v63 = vmul.f32 %v4170_v37, %v1528_v46  ;;  %v2095_v35 = vstv %s4591_s25  ;;  %s4717_s25 = sld [smem:[#allocation2 + $0x27]] }
 0x1a9   :  { %2009 = vrot.lane.b32.xlu1 %v2003_v42, %s3399_s4  ;;  %1985 = vrot.lane.b32.xlu0 %v1977_v33, %s3399_s4  ;;  %v1504_v33 = vadd.f32 %v1501_v29, %v1498_v25  ;;  %v1506_v62 = vadd.f32 %v1503_v43, %v1498_v25  ;;  %v2096_v55 = vmul.f32 %v4217_v7, %v2095_v35  ;;  %v1556_v37 = vstv %s4598_s26  ;;  %s4720_s26 = sld [smem:[#allocation2 + $0x30]] }
 0x1aa   :  { %v1419_v1 = vadd.f32 %v1416_v44, %v1411_v54  ;;  %v1420_v9 = vadd.f32 %v1417_v60, %v1412_v57  ;;  %v2070_v44 = vmul.f32 %v4192_v51, %v2067_v17  ;;  %v2097_v54 = vmul.f32 %v4211_v21, %v2095_v35 }
 0x1ab   :  { %v1432_v10 = vpop.permute.xlu1 %1431  ;;  %v1430_v58 = vpop.permute.xlu0 %1429  ;;  %v1530_v60 = vmul.f32 %v4197_v53, %v1528_v46  ;;  %v2123_v57 = vstv %s4601_s27  ;;  %v2098_v53 = vmul.f32 %v4237_v34, %v2095_v35  ;;  %v2151_v29 = vstv %s4621_s29  ;;  %s3186_s29 = sld [smem:[#allocation2 + $0x1c]] }
 0x1ac   :  { %v1438_v19 = vadd.f32 %v1430_v58, %v1418_v18  ;;  %v1439_v8 = vadd.f32 %v1432_v10, %v1419_v1  ;;  %v1557_v58 = vmul.f32 %v4217_v7, %v1556_v37  ;;  %s5072_s27 = sld [smem:[#allocation2 + $0x54]] }
 0x1ad   :  { %2013 = vrot.lane.b32.xlu1 %v2005_v56, %s3399_s4  ;;  %2011 = vrot.lane.b32.xlu0 %v2004_v39, %s3399_s4 }
 0x1ae   :  { %v1446_v52 = vadd.f32 %v1443_v16, %v1438_v19  ;;  %v1447_v4 = vadd.f32 %v1444_v36, %v1439_v8  ;;  %v1531_v16 = vmul.f32 %v4192_v51, %v1528_v46  ;;  %v2124_v51 = vmul.f32 %v4231_v32, %v2123_v57 }
 0x1af   :  { %v1458_v24 = vpop.permute.xlu1 %1457  ;;  %v1434_v26 = vpop.permute.xlu0 %1433  ;;  %v1558_v19 = vmul.f32 %v4211_v21, %v1556_v37  ;;  %v2126_v21 = vmul.f32 %v4256_v49, %v2123_v57 }
 0x1b0   :  { %v1466_v23 = vadd.f32 %v1458_v24, %v1446_v52  ;;  %v1440_v27 = vadd.f32 %v1434_v26, %v1420_v9  ;;  %v1559_v9 = vmul.f32 %v4237_v34, %v1556_v37  ;;  %v2125_v24 = vmul.f32 %v4261_v11, %v2123_v57 }
 0x1b1   :  { %2048 = vrot.lane.b32.xlu1 %v2041_v5, %s3399_s4  ;;  %2046 = vrot.lane.b32.xlu0 %v2040_v14, %s3399_s4  ;;  %v1584_v14 = vstv %s4611_s28  ;;  %s3113_s28 = sld [smem:[#allocation2 + $0x49]] }
 0x1b2   :  { %3243 = vtanh.f32 %v1466_v23  ;;  %v1448_v50 = vadd.f32 %v1445_v40, %v1440_v27  ;;  %v1585_v26 = vmul.f32 %v4231_v32, %v1584_v14  ;;  %v2153_v32 = vmul.f32 %v4283_v13, %v2151_v29 }
 0x1b3   :  { %v1462_v15 = vpop.permute.xlu1 %1461  ;;  %v1460_v0 = vpop.permute.xlu0 %1459  ;;  %v1587_v41 = vmul.f32 %v4256_v49, %v1584_v14 }
 0x1b4   :  { %v1468_v2 = vadd.f32 %v1462_v15, %v1448_v50  ;;  %v1467_v42 = vadd.f32 %v1460_v0, %v1447_v4  ;;  %v1586_v50 = vmul.f32 %v4261_v11, %v1584_v14  ;;  %v2152_v4 = vmul.f32 %v4289_v20, %v2151_v29 }
 0x1b5   :  { %2074 = vrot.lane.b32.xlu1 %v2068_v48, %s3399_s4  ;;  %2050 = vrot.lane.b32.xlu0 %v2042_v31, %s3399_s4  ;;  %v1612_v15 = vstv %s4633_s6  ;;  %s3118_s6 = sld [smem:[#allocation4 + $0x3]] }
 0x1b6   :  { %3245 = vtanh.f32 %v1468_v2  ;;  %v1613_v11 = vmul.f32 %v4289_v20, %v1612_v15  ;;  %v1614_v49 = vmul.f32 %v4283_v13, %v1612_v15 }
 0x1b7   :  { %3247 = vtanh.f32 %v1467_v42  ;;  %v1518_v47 = vpop.permute.xlu1 %1517  ;;  %v1516_v30 = vpop.permute.xlu0 %1515  ;;  %v2179_v42 = vstv %s4636_s7  ;;  %s4964_s7 = sld [smem:[#allocation2 + $0xd]] }
 0x1b8   :  { %v1524_v38 = vadd.f32 %v1516_v30, %v1504_v33  ;;  %v1525_v56 = vadd.f32 %v1518_v47, %v1505_v12  ;;  %v2154_v12 = vmul.f32 %v4309_v3, %v2151_v29  ;;  %v1640_v30 = vstv %s3081_s12  ;;  %s5002_s12 = sld [smem:[#allocation2 + $0x38]] }
 0x1b9   :  { %2078 = vrot.lane.b32.xlu1 %v2070_v44, %s3399_s4  ;;  %2076 = vrot.lane.b32.xlu0 %v2069_v45, %s3399_s4  ;;  %v2180_v45 = vmul.f32 %v4303_v28, %v2179_v42  ;;  %v2181_v13 = vmul.f32 %v4329_v61, %v2179_v42  ;;  %v1705_v29 = vstv %s4679_s17  ;;  %s4782_s17 = sld [smem:[#allocation2 + $0x47]] }
 0x1ba   :  { %v1532_v39 = vadd.f32 %v1529_v63, %v1524_v38  ;;  %v1533_v7 = vadd.f32 %v1530_v60, %v1525_v56  ;;  %v1641_v60 = vmul.f32 %v4303_v28, %v1640_v30  ;;  %v4687_v28 = vld [vmem:[%s5464_s0 + $0x50] sm:$0xff] }
 0x1bb   :  { %v1544_v1 = vpop.permute.xlu1 %1543  ;;  %v1520_v18 = vpop.permute.xlu0 %1519 }
 0x1bc   :  { %v3244_v22 = vpop.eup %3243  ;;  %v1526_v10 = vadd.f32 %v1520_v18, %v1506_v62  ;;  %v1552_v36 = vadd.f32 %v1544_v1, %v1532_v39  ;;  %v1642_v18 = vmul.f32 %v4329_v61, %v1640_v30  ;;  %v1643_v61 = vmul.f32 %v4324_v59, %v1640_v30 }
 0x1bd   :  { %3051 = vst.msk [vmem:[%s5467_s3 + $0xa8] sm:$0xff] %vm232_vm0, %v3244_v22  ;;  %2104 = vrot.lane.b32.xlu1 %v2097_v54, %s3399_s4  ;;  %2102 = vrot.lane.b32.xlu0 %v2096_v55, %s3399_s4  ;;  %v1615_v54 = vmul.f32 %v4309_v3, %v1612_v15  ;;  %v2182_v55 = vmul.f32 %v4324_v59, %v2179_v42  ;;  %v4707_v59 = vld [vmem:[%s5464_s0 + $0x4a] sm:$0xff] }
 0x1be   :  { %v1534_v5 = vadd.f32 %v1531_v16, %v1526_v10  ;;  %v1560_v27 = vadd.f32 %v1557_v58, %v1552_v36  ;;  %v2216_v16 = vstv %s3136_s13  ;;  %v4693_v10 = vld [vmem:[%s5464_s0 + $0x48] sm:$0xff]  ;;  %s3151_s13 = sld [smem:[#allocation2 + $0x17]] }
 0x1bf   :  { %v1548_v40 = vpop.permute.xlu1 %1547  ;;  %v1546_v6 = vpop.permute.xlu0 %1545  ;;  %v2218_v22 = vmul.f32 %v4687_v28, %v2216_v16  ;;  %v2217_v58 = vmul.f32 %v4693_v10, %v2216_v16 }
 0x1c0   :  { %v3246_v8 = vpop.eup %3245  ;;  %v1553_v52 = vadd.f32 %v1546_v6, %v1533_v7  ;;  %v1554_v34 = vadd.f32 %v1548_v40, %v1534_v5  ;;  %v2244_v5 = vstv %s4669_s15  ;;  %s3102_s15 = sld [smem:[#allocation4 + $0x2]] }
 0x1c1   :  { %v3248_v17 = vpop.eup %3247  ;;  %3053 = vst.msk [vmem:[%s5467_s3 + $0xb8] sm:$0x7] %vm235_vm1, %v3246_v8  ;;  %2130 = vrot.lane.b32.xlu1 %v2124_v51, %s3399_s4  ;;  %2106 = vrot.lane.b32.xlu0 %v2098_v53, %s3399_s4  ;;  %v1677_v51 = vstv %s4667_s14  ;;  %s3150_s14 = sld [smem:[#allocation4 + $0x5]] }
 0x1c2   :  { %3052 = vst.msk [vmem:[%s5467_s3 + $0xb0] sm:$0xff] %vm232_vm0, %v3248_v17  ;;  %v1561_v23 = vadd.f32 %v1558_v19, %v1553_v52  ;;  %v1562_v2 = vadd.f32 %v1559_v9, %v1554_v34  ;;  %v1678_v8 = vmul.f32 %v4693_v10, %v1677_v51  ;;  %v2245_v52 = vmul.f32 %v4707_v59, %v2244_v5  ;;  %v4713_v9 = vld [vmem:[%s5464_s0 + $0x58] sm:$0x7] }
 0x1c3   :  { %v1574_v48 = vpop.permute.xlu1 %1573  ;;  %v1572_v31 = vpop.permute.xlu0 %1571  ;;  %v2219_v17 = vmul.f32 %v4713_v9, %v2216_v16  ;;  %v1679_v34 = vmul.f32 %v4687_v28, %v1677_v51 }
 0x1c4   :  { %v1580_v25 = vadd.f32 %v1572_v31, %v1560_v27  ;;  %v1581_v0 = vadd.f32 %v1574_v48, %v1561_v23 }
 0x1c5   :  { %2134 = vrot.lane.b32.xlu1 %v2126_v21, %s3399_s4  ;;  %2132 = vrot.lane.b32.xlu0 %v2125_v24, %s3399_s4  ;;  %v1675_v21 = vstv %s4677_s16  ;;  %s4872_s16 = sld [smem:[#allocation2 + $0x9]] }
 0x1c6   :  { %v1588_v46 = vadd.f32 %v1585_v26, %v1580_v25  ;;  %v1589_v47 = vadd.f32 %v1586_v50, %v1581_v0  ;;  %v1681_v25 = vadd.f32 %v1678_v8, %v1675_v21  ;;  %v1680_v50 = vmul.f32 %v4713_v9, %v1677_v51 }
 0x1c7   :  { %v1600_v33 = vpop.permute.xlu1 %1599  ;;  %v1576_v43 = vpop.permute.xlu0 %1575  ;;  %v1682_v0 = vadd.f32 %v1679_v34, %v1675_v21 }
 0x1c8   :  { %v1582_v44 = vadd.f32 %v1576_v43, %v1562_v2  ;;  %v1608_v63 = vadd.f32 %v1600_v33, %v1588_v46  ;;  %v1706_v46 = vmul.f32 %v4707_v59, %v1705_v29  ;;  %v2272_v2 = vstv %s4699_s2  ;;  %s3160_s2 = sld [smem:[#allocation2 + $0x56]] }
 0x1c9   :  { %2160 = vrot.lane.b32.xlu1 %v2153_v32, %s3399_s4  ;;  %2158 = vrot.lane.b32.xlu0 %v2152_v4, %s3399_s4  ;;  %v4729_v32 = vld [vmem:[%s5464_s0 + $0x5a] sm:$0x7] }
 0x1ca   :  { %v1590_v35 = vadd.f32 %v1587_v41, %v1582_v44  ;;  %v1616_v39 = vadd.f32 %v1613_v11, %v1608_v63  ;;  %v2247_v4 = vmul.f32 %v4729_v32, %v2244_v5  ;;  %v4735_v41 = vld [vmem:[%s5464_s0 + $0x52] sm:$0xff]  ;;  %v1683_v44 = vadd.f32 %v1680_v50, %v1675_v21  ;;  %v4747_v11 = vld [vmem:[%s5464_s0 + $0x68] sm:$0xff] }
 0x1cb   :  { %v1604_v38 = vpop.permute.xlu1 %1603  ;;  %v1602_v20 = vpop.permute.xlu0 %1601  ;;  %v2246_v15 = vmul.f32 %v4735_v41, %v2244_v5  ;;  %v1707_v63 = vmul.f32 %v4735_v41, %v1705_v29  ;;  %v4797_v5 = vld [vmem:[%s5464_s0 + $0x72] sm:$0x7]  ;;  %v2328_v21 = vstv %s4760_s10  ;;  %v1789_v50 = vstv %s4782_s17  ;;  %s4853_s10 = sld [smem:[#allocation2 + $0x14]]  ;;  %s4882_s17 = sld [smem:[#allocation2 + $0x36]] }
 0x1cc   :  { %v1609_v62 = vadd.f32 %v1602_v20, %v1589_v47  ;;  %v1610_v37 = vadd.f32 %v1604_v38, %v1590_v35  ;;  %v1733_v35 = vstv %s4717_s25  ;;  %v1708_v38 = vmul.f32 %v4729_v32, %v1705_v29  ;;  %s4812_s25 = sld [smem:[#allocation2 + $0x45]] }
 0x1cd   :  { %2186 = vrot.lane.b32.xlu1 %v2180_v45, %s3399_s4  ;;  %2162 = vrot.lane.b32.xlu0 %v2154_v12, %s3399_s4  ;;  %v2274_v45 = vmul.f32 %v4747_v11, %v2272_v2  ;;  %v4753_v12 = vld [vmem:[%s5464_s0 + $0x60] sm:$0xff]  ;;  %v2300_v20 = vstv %s4720_s26  ;;  %s5069_s26 = sld [smem:[#allocation2 + $0x33]] }
 0x1ce   :  { %v1617_v56 = vadd.f32 %v1614_v49, %v1609_v62  ;;  %v1618_v36 = vadd.f32 %v1615_v54, %v1610_v37  ;;  %v2273_v49 = vmul.f32 %v4753_v12, %v2272_v2  ;;  %v4772_v37 = vld [vmem:[%s5464_s0 + $0x62] sm:$0xff] }
 0x1cf   :  { %v1630_v57 = vpop.permute.xlu1 %1629  ;;  %v1628_v3 = vpop.permute.xlu0 %1627 }
 0x1d0   :  { %v1636_v1 = vadd.f32 %v1628_v3, %v1616_v39  ;;  %v1637_v53 = vadd.f32 %v1630_v57, %v1617_v56  ;;  %v2301_v56 = vmul.f32 %v4772_v37, %v2300_v20  ;;  %v4778_v39 = vld [vmem:[%s5464_s0 + $0x70] sm:$0x7]  ;;  %v1735_v57 = vmul.f32 %v4747_v11, %v1733_v35 }
 0x1d1   :  { %2190 = vrot.lane.b32.xlu1 %v2182_v55, %s3399_s4  ;;  %2188 = vrot.lane.b32.xlu0 %v2181_v13, %s3399_s4  ;;  %v2275_v16 = vmul.f32 %v4778_v39, %v2272_v2 }
 0x1d2   :  { %v1644_v19 = vadd.f32 %v1641_v60, %v1636_v1  ;;  %v1645_v26 = vadd.f32 %v1642_v18, %v1637_v53  ;;  %v1734_v60 = vmul.f32 %v4753_v12, %v1733_v35 }
 0x1d3   :  { %v1656_v7 = vpop.permute.xlu1 %1655  ;;  %v1632_v14 = vpop.permute.xlu0 %1631 }
 0x1d4   :  { %v1664_v40 = vadd.f32 %v1656_v7, %v1644_v19  ;;  %v1638_v6 = vadd.f32 %v1632_v14, %v1618_v36  ;;  %v1736_v19 = vmul.f32 %v4778_v39, %v1733_v35  ;;  %v2303_v7 = vmul.f32 %v4797_v5, %v2300_v20  ;;  %v4803_v14 = vld [vmem:[%s5464_s0 + $0x6a] sm:$0xff] }
 0x1d5   :  { %2225 = vrot.lane.b32.xlu1 %v2218_v22, %s3399_s4  ;;  %2223 = vrot.lane.b32.xlu0 %v2217_v58, %s3399_s4  ;;  %v1761_v22 = vstv %s4740_s5  ;;  %s3172_s5 = sld [smem:[#allocation2 + $0x3a]] }
 0x1d6   :  { %3249 = vtanh.f32 %v1664_v40  ;;  %v1646_v24 = vadd.f32 %v1643_v61, %v1638_v6  ;;  %v2302_v40 = vmul.f32 %v4803_v14, %v2300_v20  ;;  %v1762_v6 = vmul.f32 %v4772_v37, %v1761_v22 }
 0x1d7   :  { %v1660_v23 = vpop.permute.xlu1 %1659  ;;  %v1658_v27 = vpop.permute.xlu0 %1657  ;;  %v1817_v20 = vstv %s4812_s25  ;;  %s5062_s25 = sld [smem:[#allocation2 + $0x5e]] }
 0x1d8   :  { %v1666_v48 = vadd.f32 %v1660_v23, %v1646_v24  ;;  %v1665_v31 = vadd.f32 %v1658_v27, %v1645_v26  ;;  %v1763_v23 = vmul.f32 %v4803_v14, %v1761_v22  ;;  %v4820_v27 = vld [vmem:[%s5464_s0 + $0x80] sm:$0xff] }
 0x1d9   :  { %2251 = vrot.lane.b32.xlu1 %v2245_v52, %s3399_s4  ;;  %2227 = vrot.lane.b32.xlu0 %v2219_v17, %s3399_s4  ;;  %v2330_v29 = vmul.f32 %v4820_v27, %v2328_v21  ;;  %v1791_v35 = vmul.f32 %v4820_v27, %v1789_v50 }
 0x1da   :  { %3251 = vtanh.f32 %v1666_v48  ;;  %v4826_v48 = vld [vmem:[%s5464_s0 + $0x78] sm:$0xff] }
 0x1db   :  { %3253 = vtanh.f32 %v1665_v31  ;;  %v1695_v42 = vpop.permute.xlu1 %1694  ;;  %v1693_v33 = vpop.permute.xlu0 %1692  ;;  %v2329_v31 = vmul.f32 %v4826_v48, %v2328_v21 }
 0x1dc   :  { %v1701_v43 = vadd.f32 %v1693_v33, %v1681_v25  ;;  %v1702_v47 = vadd.f32 %v1695_v42, %v1682_v0  ;;  %v1764_v25 = vmul.f32 %v4797_v5, %v1761_v22 }
 0x1dd   :  { %2255 = vrot.lane.b32.xlu1 %v2247_v4, %s3399_s4  ;;  %2253 = vrot.lane.b32.xlu0 %v2246_v15, %s3399_s4 }
 0x1de   :  { %v1709_v30 = vadd.f32 %v1706_v46, %v1701_v43  ;;  %v1710_v18 = vadd.f32 %v1707_v63, %v1702_v47  ;;  %v2356_v46 = vstv %s4785_s18  ;;  %v1790_v43 = vmul.f32 %v4826_v48, %v1789_v50  ;;  %s4889_s18 = sld [smem:[#allocation2 + $0x2b]] }
 0x1df   :  { %v1721_v62 = vpop.permute.xlu1 %1720  ;;  %v1697_v54 = vpop.permute.xlu0 %1696 }
 0x1e0   :  { %v3250_v55 = vpop.eup %3249  ;;  %v1703_v13 = vadd.f32 %v1697_v54, %v1683_v44  ;;  %v1729_v3 = vadd.f32 %v1721_v62, %v1709_v30  ;;  %v4840_v44 = vld [vmem:[%s5464_s0 + $0x7a] sm:$0xff] }
 0x1e1   :  { %3083 = vst.msk [vmem:[%s5467_s3 + $0xc0] sm:$0xff] %vm232_vm0, %v3250_v55  ;;  %2281 = vrot.lane.b32.xlu1 %v2274_v45, %s3399_s4  ;;  %2279 = vrot.lane.b32.xlu0 %v2273_v49, %s3399_s4  ;;  %v2357_v45 = vmul.f32 %v4840_v44, %v2356_v46  ;;  %v4846_v49 = vld [vmem:[%s5464_s0 + $0x88] sm:$0x7] }
 0x1e2   :  { %v1711_v1 = vadd.f32 %v1708_v38, %v1703_v13  ;;  %v1737_v17 = vadd.f32 %v1734_v60, %v1729_v3  ;;  %v2331_v63 = vmul.f32 %v4846_v49, %v2328_v21  ;;  %v1792_v13 = vmul.f32 %v4846_v49, %v1789_v50  ;;  %v4861_v60 = vld [vmem:[%s5464_s0 + $0x8a] sm:$0x7] }
 0x1e3   :  { %v1725_v58 = vpop.permute.xlu1 %1724  ;;  %v1723_v61 = vpop.permute.xlu0 %1722  ;;  %v1818_v3 = vmul.f32 %v4840_v44, %v1817_v20  ;;  %v2421_v21 = vstv %s4853_s10  ;;  %v1852_v50 = vstv %s3102_s15  ;;  %s4982_s10 = sld [smem:[#allocation2 + $0x34]]  ;;  %s5014_s15 = sld [smem:[#allocation2 + $0x4f]] }
 0x1e4   :  { %v3252_v51 = vpop.eup %3251  ;;  %v1730_v53 = vadd.f32 %v1723_v61, %v1710_v18  ;;  %v1731_v8 = vadd.f32 %v1725_v58, %v1711_v1  ;;  %v2393_v58 = vstv %s4832_s30  ;;  %s3119_s30 = sld [smem:[#allocation2 + $0xf]] }
 0x1e5   :  { %v3254_v36 = vpop.eup %3253  ;;  %3085 = vst.msk [vmem:[%s5467_s3 + $0xd0] sm:$0x7] %vm235_vm1, %v3252_v51  ;;  %2307 = vrot.lane.b32.xlu1 %v2301_v56, %s3399_s4  ;;  %2283 = vrot.lane.b32.xlu0 %v2275_v16, %s3399_s4  ;;  %v2359_v56 = vmul.f32 %v4861_v60, %v2356_v46  ;;  %v4867_v16 = vld [vmem:[%s5464_s0 + $0x82] sm:$0xff] }
 0x1e6   :  { %3084 = vst.msk [vmem:[%s5467_s3 + $0xc8] sm:$0xff] %vm232_vm0, %v3254_v36  ;;  %v1738_v52 = vadd.f32 %v1735_v57, %v1730_v53  ;;  %v1739_v0 = vadd.f32 %v1736_v19, %v1731_v8  ;;  %v2358_v57 = vmul.f32 %v4867_v16, %v2356_v46  ;;  %v1819_v19 = vmul.f32 %v4867_v16, %v1817_v20 }
 0x1e7   :  { %v1751_v24 = vpop.permute.xlu1 %1750  ;;  %v1749_v26 = vpop.permute.xlu0 %1748  ;;  %v2395_v36 = vmul.f32 %v4687_v28, %v2393_v58 }
 0x1e8   :  { %v1757_v34 = vadd.f32 %v1749_v26, %v1737_v17  ;;  %v1758_v4 = vadd.f32 %v1751_v24, %v1738_v52 }
 0x1e9   :  { %2311 = vrot.lane.b32.xlu1 %v2303_v7, %s3399_s4  ;;  %2309 = vrot.lane.b32.xlu0 %v2302_v40, %s3399_s4  ;;  %v2394_v7 = vmul.f32 %v4693_v10, %v2393_v58  ;;  %v1820_v40 = vmul.f32 %v4861_v60, %v1817_v20  ;;  %v2449_v20 = vstv %s4882_s17  ;;  %s5263_s17 = sld [smem:[#allocation2 + $0x39]] }
 0x1ea   :  { %v1765_v15 = vadd.f32 %v1762_v6, %v1757_v34  ;;  %v1766_v38 = vadd.f32 %v1763_v23, %v1758_v4  ;;  %v1854_v6 = vstv %s4850_s9  ;;  %s4979_s9 = sld [smem:[#allocation2 + $0x2f]] }
 0x1eb   :  { %v1777_v2 = vpop.permute.xlu1 %1776  ;;  %v1753_v42 = vpop.permute.xlu0 %1752 }
 0x1ec   :  { %v1759_v33 = vadd.f32 %v1753_v42, %v1739_v0  ;;  %v1785_v47 = vadd.f32 %v1777_v2, %v1765_v15  ;;  %v1856_v0 = vmul.f32 %v4687_v28, %v1854_v6  ;;  %v1882_v42 = vstv %s4872_s16  ;;  %s5017_s16 = sld [smem:[#allocation2 + $0x3c]] }
 0x1ed   :  { %2337 = vrot.lane.b32.xlu1 %v2330_v29, %s3399_s4  ;;  %2335 = vrot.lane.b32.xlu0 %v2329_v31, %s3399_s4  ;;  %v1855_v29 = vmul.f32 %v4693_v10, %v1854_v6  ;;  %v2422_v31 = vmul.f32 %v4707_v59, %v2421_v21 }
 0x1ee   :  { %v1767_v30 = vadd.f32 %v1764_v25, %v1759_v33  ;;  %v1793_v22 = vadd.f32 %v1790_v43, %v1785_v47  ;;  %v2396_v25 = vmul.f32 %v4713_v9, %v2393_v58  ;;  %v2423_v47 = vmul.f32 %v4735_v41, %v2421_v21 }
 0x1ef   :  { %v1781_v62 = vpop.permute.xlu1 %1780  ;;  %v1779_v54 = vpop.permute.xlu0 %1778  ;;  %v1885_v58 = vmul.f32 %v4729_v32, %v1882_v42 }
 0x1f0   :  { %v1786_v55 = vadd.f32 %v1779_v54, %v1766_v38  ;;  %v1787_v1 = vadd.f32 %v1781_v62, %v1767_v30  ;;  %v1859_v30 = vadd.f32 %v1856_v0, %v1852_v50  ;;  %v1883_v38 = vmul.f32 %v4707_v59, %v1882_v42 }
 0x1f1   :  { %2363 = vrot.lane.b32.xlu1 %v2357_v45, %s3399_s4  ;;  %2339 = vrot.lane.b32.xlu0 %v2331_v63, %s3399_s4  ;;  %v1858_v45 = vadd.f32 %v1855_v29, %v1852_v50  ;;  %v1857_v63 = vmul.f32 %v4713_v9, %v1854_v6  ;;  %v2452_v6 = vmul.f32 %v4778_v39, %v2449_v20 }
 0x1f2   :  { %v1794_v18 = vadd.f32 %v1791_v35, %v1786_v55  ;;  %v1795_v17 = vadd.f32 %v1792_v13, %v1787_v1  ;;  %v2424_v35 = vmul.f32 %v4729_v32, %v2421_v21  ;;  %v1910_v1 = vstv %s4889_s18 }
 0x1f3   :  { %v1807_v61 = vpop.permute.xlu1 %1806  ;;  %v1805_v51 = vpop.permute.xlu0 %1804  ;;  %v1860_v13 = vadd.f32 %v1857_v63, %v1852_v50 }
 0x1f4   :  { %v1813_v53 = vadd.f32 %v1805_v51, %v1793_v22  ;;  %v1814_v8 = vadd.f32 %v1807_v61, %v1794_v18  ;;  %v2570_v61 = vstv %s4892_s19  ;;  %s5274_s19 = sld [smem:[#allocation2 + $0x3d]] }
 0x1f5   :  { %2367 = vrot.lane.b32.xlu1 %v2359_v56, %s3399_s4  ;;  %2365 = vrot.lane.b32.xlu0 %v2358_v57, %s3399_s4  ;;  %v2451_v56 = vmul.f32 %v4747_v11, %v2449_v20  ;;  %v2450_v57 = vmul.f32 %v4753_v12, %v2449_v20  ;;  %v2573_v50 = vmul.f32 %v4713_v9, %v2570_v61 }
 0x1f6   :  { %v1821_v52 = vadd.f32 %v1818_v3, %v1813_v53  ;;  %v1822_v15 = vadd.f32 %v1819_v19, %v1814_v8  ;;  %v1884_v3 = vmul.f32 %v4735_v41, %v1882_v42  ;;  %v1912_v8 = vmul.f32 %v4747_v11, %v1910_v1 }
 0x1f7   :  { %v1833_v24 = vpop.permute.xlu1 %1832  ;;  %v1809_v26 = vpop.permute.xlu0 %1808  ;;  %v2747_v42 = vstv %s4912_s1  ;;  %s3129_s1 = sld [smem:[#allocation2 + $0x4d]] }
 0x1f8   :  { %v1841_v34 = vadd.f32 %v1833_v24, %v1821_v52  ;;  %v1815_v23 = vadd.f32 %v1809_v26, %v1795_v17  ;;  %v1938_v24 = vstv %s4902_s20 }
 0x1f9   :  { %2402 = vrot.lane.b32.xlu1 %v2395_v36, %s3399_s4  ;;  %2400 = vrot.lane.b32.xlu0 %v2394_v7, %s3399_s4  ;;  %v1911_v7 = vmul.f32 %v4753_v12, %v1910_v1  ;;  %v1940_v63 = vmul.f32 %v4803_v14, %v1938_v24 }
 0x1fa   :  { %3255 = vtanh.f32 %v1841_v34  ;;  %v1823_v4 = vadd.f32 %v1820_v40, %v1815_v23  ;;  %v2571_v40 = vmul.f32 %v4693_v10, %v2570_v61 }
 0x1fb   :  { %v1837_v46 = vpop.permute.xlu1 %1836  ;;  %v1835_v2 = vpop.permute.xlu0 %1834 }
 0x1fc   :  { %v1843_v33 = vadd.f32 %v1837_v46, %v1823_v4  ;;  %v1842_v43 = vadd.f32 %v1835_v2, %v1822_v15  ;;  %v2572_v4 = vmul.f32 %v4687_v28, %v2570_v61  ;;  %v1939_v15 = vmul.f32 %v4772_v37, %v1938_v24 }
 0x1fd   :  { %2428 = vrot.lane.b32.xlu1 %v2422_v31, %s3399_s4  ;;  %2404 = vrot.lane.b32.xlu0 %v2396_v25, %s3399_s4  ;;  %v1913_v31 = vmul.f32 %v4778_v39, %v1910_v1 }
 0x1fe   :  { %3257 = vtanh.f32 %v1843_v33 }
 0x1ff   :  { %3259 = vtanh.f32 %v1842_v43  ;;  %v1872_v62 = vpop.permute.xlu1 %1871  ;;  %v1870_v54 = vpop.permute.xlu0 %1869 }
 0x200   :  { %v1878_v55 = vadd.f32 %v1870_v54, %v1858_v45  ;;  %v1879_v18 = vadd.f32 %v1872_v62, %v1859_v30  ;;  %v1941_v30 = vmul.f32 %v4797_v5, %v1938_v24 }
 0x201   :  { %2432 = vrot.lane.b32.xlu1 %v2424_v35, %s3399_s4  ;;  %2430 = vrot.lane.b32.xlu0 %v2423_v47, %s3399_s4  ;;  %v2749_v35 = vmul.f32 %v4687_v28, %v2747_v42  ;;  %v2748_v47 = vmul.f32 %v4693_v10, %v2747_v42 }
 0x202   :  { %v1886_v22 = vadd.f32 %v1883_v38, %v1878_v55  ;;  %v1887_v21 = vadd.f32 %v1884_v3, %v1879_v18  ;;  %v1966_v38 = vstv %s4924_s22  ;;  %v2598_v55 = vstv %s4927_s23  ;;  %s3176_s22 = sld [smem:[#allocation2 + $0x5a]]  ;;  %s3134_s23 = sld [smem:[#allocation4 + $0x4]] }
 0x203   :  { %v1898_v51 = vpop.permute.xlu1 %1897  ;;  %v1874_v53 = vpop.permute.xlu0 %1873  ;;  %v1967_v3 = vmul.f32 %v4826_v48, %v1966_v38  ;;  %v2599_v1 = vmul.f32 %v4707_v59, %v2598_v55  ;;  %v2750_v18 = vmul.f32 %v4713_v9, %v2747_v42  ;;  %v2626_v42 = vstv %s3172_s5 }
 0x204   :  { %v3256_v19 = vpop.eup %3255  ;;  %v1880_v36 = vadd.f32 %v1874_v53, %v1860_v13  ;;  %v1906_v52 = vadd.f32 %v1898_v51, %v1886_v22  ;;  %v1968_v22 = vmul.f32 %v4820_v27, %v1966_v38  ;;  %v1994_v53 = vstv %s3113_s28  ;;  %s5082_s28 = sld [smem:[#allocation2 + $0x31]] }
 0x205   :  { %3099 = vst.msk [vmem:[%s5467_s3 + $0xd8] sm:$0xff] %vm232_vm0, %v3256_v19  ;;  %2458 = vrot.lane.b32.xlu1 %v2451_v56, %s3399_s4  ;;  %2456 = vrot.lane.b32.xlu0 %v2450_v57, %s3399_s4 }
 0x206   :  { %v1888_v17 = vadd.f32 %v1885_v58, %v1880_v36  ;;  %v1914_v2 = vadd.f32 %v1911_v7, %v1906_v52  ;;  %v1995_v52 = vmul.f32 %v4840_v44, %v1994_v53 }
 0x207   :  { %v1902_v26 = vpop.permute.xlu1 %1901  ;;  %v1900_v34 = vpop.permute.xlu0 %1899 }
 0x208   :  { %v3258_v23 = vpop.eup %3257  ;;  %v1907_v29 = vadd.f32 %v1900_v34, %v1887_v21  ;;  %v1908_v0 = vadd.f32 %v1902_v26, %v1888_v17  ;;  %v2775_v26 = vstv %s3186_s29  ;;  %s5092_s29 = sld [smem:[#allocation2 + $0x58]] }
 0x209   :  { %v3260_v25 = vpop.eup %3259  ;;  %3101 = vst.msk [vmem:[%s5467_s3 + $0xe8] sm:$0x7] %vm235_vm1, %v3258_v23  ;;  %2577 = vrot.lane.b32.xlu1 %v2571_v40, %s3399_s4  ;;  %2460 = vrot.lane.b32.xlu0 %v2452_v6, %s3399_s4  ;;  %v1969_v40 = vmul.f32 %v4846_v49, %v1966_v38  ;;  %v2601_v6 = vmul.f32 %v4729_v32, %v2598_v55  ;;  %v2029_v38 = vstv %s3118_s6  ;;  %s5104_s6 = sld [smem:[#allocation2 + $0x53]] }
 0x20a   :  { %3100 = vst.msk [vmem:[%s5467_s3 + $0xe0] sm:$0xff] %vm232_vm0, %v3260_v25  ;;  %v1915_v46 = vadd.f32 %v1912_v8, %v1907_v29  ;;  %v1916_v54 = vadd.f32 %v1913_v31, %v1908_v0  ;;  %v2600_v8 = vmul.f32 %v4735_v41, %v2598_v55  ;;  %v1996_v31 = vmul.f32 %v4867_v16, %v1994_v53 }
 0x20b   :  { %v1928_v33 = vpop.permute.xlu1 %1927  ;;  %v1926_v43 = vpop.permute.xlu0 %1925  ;;  %v2777_v25 = vmul.f32 %v4735_v41, %v2775_v26 }
 0x20c   :  { %v1934_v45 = vadd.f32 %v1926_v43, %v1914_v2  ;;  %v1935_v20 = vadd.f32 %v1928_v33, %v1915_v46 }
 0x20d   :  { %2581 = vrot.lane.b32.xlu1 %v2573_v50, %s3399_s4  ;;  %2579 = vrot.lane.b32.xlu0 %v2572_v4, %s3399_s4  ;;  %v2776_v50 = vmul.f32 %v4707_v59, %v2775_v26  ;;  %v1997_v4 = vmul.f32 %v4861_v60, %v1994_v53  ;;  %v2803_v53 = vstv %s4972_s8  ;;  %s3167_s8 = sld [smem:[#allocation2 + $0x1b]] }
 0x20e   :  { %v1942_v62 = vadd.f32 %v1939_v15, %v1934_v45  ;;  %v1943_v51 = vadd.f32 %v1940_v63, %v1935_v20  ;;  %v2031_v15 = vstv %s3119_s30 }
 0x20f   :  { %v1954_v13 = vpop.permute.xlu1 %1953  ;;  %v1930_v56 = vpop.permute.xlu0 %1929 }
 0x210   :  { %v1936_v57 = vadd.f32 %v1930_v56, %v1916_v54  ;;  %v1962_v58 = vadd.f32 %v1954_v13, %v1942_v62  ;;  %v2033_v54 = vmul.f32 %v4687_v28, %v2031_v15  ;;  %v2059_v56 = vstv %s4964_s7  ;;  %s5107_s7 = sld [smem:[#allocation2 + $0x5c]] }
 0x211   :  { %2756 = vrot.lane.b32.xlu1 %v2749_v35, %s3399_s4  ;;  %2754 = vrot.lane.b32.xlu0 %v2748_v47, %s3399_s4  ;;  %v2032_v35 = vmul.f32 %v4693_v10, %v2031_v15  ;;  %v2627_v47 = vmul.f32 %v4753_v12, %v2626_v42 }
 0x212   :  { %v1944_v61 = vadd.f32 %v1941_v30, %v1936_v57  ;;  %v1970_v24 = vadd.f32 %v1967_v3, %v1962_v58  ;;  %v2778_v30 = vmul.f32 %v4729_v32, %v2775_v26  ;;  %v2628_v58 = vmul.f32 %v4747_v11, %v2626_v42 }
 0x213   :  { %v1958_v19 = vpop.permute.xlu1 %1957  ;;  %v1956_v36 = vpop.permute.xlu0 %1955  ;;  %v2062_v26 = vmul.f32 %v4729_v32, %v2059_v56 }
 0x214   :  { %v1963_v7 = vadd.f32 %v1956_v36, %v1943_v51  ;;  %v1964_v17 = vadd.f32 %v1958_v19, %v1944_v61  ;;  %v2036_v61 = vadd.f32 %v2033_v54, %v2029_v38  ;;  %v2060_v51 = vmul.f32 %v4707_v59, %v2059_v56 }
 0x215   :  { %2605 = vrot.lane.b32.xlu1 %v2599_v1, %s3399_s4  ;;  %2758 = vrot.lane.b32.xlu0 %v2750_v18, %s3399_s4  ;;  %v2035_v1 = vadd.f32 %v2032_v35, %v2029_v38  ;;  %v2034_v18 = vmul.f32 %v4713_v9, %v2031_v15  ;;  %v2806_v15 = vmul.f32 %v4778_v39, %v2803_v53 }
 0x216   :  { %v1971_v21 = vadd.f32 %v1968_v22, %v1963_v7  ;;  %v1972_v2 = vadd.f32 %v1969_v40, %v1964_v17  ;;  %v2629_v22 = vmul.f32 %v4778_v39, %v2626_v42  ;;  %v2087_v17 = vstv %s4979_s9  ;;  %s3166_s9 = sld [smem:[#allocation4 + $0x6]] }
 0x217   :  { %v1984_v34 = vpop.permute.xlu1 %1983  ;;  %v1982_v23 = vpop.permute.xlu0 %1981  ;;  %v2037_v40 = vadd.f32 %v2034_v18, %v2029_v38 }
 0x218   :  { %v1990_v29 = vadd.f32 %v1982_v23, %v1970_v24  ;;  %v1991_v0 = vadd.f32 %v1984_v34, %v1971_v21  ;;  %v2477_v34 = vstv %s4982_s10  ;;  %s3183_s10 = sld [smem:[#allocation2 + $0x1f]] }
 0x219   :  { %2609 = vrot.lane.b32.xlu1 %v2601_v6, %s3399_s4  ;;  %2607 = vrot.lane.b32.xlu0 %v2600_v8, %s3399_s4  ;;  %v2805_v6 = vmul.f32 %v4747_v11, %v2803_v53  ;;  %v2804_v8 = vmul.f32 %v4753_v12, %v2803_v53  ;;  %v2480_v38 = vmul.f32 %v4797_v5, %v2477_v34 }
 0x21a   :  { %v1998_v46 = vadd.f32 %v1995_v52, %v1990_v29  ;;  %v1999_v62 = vadd.f32 %v1996_v31, %v1991_v0  ;;  %v2061_v52 = vmul.f32 %v4735_v41, %v2059_v56  ;;  %v2089_v0 = vmul.f32 %v4747_v11, %v2087_v17 }
 0x21b   :  { %v2010_v33 = vpop.permute.xlu1 %2009  ;;  %v1986_v43 = vpop.permute.xlu0 %1985  ;;  %v2654_v56 = vstv %s5002_s12  ;;  %s3145_s12 = sld [smem:[#allocation2 + $0x51]] }
 0x21c   :  { %v2018_v45 = vadd.f32 %v2010_v33, %v1998_v46  ;;  %v1992_v63 = vadd.f32 %v1986_v43, %v1972_v2  ;;  %v2115_v33 = vstv %s4992_s11  ;;  %s3169_s11 = sld [smem:[#allocation2 + $0x19]] }
 0x21d   :  { %2784 = vrot.lane.b32.xlu1 %v2777_v25, %s3399_s4  ;;  %2782 = vrot.lane.b32.xlu0 %v2776_v50, %s3399_s4  ;;  %v2088_v50 = vmul.f32 %v4753_v12, %v2087_v17  ;;  %v2117_v18 = vmul.f32 %v4803_v14, %v2115_v33 }
 0x21e   :  { %3261 = vtanh.f32 %v2018_v45  ;;  %v2000_v20 = vadd.f32 %v1997_v4, %v1992_v63  ;;  %v2478_v4 = vmul.f32 %v4772_v37, %v2477_v34 }
 0x21f   :  { %v2014_v55 = vpop.permute.xlu1 %2013  ;;  %v2012_v13 = vpop.permute.xlu0 %2011 }
 0x220   :  { %v2020_v57 = vadd.f32 %v2014_v55, %v2000_v20  ;;  %v2019_v3 = vadd.f32 %v2012_v13, %v1999_v62  ;;  %v2479_v20 = vmul.f32 %v4803_v14, %v2477_v34  ;;  %v2116_v62 = vmul.f32 %v4772_v37, %v2115_v33 }
 0x221   :  { %2633 = vrot.lane.b32.xlu1 %v2627_v47, %s3399_s4  ;;  %2786 = vrot.lane.b32.xlu0 %v2778_v30, %s3399_s4  ;;  %v2090_v47 = vmul.f32 %v4778_v39, %v2087_v17 }
 0x222   :  { %3263 = vtanh.f32 %v2020_v57 }
 0x223   :  { %3265 = vtanh.f32 %v2019_v3  ;;  %v2049_v19 = vpop.permute.xlu1 %2048  ;;  %v2047_v36 = vpop.permute.xlu0 %2046 }
 0x224   :  { %v2055_v7 = vadd.f32 %v2047_v36, %v2035_v1  ;;  %v2056_v21 = vadd.f32 %v2049_v19, %v2036_v61  ;;  %v2118_v61 = vmul.f32 %v4797_v5, %v2115_v33 }
 0x225   :  { %2637 = vrot.lane.b32.xlu1 %v2629_v22, %s3399_s4  ;;  %2635 = vrot.lane.b32.xlu0 %v2628_v58, %s3399_s4  ;;  %v2656_v22 = vmul.f32 %v4803_v14, %v2654_v56  ;;  %v2655_v58 = vmul.f32 %v4772_v37, %v2654_v56 }
 0x226   :  { %v2063_v24 = vadd.f32 %v2060_v51, %v2055_v7  ;;  %v2064_v42 = vadd.f32 %v2061_v52, %v2056_v21  ;;  %v2143_v51 = vstv %s5014_s15  ;;  %v2831_v7 = vstv %s5017_s16  ;;  %s3153_s15 = sld [smem:[#allocation2 + $0x15]]  ;;  %s5261_s16 = sld [smem:[#allocation2 + $0x3f]] }
 0x227   :  { %v2075_v23 = vpop.permute.xlu1 %2074  ;;  %v2051_v29 = vpop.permute.xlu0 %2050  ;;  %v2144_v52 = vmul.f32 %v4826_v48, %v2143_v51  ;;  %v2832_v17 = vmul.f32 %v4772_v37, %v2831_v7  ;;  %v2657_v21 = vmul.f32 %v4797_v5, %v2654_v56  ;;  %v2682_v56 = vstv %s3176_s22 }
 0x228   :  { %v3262_v31 = vpop.eup %3261  ;;  %v2057_v25 = vadd.f32 %v2051_v29, %v2037_v40  ;;  %v2083_v46 = vadd.f32 %v2075_v23, %v2063_v24  ;;  %v2145_v24 = vmul.f32 %v4820_v27, %v2143_v51  ;;  %v2171_v29 = vstv %s3129_s1  ;;  %s3155_s1 = sld [smem:[#allocation2 + $0x37]] }
 0x229   :  { %3115 = vst.msk [vmem:[%s5467_s3 + $0xf0] sm:$0xff] %vm232_vm0, %v3262_v31  ;;  %2812 = vrot.lane.b32.xlu1 %v2805_v6, %s3399_s4  ;;  %2810 = vrot.lane.b32.xlu0 %v2804_v8, %s3399_s4 }
 0x22a   :  { %v2065_v2 = vadd.f32 %v2062_v26, %v2057_v25  ;;  %v2091_v13 = vadd.f32 %v2088_v50, %v2083_v46  ;;  %v2172_v46 = vmul.f32 %v4840_v44, %v2171_v29 }
 0x22b   :  { %v2079_v43 = vpop.permute.xlu1 %2078  ;;  %v2077_v45 = vpop.permute.xlu0 %2076 }
 0x22c   :  { %v3264_v63 = vpop.eup %3263  ;;  %v2084_v35 = vadd.f32 %v2077_v45, %v2064_v42  ;;  %v2085_v54 = vadd.f32 %v2079_v43, %v2065_v2  ;;  %v2505_v43 = vstv %s3160_s2 }
 0x22d   :  { %v3266_v30 = vpop.eup %3265  ;;  %3117 = vst.msk [vmem:[%s5467_s3 + $0x100] sm:$0x7] %vm235_vm1, %v3264_v63  ;;  %2484 = vrot.lane.b32.xlu1 %v2478_v4, %s3399_s4  ;;  %2814 = vrot.lane.b32.xlu0 %v2806_v15, %s3399_s4  ;;  %v2146_v4 = vmul.f32 %v4846_v49, %v2143_v51  ;;  %v2834_v15 = vmul.f32 %v4797_v5, %v2831_v7  ;;  %v2206_v51 = vstv %s3134_s23 }
 0x22e   :  { %3116 = vst.msk [vmem:[%s5467_s3 + $0xf8] sm:$0xff] %vm232_vm0, %v3266_v30  ;;  %v2092_v55 = vadd.f32 %v2089_v0, %v2084_v35  ;;  %v2093_v36 = vadd.f32 %v2090_v47, %v2085_v54  ;;  %v2833_v0 = vmul.f32 %v4803_v14, %v2831_v7  ;;  %v2173_v47 = vmul.f32 %v4867_v16, %v2171_v29 }
 0x22f   :  { %v2105_v57 = vpop.permute.xlu1 %2104  ;;  %v2103_v3 = vpop.permute.xlu0 %2102  ;;  %v2507_v30 = vmul.f32 %v4820_v27, %v2505_v43 }
 0x230   :  { %v2111_v1 = vadd.f32 %v2103_v3, %v2091_v13  ;;  %v2112_v53 = vadd.f32 %v2105_v57, %v2092_v55 }
 0x231   :  { %2488 = vrot.lane.b32.xlu1 %v2480_v38, %s3399_s4  ;;  %2486 = vrot.lane.b32.xlu0 %v2479_v20, %s3399_s4  ;;  %v2506_v38 = vmul.f32 %v4826_v48, %v2505_v43  ;;  %v2174_v20 = vmul.f32 %v4861_v60, %v2171_v29 }
 0x232   :  { %v2119_v19 = vadd.f32 %v2116_v62, %v2111_v1  ;;  %v2120_v23 = vadd.f32 %v2117_v18, %v2112_v53  ;;  %v2208_v62 = vstv %s3135_s21 }
 0x233   :  { %v2131_v40 = vpop.permute.xlu1 %2130  ;;  %v2107_v6 = vpop.permute.xlu0 %2106 }
 0x234   :  { %v2113_v8 = vadd.f32 %v2107_v6, %v2093_v36  ;;  %v2139_v26 = vadd.f32 %v2131_v40, %v2119_v19  ;;  %v2210_v36 = vmul.f32 %v4687_v28, %v2208_v62  ;;  %v2236_v40 = vstv %s5054_s24 }
 0x235   :  { %2663 = vrot.lane.b32.xlu1 %v2656_v22, %s3399_s4  ;;  %2661 = vrot.lane.b32.xlu0 %v2655_v58, %s3399_s4  ;;  %v2209_v22 = vmul.f32 %v4693_v10, %v2208_v62  ;;  %v2683_v58 = vmul.f32 %v4826_v48, %v2682_v56 }
 0x236   :  { %v2121_v34 = vadd.f32 %v2118_v61, %v2113_v8  ;;  %v2147_v33 = vadd.f32 %v2144_v52, %v2139_v26  ;;  %v2508_v61 = vmul.f32 %v4846_v49, %v2505_v43  ;;  %v2213_v28 = vadd.f32 %v2210_v36, %v2206_v51 }
 0x237   :  { %v2135_v31 = vpop.permute.xlu1 %2134  ;;  %v2133_v25 = vpop.permute.xlu0 %2132  ;;  %v2212_v52 = vadd.f32 %v2209_v22, %v2206_v51  ;;  %v2237_v26 = vmul.f32 %v4707_v59, %v2236_v40  ;;  %v2264_v59 = vstv %s5069_s26  ;;  %v2710_v22 = vstv %s5092_s29  ;;  %s5301_s26 = sld [smem:[#allocation2 + $0x57]] }
 0x238   :  { %v2140_v50 = vadd.f32 %v2133_v25, %v2120_v23  ;;  %v2141_v2 = vadd.f32 %v2135_v31, %v2121_v34  ;;  %v2859_v34 = vstv %s5062_s25  ;;  %s5346_s29 = sld [smem:[#allocation2 + $0x5f]] }
 0x239   :  { %2838 = vrot.lane.b32.xlu1 %v2832_v17, %s3399_s4  ;;  %2665 = vrot.lane.b32.xlu0 %v2657_v21, %s3399_s4  ;;  %v2211_v17 = vmul.f32 %v4713_v9, %v2208_v62  ;;  %v2685_v21 = vmul.f32 %v4846_v49, %v2682_v56  ;;  %v2861_v25 = vmul.f32 %v4820_v27, %v2859_v34 }
 0x23a   :  { %v2148_v42 = vadd.f32 %v2145_v24, %v2140_v50  ;;  %v2149_v13 = vadd.f32 %v2146_v4, %v2141_v2  ;;  %v2684_v24 = vmul.f32 %v4820_v27, %v2682_v56  ;;  %v2860_v50 = vmul.f32 %v4826_v48, %v2859_v34 }
 0x23b   :  { %v2161_v45 = vpop.permute.xlu1 %2160  ;;  %v2159_v63 = vpop.permute.xlu0 %2158  ;;  %v2214_v31 = vadd.f32 %v2211_v17, %v2206_v51  ;;  %v2238_v4 = vmul.f32 %v4735_v41, %v2236_v40  ;;  %v2533_v2 = vstv %s5072_s27  ;;  %v2862_v41 = vmul.f32 %v4846_v49, %v2859_v34  ;;  %s5321_s27 = sld [smem:[#allocation2 + $0x5b]] }
 0x23c   :  { %v2167_v35 = vadd.f32 %v2159_v63, %v2147_v33  ;;  %v2168_v54 = vadd.f32 %v2161_v45, %v2148_v42  ;;  %v2265_v63 = vmul.f32 %v4753_v12, %v2264_v59 }
 0x23d   :  { %2842 = vrot.lane.b32.xlu1 %v2834_v15, %s3399_s4  ;;  %2840 = vrot.lane.b32.xlu0 %v2833_v0, %s3399_s4 }
 0x23e   :  { %v2175_v55 = vadd.f32 %v2172_v46, %v2167_v35  ;;  %v2176_v19 = vadd.f32 %v2173_v47, %v2168_v54  ;;  %v2239_v46 = vmul.f32 %v4729_v32, %v2236_v40  ;;  %v2534_v32 = vmul.f32 %v4840_v44, %v2533_v2 }
 0x23f   :  { %v2187_v57 = vpop.permute.xlu1 %2186  ;;  %v2163_v3 = vpop.permute.xlu0 %2162  ;;  %v2266_v35 = vmul.f32 %v4747_v11, %v2264_v59  ;;  %v2536_v11 = vmul.f32 %v4861_v60, %v2533_v2 }
 0x240   :  { %v2195_v1 = vadd.f32 %v2187_v57, %v2175_v55  ;;  %v2169_v18 = vadd.f32 %v2163_v3, %v2149_v13  ;;  %v2267_v13 = vmul.f32 %v4778_v39, %v2264_v59  ;;  %v2535_v57 = vmul.f32 %v4867_v16, %v2533_v2 }
 0x241   :  { %2514 = vrot.lane.b32.xlu1 %v2507_v30, %s3399_s4  ;;  %2512 = vrot.lane.b32.xlu0 %v2506_v38, %s3399_s4  ;;  %v2292_v38 = vstv %s5082_s28  ;;  %s5329_s28 = sld [smem:[#allocation2 + $0x55]] }
 0x242   :  { %3267 = vtanh.f32 %v2195_v1  ;;  %v2177_v53 = vadd.f32 %v2174_v20, %v2169_v18  ;;  %v2293_v3 = vmul.f32 %v4772_v37, %v2292_v38  ;;  %v2712_v37 = vmul.f32 %v4867_v16, %v2710_v22 }
 0x243   :  { %v2191_v10 = vpop.permute.xlu1 %2190  ;;  %v2189_v7 = vpop.permute.xlu0 %2188  ;;  %v2295_v36 = vmul.f32 %v4797_v5, %v2292_v38 }
 0x244   :  { %v2197_v6 = vadd.f32 %v2191_v10, %v2177_v53  ;;  %v2196_v8 = vadd.f32 %v2189_v7, %v2176_v19  ;;  %v2294_v53 = vmul.f32 %v4803_v14, %v2292_v38  ;;  %v2711_v19 = vmul.f32 %v4840_v44, %v2710_v22 }
 0x245   :  { %2689 = vrot.lane.b32.xlu1 %v2683_v58, %s3399_s4  ;;  %2516 = vrot.lane.b32.xlu0 %v2508_v61, %s3399_s4  ;;  %v2320_v10 = vstv %s5104_s6  ;;  %v2383_v38 = vstv %s3150_s14  ;;  %s3185_s14 = sld [smem:[#allocation2 + $0x1d]] }
 0x246   :  { %3269 = vtanh.f32 %v2197_v6 }
 0x247   :  { %3271 = vtanh.f32 %v2196_v8  ;;  %v2226_v23 = vpop.permute.xlu1 %2225  ;;  %v2224_v9 = vpop.permute.xlu0 %2223  ;;  %v2887_v8 = vstv %s5107_s7 }
 0x248   :  { %v2232_v29 = vadd.f32 %v2224_v9, %v2212_v52  ;;  %v2233_v15 = vadd.f32 %v2226_v23, %v2213_v28  ;;  %v2888_v14 = vmul.f32 %v4840_v44, %v2887_v8  ;;  %v2321_v28 = vmul.f32 %v4826_v48, %v2320_v10 }
 0x249   :  { %2693 = vrot.lane.b32.xlu1 %v2685_v21, %s3399_s4  ;;  %2691 = vrot.lane.b32.xlu0 %v2684_v24, %s3399_s4  ;;  %v2713_v24 = vmul.f32 %v4861_v60, %v2710_v22  ;;  %v2322_v23 = vmul.f32 %v4820_v27, %v2320_v10  ;;  %v2323_v48 = vmul.f32 %v4846_v49, %v2320_v10 }
 0x24a   :  { %v2240_v0 = vadd.f32 %v2237_v26, %v2232_v29  ;;  %v2241_v12 = vadd.f32 %v2238_v4, %v2233_v15  ;;  %v2889_v4 = vmul.f32 %v4867_v16, %v2887_v8 }
 0x24b   :  { %v2252_v42 = vpop.permute.xlu1 %2251  ;;  %v2228_v33 = vpop.permute.xlu0 %2227 }
 0x24c   :  { %v3268_v43 = vpop.eup %3267  ;;  %v2234_v45 = vadd.f32 %v2228_v33, %v2214_v31  ;;  %v2260_v47 = vadd.f32 %v2252_v42, %v2240_v0  ;;  %v2348_v31 = vstv %s3145_s12  ;;  %s3157_s12 = sld [smem:[#allocation2 + $0x35]] }
 0x24d   :  { %3131 = vst.msk [vmem:[%s5467_s3 + $0x108] sm:$0xff] %vm232_vm0, %v3268_v43  ;;  %2868 = vrot.lane.b32.xlu1 %v2861_v25, %s3399_s4  ;;  %2866 = vrot.lane.b32.xlu0 %v2860_v50, %s3399_s4  ;;  %v2890_v50 = vmul.f32 %v4861_v60, %v2887_v8  ;;  %v2349_v27 = vmul.f32 %v4840_v44, %v2348_v31  ;;  %v2385_v43 = vstv %s3151_s13  ;;  %s3182_s13 = sld [smem:[#allocation4 + $0x7]] }
 0x24e   :  { %v2242_v30 = vadd.f32 %v2239_v46, %v2234_v45  ;;  %v2268_v18 = vadd.f32 %v2265_v63, %v2260_v47  ;;  %v2350_v33 = vmul.f32 %v4867_v16, %v2348_v31 }
 0x24f   :  { %v2256_v20 = vpop.permute.xlu1 %2255  ;;  %v2254_v62 = vpop.permute.xlu0 %2253 }
 0x250   :  { %v3270_v54 = vpop.eup %3269  ;;  %v2261_v55 = vadd.f32 %v2254_v62, %v2241_v12  ;;  %v2262_v39 = vadd.f32 %v2256_v20, %v2242_v30  ;;  %v5151_v30 = vld [vmem:[%s5464_s0 + $0x48] sm:$0xff]  ;;  %v5157_v62 = vld [vmem:[%s5464_s0 + $0x50] sm:$0xff] }
 0x251   :  { %v3272_v56 = vpop.eup %3271  ;;  %3133 = vst.msk [vmem:[%s5467_s3 + $0x118] sm:$0x7] %vm235_vm1, %v3270_v54  ;;  %2540 = vrot.lane.b32.xlu1 %v2534_v32, %s3399_s4  ;;  %2870 = vrot.lane.b32.xlu0 %v2862_v41, %s3399_s4  ;;  %v2351_v32 = vmul.f32 %v4861_v60, %v2348_v31  ;;  %v2386_v12 = vmul.f32 %v5151_v30, %v2385_v43 }
 0x252   :  { %3132 = vst.msk [vmem:[%s5467_s3 + $0x110] sm:$0xff] %vm232_vm0, %v3272_v56  ;;  %v2269_v1 = vadd.f32 %v2266_v35, %v2261_v55  ;;  %v2270_v6 = vadd.f32 %v2267_v13, %v2262_v39  ;;  %v2387_v60 = vmul.f32 %v5157_v62, %v2385_v43  ;;  %v2413_v13 = vstv %s3153_s15  ;;  %s5257_s15 = sld [smem:[#allocation2 + $0x3b]] }
 0x253   :  { %v2282_v58 = vpop.permute.xlu1 %2281  ;;  %v2280_v61 = vpop.permute.xlu0 %2279 }
 0x254   :  { %v2288_v51 = vadd.f32 %v2280_v61, %v2268_v18  ;;  %v2289_v7 = vadd.f32 %v2282_v58, %v2269_v1  ;;  %v2390_v1 = vadd.f32 %v2387_v60, %v2383_v38  ;;  %v5169_v18 = vld [vmem:[%s5464_s0 + $0x4a] sm:$0xff]  ;;  %v2562_v60 = vstv %s3167_s8 }
 0x255   :  { %2544 = vrot.lane.b32.xlu1 %v2536_v11, %s3399_s4  ;;  %2542 = vrot.lane.b32.xlu0 %v2535_v57, %s3399_s4  ;;  %v2389_v57 = vadd.f32 %v2386_v12, %v2383_v38  ;;  %v2414_v22 = vmul.f32 %v5169_v18, %v2413_v13 }
 0x256   :  { %v2296_v40 = vadd.f32 %v2293_v3, %v2288_v51  ;;  %v2297_v34 = vadd.f32 %v2294_v53, %v2289_v7  ;;  %v5163_v3 = vld [vmem:[%s5464_s0 + $0x58] sm:$0x7] }
 0x257   :  { %v2308_v52 = vpop.permute.xlu1 %2307  ;;  %v2284_v17 = vpop.permute.xlu0 %2283  ;;  %v2388_v39 = vmul.f32 %v5163_v3, %v2385_v43  ;;  %v5181_v7 = vld [vmem:[%s5464_s0 + $0x52] sm:$0xff] }
 0x258   :  { %v2290_v21 = vadd.f32 %v2284_v17, %v2270_v6  ;;  %v2316_v5 = vadd.f32 %v2308_v52, %v2296_v40  ;;  %v2415_v40 = vmul.f32 %v5181_v7, %v2413_v13 }
 0x259   :  { %2719 = vrot.lane.b32.xlu1 %v2712_v37, %s3399_s4  ;;  %2717 = vrot.lane.b32.xlu0 %v2711_v19, %s3399_s4  ;;  %v2391_v53 = vadd.f32 %v2388_v39, %v2383_v38 }
 0x25a   :  { %v2298_v26 = vadd.f32 %v2295_v36, %v2290_v21  ;;  %v2324_v0 = vadd.f32 %v2321_v28, %v2316_v5  ;;  %v5175_v36 = vld [vmem:[%s5464_s0 + $0x5a] sm:$0x7]  ;;  %v5195_v5 = vld [vmem:[%s5464_s0 + $0x68] sm:$0xff] }
 0x25b   :  { %v2312_v9 = vpop.permute.xlu1 %2311  ;;  %v2310_v29 = vpop.permute.xlu0 %2309  ;;  %v2416_v10 = vmul.f32 %v5175_v36, %v2413_v13  ;;  %v2563_v13 = vmul.f32 %v5151_v30, %v2562_v60 }
 0x25c   :  { %v2317_v25 = vadd.f32 %v2310_v29, %v2297_v34  ;;  %v2318_v59 = vadd.f32 %v2312_v9, %v2298_v26 }
 0x25d   :  { %2894 = vrot.lane.b32.xlu1 %v2888_v14, %s3399_s4  ;;  %2721 = vrot.lane.b32.xlu0 %v2713_v24, %s3399_s4  ;;  %v5190_v14 = vstv %s3155_s1 }
 0x25e   :  { %v2325_v15 = vadd.f32 %v2322_v23, %v2317_v25  ;;  %v2326_v49 = vadd.f32 %v2323_v48, %v2318_v59  ;;  %v2443_v26 = vmul.f32 %v5195_v5, %v5190_v14 }
 0x25f   :  { %v2338_v46 = vpop.permute.xlu1 %2337  ;;  %v2336_v2 = vpop.permute.xlu0 %2335 }
 0x260   :  { %v2344_v42 = vadd.f32 %v2336_v2, %v2324_v0  ;;  %v2345_v45 = vadd.f32 %v2338_v46, %v2325_v15 }
 0x261   :  { %2898 = vrot.lane.b32.xlu1 %v2890_v50, %s3399_s4  ;;  %2896 = vrot.lane.b32.xlu0 %v2889_v4, %s3399_s4 }
 0x262   :  { %v2352_v63 = vadd.f32 %v2349_v27, %v2344_v42  ;;  %v2353_v20 = vadd.f32 %v2350_v33, %v2345_v45 }
 0x263   :  { %v2364_v41 = vpop.permute.xlu1 %2363  ;;  %v2340_v35 = vpop.permute.xlu0 %2339 }
 0x264   :  { %v2372_v47 = vadd.f32 %v2364_v41, %v2352_v63  ;;  %v2346_v44 = vadd.f32 %v2340_v35, %v2326_v49 }
 0x266   :  { %3273 = vtanh.f32 %v2372_v47  ;;  %v2354_v16 = vadd.f32 %v2351_v32, %v2346_v44 }
 0x267   :  { %v2368_v54 = vpop.permute.xlu1 %2367  ;;  %v2366_v55 = vpop.permute.xlu0 %2365 }
 0x268   :  { %v2374_v56 = vadd.f32 %v2368_v54, %v2354_v16  ;;  %v2373_v11 = vadd.f32 %v2366_v55, %v2353_v20 }
 0x26a   :  { %3275 = vtanh.f32 %v2374_v56  ;;  %v2560_v56 = vstv %s3166_s9 }
 0x26b   :  { %3277 = vtanh.f32 %v2373_v11  ;;  %v2403_v58 = vpop.permute.xlu1 %2402  ;;  %v2401_v61 = vpop.permute.xlu0 %2400  ;;  %v2564_v11 = vmul.f32 %v5157_v62, %v2562_v60 }
 0x26c   :  { %v2409_v51 = vadd.f32 %v2401_v61, %v2389_v57  ;;  %v2410_v37 = vadd.f32 %v2403_v58, %v2390_v1  ;;  %v2739_v57 = vstv %s3183_s10  ;;  %v2565_v61 = vmul.f32 %v5163_v3, %v2562_v60  ;;  %s5370_s10 = sld [smem:[#allocation2 + $0x59]] }
 0x26e   :  { %v2417_v19 = vadd.f32 %v2414_v22, %v2409_v51  ;;  %v2418_v28 = vadd.f32 %v2415_v40, %v2410_v37  ;;  %v3358_v22 = vld [vmem:[%s5464_s0 + $0x60] sm:$0xff]  ;;  %v2590_v51 = vstv %s3169_s11  ;;  %v2566_v37 = vadd.f32 %v2563_v13, %v2560_v56 }
 0x26f   :  { %v2429_v6 = vpop.permute.xlu1 %2428  ;;  %v2405_v8 = vpop.permute.xlu0 %2404  ;;  %v2442_v58 = vmul.f32 %v3358_v22, %v5190_v14  ;;  %v2741_v40 = vmul.f32 %v5157_v62, %v2739_v57 }
 0x270   :  { %v3274_v52 = vpop.eup %3273  ;;  %v5184_v17 = vadd.f32 %v2429_v6, %v2417_v19  ;;  %v2411_v21 = vadd.f32 %v2405_v8, %v2391_v53  ;;  %v2469_v53 = vstv %s3157_s12  ;;  %v3359_v19 = vld [vmem:[%s5464_s0 + $0x70] sm:$0x7]  ;;  %v2740_v6 = vmul.f32 %v5151_v30, %v2739_v57 }
 0x271   :  { %3147 = vst.msk [vmem:[%s5467_s3 + $0x120] sm:$0xff] %vm232_vm0, %v3274_v52  ;;  %v2567_v8 = vadd.f32 %v2564_v11, %v2560_v56  ;;  %v2737_v52 = vstv %s3182_s13  ;;  %v3362_v30 = vld [vmem:[%s5464_s0 + $0x6a] sm:$0xff]  ;;  %s5393_s13 = sld [smem:[#allocation2 + $0x5d]] }
 0x272   :  { %v2419_v24 = vadd.f32 %v2416_v10, %v2411_v21  ;;  %v2444_v10 = vmul.f32 %v3359_v19, %v5190_v14  ;;  %v2742_v21 = vmul.f32 %v5163_v3, %v2739_v57  ;;  %v3361_v14 = vld [vmem:[%s5464_s0 + $0x72] sm:$0x7]  ;;  %v5295_v3 = vmul.f32 %v3362_v30, %v2469_v53 }
 0x273   :  { %v2433_v34 = vpop.permute.xlu1 %2432  ;;  %v2431_v23 = vpop.permute.xlu0 %2430  ;;  %v5290_v62 = vmul.f32 %v3361_v14, %v2469_v53  ;;  %v2744_v60 = vadd.f32 %v2741_v40, %v2737_v52  ;;  %v2743_v13 = vadd.f32 %v2740_v6, %v2737_v52  ;;  %v2445_v6 = vadd.f32 %v2442_v58, %v5184_v17 }
 0x274   :  { %v3276_v9 = vpop.eup %3275  ;;  %v5199_v29 = vadd.f32 %v2433_v34, %v2419_v24  ;;  %v2438_v31 = vadd.f32 %v2431_v23, %v2418_v28  ;;  %v2767_v24 = vstv %s3185_s14  ;;  %v2591_v28 = vmul.f32 %v5169_v18, %v2590_v51 }
 0x275   :  { %v3278_v25 = vpop.eup %3277  ;;  %3149 = vst.msk [vmem:[%s5467_s3 + $0x130] sm:$0x7] %vm235_vm1, %v3276_v9  ;;  %v2769_v11 = vmul.f32 %v5181_v7, %v2767_v24  ;;  %v2768_v57 = vmul.f32 %v5169_v18, %v2767_v24 }
 0x276   :  { %3148 = vst.msk [vmem:[%s5467_s3 + $0x128] sm:$0xff] %vm232_vm0, %v3278_v25  ;;  %v2446_v50 = vadd.f32 %v2443_v26, %v2438_v31  ;;  %v3360_v26 = vld [vmem:[%s5464_s0 + $0x62] sm:$0xff]  ;;  %v2568_v31 = vadd.f32 %v2565_v61, %v2560_v56  ;;  %v2593_v25 = vmul.f32 %v5175_v36, %v2590_v51  ;;  %v2770_v56 = vmul.f32 %v5175_v36, %v2767_v24 }
 0x277   :  { %v2459_v4 = vpop.permute.xlu1 %2458  ;;  %v5209_v48 = vpop.permute.xlu0 %2456  ;;  %v2470_v34 = vmul.f32 %v3360_v26, %v2469_v53 }
 0x278   :  { %v5211_v59 = vadd.f32 %v2459_v4, %v2446_v50  ;;  %v2592_v50 = vmul.f32 %v5181_v7, %v2590_v51  ;;  %v2618_v4 = vstv %s5257_s15  ;;  %v2465_v17 = vadd.f32 %v5209_v48, %v2445_v6 }
 0x279   :  { %v2621_v61 = vmul.f32 %v3359_v19, %v2618_v4  ;;  %v2620_v18 = vmul.f32 %v5195_v5, %v2618_v4 }
 0x27a   :  { %v2474_v6 = vadd.f32 %v5295_v3, %v5211_v59 }
 0x27b   :  { %v5213_v15 = vpop.permute.xlu1 %2577  ;;  %v5215_v0 = vpop.permute.xlu0 %2460 }
 0x27c   :  { %v2586_v53 = vadd.f32 %v5213_v15, %v2566_v37  ;;  %v2823_v15 = vstv %s5274_s19 }
 0x27d   :  { %v5332_v24 = vmul.f32 %v3360_v26, %v2823_v15 }
 0x27e   :  { %v2594_v58 = vadd.f32 %v2591_v28, %v2586_v53 }
 0x27f   :  { %v5217_v27 = vpop.permute.xlu1 %2581  ;;  %v5219_v46 = vpop.permute.xlu0 %2579 }
 0x280   :  { %v2588_v7 = vadd.f32 %v5217_v27, %v2568_v31 }
 0x283   :  { %v5221_v2 = vpop.permute.xlu1 %2756  ;;  %v5223_v42 = vpop.permute.xlu0 %2754 }
 0x284   :  { %v2764_v48 = vadd.f32 %v5221_v2, %v2744_v60  ;;  %v5356_v2 = vld [vmem:[%s5464_s0 + $0x80] sm:$0xff]  ;;  %v2674_v60 = vstv %s5321_s27 }
 0x287   :  { %v5225_v33 = vpop.permute.xlu1 %2605  ;;  %v5227_v43 = vpop.permute.xlu0 %2758 }
 0x28b   :  { %v5229_v45 = vpop.permute.xlu1 %2609  ;;  %v5231_v63 = vpop.permute.xlu0 %2607 }
 0x28f   :  { %v5233_v49 = vpop.permute.xlu1 %2784  ;;  %v5235_v32 = vpop.permute.xlu0 %2782 }
 0x293   :  { %v5237_v41 = vpop.permute.xlu1 %2633  ;;  %v5239_v35 = vpop.permute.xlu0 %2786 }
 0x297   :  { %v5241_v47 = vpop.permute.xlu1 %2637  ;;  %v5243_v44 = vpop.permute.xlu0 %2635 }
 0x29b   :  { %v5245_v12 = vpop.permute.xlu1 %2812  ;;  %v5247_v38 = vpop.permute.xlu0 %2810 }
 0x29c   :  { %5468 = vst [vmem:[#allocation8_spill] sm:$0xff] %v5245_v12  ;;  %v2619_v12 = vmul.f32 %v3358_v22, %v2618_v4  ;;  %v2497_v4 = vstv %s5301_s26 }
 0x29f   :  { %v5249_v16 = vpop.permute.xlu1 %2484  ;;  %v5251_v20 = vpop.permute.xlu0 %2814 }
 0x2a0   :  { %5469 = vst [vmem:[#allocation9_spill] sm:$0xff] %v5251_v20  ;;  %v2795_v20 = vstv %s5261_s16 }
 0x2a1   :  { %v5325_v36 = vmul.f32 %v5195_v5, %v2795_v20  ;;  %v2796_v37 = vmul.f32 %v3358_v22, %v2795_v20  ;;  %v2447_v22 = vadd.f32 %v2444_v10, %v5199_v29  ;;  %v2473_v29 = vadd.f32 %v2470_v34, %v2465_v17  ;;  %v5367_v34 = vld [vmem:[%s5464_s0 + $0x88] sm:$0x7] }
 0x2a2   :  { %v5350_v10 = vmul.f32 %v3361_v14, %v2823_v15 }
 0x2a3   :  { %v5253_v54 = vpop.permute.xlu1 %2488  ;;  %v5255_v55 = vpop.permute.xlu0 %2486 }
 0x2a7   :  { %v5265_v39 = vpop.permute.xlu1 %2663  ;;  %v5267_v1 = vpop.permute.xlu0 %2661 }
 0x2a8   :  { %5470 = vst [vmem:[#allocation10_spill] sm:$0xff] %v5267_v1  ;;  %v2646_v1 = vstv %s5263_s17 }
 0x2a9   :  { %v5334_v31 = vmul.f32 %v3361_v14, %v2646_v1 }
 0x2ab   :  { %v5297_v23 = vpop.permute.xlu1 %2838  ;;  %v5299_v9 = vpop.permute.xlu0 %2665 }
 0x2ac   :  { %5471 = vst [vmem:[#allocation11_spill] sm:$0xff] %v5297_v23  ;;  %5472 = vst [vmem:[#allocation12_spill] sm:$0xff] %v5299_v9  ;;  %v2587_v9 = vadd.f32 %v5219_v46, %v2567_v8  ;;  %v2745_v23 = vadd.f32 %v2742_v21, %v2737_v52  ;;  %v2763_v46 = vadd.f32 %v5223_v42, %v2743_v13 }
 0x2ad   :  { %v5327_v8 = vmul.f32 %v3359_v19, %v2795_v20  ;;  %v2647_v52 = vmul.f32 %v3360_v26, %v2646_v1  ;;  %v2648_v21 = vmul.f32 %v3362_v30, %v2646_v1  ;;  %v2614_v20 = vadd.f32 %v5225_v33, %v2594_v58 }
 0x2ae   :  { %v2595_v27 = vadd.f32 %v2592_v50, %v2587_v9  ;;  %v2596_v19 = vadd.f32 %v2593_v25, %v2588_v7  ;;  %v2765_v28 = vadd.f32 %v5227_v43, %v2745_v23  ;;  %v2771_v9 = vadd.f32 %v2768_v57, %v2763_v46 }
 0x2af   :  { %v5313_v51 = vpop.permute.xlu1 %2842  ;;  %v5315_v40 = vpop.permute.xlu0 %2840  ;;  %v5344_v26 = vmul.f32 %v3362_v30, %v2823_v15  ;;  %v2467_v1 = vadd.f32 %v5215_v0, %v2447_v22  ;;  %v2499_v43 = vmul.f32 %v5356_v2, %v2497_v4  ;;  %v3364_v0 = vld [vmem:[%s5464_s0 + $0x78] sm:$0xff]  ;;  %v2622_v30 = vadd.f32 %v2619_v12, %v2614_v20 }
 0x2b0   :  { %v2615_v13 = vadd.f32 %v5231_v63, %v2595_v27  ;;  %v2616_v50 = vadd.f32 %v5229_v45, %v2596_v19  ;;  %v2791_v33 = vadd.f32 %v5235_v32, %v2771_v9  ;;  %v2498_v63 = vmul.f32 %v3364_v0, %v2497_v4 }
 0x2b1   :  { %v2500_v32 = vmul.f32 %v5367_v34, %v2497_v4  ;;  %v2493_v25 = vadd.f32 %v5249_v16, %v2473_v29  ;;  %v2772_v57 = vadd.f32 %v2769_v11, %v2764_v48  ;;  %v2773_v53 = vadd.f32 %v2770_v56, %v2765_v28 }
 0x2b2   :  { %v2623_v23 = vadd.f32 %v2620_v18, %v2615_v13  ;;  %v2525_v7 = vstv %s5329_s28  ;;  %v2642_v15 = vadd.f32 %v5237_v41, %v2622_v30  ;;  %v2624_v46 = vadd.f32 %v2621_v61, %v2616_v50  ;;  %v5474_v50 = vld [vmem:[#allocation8_spill] sm:$0xff] }
 0x2b3   :  { %v5337_v42 = vpop.permute.xlu1 %2514  ;;  %v2513_v5 = vpop.permute.xlu0 %2512  ;;  %v2475_v58 = vadd.f32 %v5290_v62, %v2467_v1  ;;  %v2792_v12 = vadd.f32 %v5233_v49, %v2772_v57  ;;  %v2793_v18 = vadd.f32 %v5239_v35, %v2773_v53  ;;  %v2799_v16 = vadd.f32 %v2796_v37, %v2791_v33  ;;  %v3366_v35 = vld [vmem:[%s5464_s0 + $0x7a] sm:$0xff]  ;;  %v5475_v33 = vld [vmem:[#allocation9_spill] sm:$0xff] }
 0x2b4   :  { %v2643_v17 = vadd.f32 %v5243_v44, %v2623_v23  ;;  %v2494_v11 = vadd.f32 %v5255_v55, %v2474_v6  ;;  %v2644_v59 = vadd.f32 %v5241_v47, %v2624_v46  ;;  %v2501_v3 = vadd.f32 %v2498_v63, %v2493_v25  ;;  %v5477_v57 = vld [vmem:[#allocation12_spill] sm:$0xff] }
 0x2b5   :  { %v2495_v41 = vadd.f32 %v5253_v54, %v2475_v58  ;;  %v2675_v61 = vmul.f32 %v3364_v0, %v2674_v60  ;;  %v2819_v44 = vadd.f32 %v5247_v38, %v2799_v16  ;;  %v2676_v62 = vmul.f32 %v5356_v2, %v2674_v60  ;;  %v5398_v54 = vld [vmem:[%s5464_s0 + $0x82] sm:$0xff] }
 0x2b6   :  { %v2851_v49 = vstv %s5346_s29  ;;  %v2526_v55 = vmul.f32 %v3366_v35, %v2525_v7  ;;  %v2651_v37 = vadd.f32 %v2648_v21, %v2643_v17  ;;  %v2650_v4 = vadd.f32 %v2647_v52, %v2642_v15  ;;  %v5473_v21 = vld [vmem:[#allocation10_spill] sm:$0xff] }
 0x2b7   :  { %v5362_v45 = vpop.permute.xlu1 %2689  ;;  %v2517_v14 = vpop.permute.xlu0 %2516  ;;  %v2521_v47 = vadd.f32 %v2513_v5, %v2501_v3  ;;  %v2527_v38 = vmul.f32 %v5398_v54, %v2525_v7  ;;  %v2800_v22 = vadd.f32 %v5325_v36, %v2792_v12  ;;  %v2801_v20 = vadd.f32 %v5327_v8, %v2793_v18 }
 0x2b8   :  { %v2502_v19 = vadd.f32 %v2499_v43, %v2494_v11  ;;  %v2702_v28 = vstv %s5370_s10  ;;  %v2671_v9 = vadd.f32 %v5265_v39, %v2651_v37  ;;  %v2670_v52 = vadd.f32 %v5473_v21, %v2650_v4  ;;  %v3368_v39 = vld [vmem:[%s5464_s0 + $0x8a] sm:$0x7] }
 0x2b9   :  { %v2652_v5 = vadd.f32 %v5334_v31, %v2644_v59  ;;  %v2503_v1 = vadd.f32 %v2500_v32, %v2495_v41  ;;  %v2820_v29 = vadd.f32 %v5474_v50, %v2800_v22  ;;  %v2821_v63 = vadd.f32 %v5475_v33, %v2801_v20  ;;  %v5476_v31 = vld [vmem:[#allocation11_spill] sm:$0xff] }
 0x2ba   :  { %v2827_v30 = vadd.f32 %v5332_v24, %v2819_v44  ;;  %v2522_v36 = vadd.f32 %v5337_v42, %v2502_v19  ;;  %v2677_v43 = vmul.f32 %v5367_v34, %v2674_v60  ;;  %v2529_v23 = vadd.f32 %v2526_v55, %v2521_v47 }
 0x2bb   :  { %v5383_v56 = vpop.permute.xlu1 %2693  ;;  %v2692_v27 = vpop.permute.xlu0 %2691  ;;  %v2523_v8 = vadd.f32 %v2517_v14, %v2503_v1  ;;  %v2528_v25 = vmul.f32 %v3368_v39, %v2525_v7  ;;  %v2672_v53 = vadd.f32 %v5477_v57, %v2652_v5  ;;  %v2852_v6 = vmul.f32 %v3364_v0, %v2851_v49 }
 0x2bc   :  { %v2847_v32 = vadd.f32 %v5476_v31, %v2827_v30  ;;  %v2703_v24 = vmul.f32 %v3366_v35, %v2702_v28  ;;  %v2678_v17 = vadd.f32 %v2675_v61, %v2670_v52  ;;  %v2679_v42 = vadd.f32 %v2676_v62, %v2671_v9 }
 0x2bd   :  { %v2704_v60 = vmul.f32 %v5398_v54, %v2702_v28  ;;  %v2829_v58 = vadd.f32 %v5350_v10, %v2821_v63  ;;  %v2828_v12 = vadd.f32 %v5344_v26, %v2820_v29  ;;  %v2530_v18 = vadd.f32 %v2527_v38, %v2522_v36 }
 0x2be   :  { %v2879_v16 = vstv %s5393_s13  ;;  %v2698_v7 = vadd.f32 %v5362_v45, %v2678_v17  ;;  %v2699_v11 = vadd.f32 %v2692_v27, %v2679_v42  ;;  %v2531_v59 = vadd.f32 %v2528_v25, %v2523_v8 }
 0x2bf   :  { %v2869_v13 = vpop.permute.xlu1 %2868  ;;  %v2867_v48 = vpop.permute.xlu0 %2866  ;;  %v2680_v0 = vadd.f32 %v2677_v43, %v2672_v53  ;;  %v2853_v41 = vmul.f32 %v5356_v2, %v2851_v49  ;;  %v2855_v3 = vadd.f32 %v2852_v6, %v2847_v32  ;;  %v2854_v61 = vmul.f32 %v5367_v34, %v2851_v49 }
 0x2c0   :  { %v2849_v55 = vadd.f32 %v5313_v51, %v2829_v58  ;;  %v2848_v10 = vadd.f32 %v5315_v40, %v2828_v12  ;;  %v2880_v45 = vmul.f32 %v3366_v35, %v2879_v16  ;;  %v2705_v27 = vmul.f32 %v3368_v39, %v2702_v28 }
 0x2c1   :  { %v2700_v4 = vadd.f32 %v5383_v56, %v2680_v0  ;;  %v2875_v47 = vadd.f32 %v2867_v48, %v2855_v3  ;;  %v2707_v38 = vadd.f32 %v2704_v60, %v2699_v11  ;;  %v2706_v22 = vadd.f32 %v2703_v24, %v2698_v7 }
 0x2c2   :  { %v2856_v34 = vadd.f32 %v2853_v41, %v2848_v10  ;;  %v2857_v49 = vadd.f32 %v2854_v61, %v2849_v55  ;;  %v2882_v21 = vmul.f32 %v3368_v39, %v2879_v16  ;;  %v2881_v40 = vmul.f32 %v5398_v54, %v2879_v16 }
 0x2c3   :  { %v2541_v15 = vpop.permute.xlu1 %2540  ;;  %v2871_v46 = vpop.permute.xlu0 %2870  ;;  %v2708_v51 = vadd.f32 %v2705_v27, %v2700_v4  ;;  %v2883_v56 = vadd.f32 %v2880_v45, %v2875_v47 }
 0x2c4   :  { %v2549_v14 = vadd.f32 %v2541_v15, %v2529_v23  ;;  %v2876_v52 = vadd.f32 %v2869_v13, %v2856_v34  ;;  %v2877_v5 = vadd.f32 %v2871_v46, %v2857_v49 }
 0x2c6   :  { %3279 = vtanh.f32 %v2549_v14  ;;  %v2885_v29 = vadd.f32 %v2882_v21, %v2877_v5  ;;  %v2884_v33 = vadd.f32 %v2881_v40, %v2876_v52 }
 0x2c7   :  { %v2545_v44 = vpop.permute.xlu1 %2544  ;;  %v2543_v62 = vpop.permute.xlu0 %2542 }
 0x2c8   :  { %v2551_v26 = vadd.f32 %v2545_v44, %v2531_v59  ;;  %v2550_v37 = vadd.f32 %v2543_v62, %v2530_v18 }
 0x2ca   :  { %3281 = vtanh.f32 %v2551_v26 }
 0x2cb   :  { %3283 = vtanh.f32 %v2550_v37  ;;  %v2720_v2 = vpop.permute.xlu1 %2719  ;;  %v2718_v20 = vpop.permute.xlu0 %2717 }
 0x2cc   :  { %v2727_v19 = vadd.f32 %v2720_v2, %v2707_v38  ;;  %v2726_v9 = vadd.f32 %v2718_v20, %v2706_v22 }
 0x2ce   :  { %3285 = vtanh.f32 %v2727_v19 }
 0x2cf   :  { %3287 = vtanh.f32 %v2726_v9  ;;  %v2895_v35 = vpop.permute.xlu1 %2894  ;;  %v2722_v48 = vpop.permute.xlu0 %2721 }
 0x2d0   :  { %v3280_v28 = vpop.eup %3279  ;;  %v2903_v1 = vadd.f32 %v2895_v35, %v2883_v56  ;;  %v2728_v50 = vadd.f32 %v2722_v48, %v2708_v51 }
 0x2d1   :  { %3163 = vst.msk [vmem:[%s5467_s3 + $0x138] sm:$0xff] %vm232_vm0, %v3280_v28 }
 0x2d2   :  { %3289 = vtanh.f32 %v2903_v1 }
 0x2d3   :  { %3291 = vtanh.f32 %v2728_v50  ;;  %v2899_v54 = vpop.permute.xlu1 %2898  ;;  %v2897_v13 = vpop.permute.xlu0 %2896 }
 0x2d4   :  { %v3282_v63 = vpop.eup %3281  ;;  %v2905_v30 = vadd.f32 %v2899_v54, %v2885_v29  ;;  %v2904_v36 = vadd.f32 %v2897_v13, %v2884_v33 }
 0x2d5   :  { %v3284_v8 = vpop.eup %3283  ;;  %3165 = vst.msk [vmem:[%s5467_s3 + $0x148] sm:$0x7] %vm235_vm1, %v3282_v63 }
 0x2d6   :  { %3164 = vst.msk [vmem:[%s5467_s3 + $0x140] sm:$0xff] %vm232_vm0, %v3284_v8  ;;  %3293 = vtanh.f32 %v2905_v30 }
 0x2d7   :  { %3295 = vtanh.f32 %v2904_v36 }
 0x2d8   :  { %v3286_v43 = vpop.eup %3285 }
 0x2d9   :  { %v3288_v23 = vpop.eup %3287  ;;  %3180 = vst.msk [vmem:[%s5467_s3 + $0x158] sm:$0xff] %vm232_vm0, %v3286_v43 }
 0x2da   :  { %3179 = vst.msk [vmem:[%s5467_s3 + $0x150] sm:$0xff] %vm232_vm0, %v3288_v23 }
 0x2dc   :  { %v3290_v39 = vpop.eup %3289 }
 0x2dd   :  { %v3292_v25 = vpop.eup %3291  ;;  %3195 = vst.msk [vmem:[%s5467_s3 + $0x168] sm:$0xff] %vm232_vm0, %v3290_v39 }
 0x2de   :  { %3181 = vst.msk [vmem:[%s5467_s3 + $0x160] sm:$0x7] %vm235_vm1, %v3292_v25 }
 0x2e0   :  { %v3294_v31 = vpop.eup %3293 }
 0x2e1   :  { %v3296_v32 = vpop.eup %3295  ;;  %3197 = vst.msk [vmem:[%s5467_s3 + $0x178] sm:$0x7] %vm235_vm1, %v3294_v31 }
 0x2e2   :  { %3196 = vst.msk [vmem:[%s5467_s3 + $0x170] sm:$0xff] %vm232_vm0, %v3296_v32 }
 0x2e3   :  { %2917 = vsyncpa [#allocation3], 1 }
 0x2e4   :  { %2918 = vsyncpa [#allocation5], 1 }

</bundles_post_ra>
